<compile_context>
chip_gen: v7x
topology: tpu7x:2x2x1
jax: 0.10.0
libtpu: 0.0.40
codegen_flags: <defaults>
</compile_context>

<pallas_src>
import functools

import jax
import jax.numpy as jnp
from jax.experimental import pallas as pl
from jax.experimental.pallas import tpu as pltpu

K_NEIGHBORS = 16
HIDDEN = 32
NUM_CLASSES = 40   # GeometricShapes dataset has 40 classes.
LANES = 128        # classifier output padded to one full lane width


# ----------------------------------------------------------------------------
# Fused Pallas kernel: one whole graph per grid step.
# ----------------------------------------------------------------------------
def _pointnet_fused_kernel(pos_ref, idx_ref,
                           w1j_ref, w1r_ref, b1_ref, w1b_ref, b1b_ref,
                           w2h_ref, w2r_ref, b2_ref, w2b_ref, b2b_ref,
                           wc_ref, bc_ref, out_ref):
    """PointNet forward for ONE graph.

    pos_ref : (npg, 3)   node positions of this graph
    idx_ref : (npg, K)   graph-local kNN indices (self included, loop=True)
    w1j     : (3, H)     = W1_h + W1_rel   (applied to pos_j)
    w1r     : (3, H)     = W1_rel          (applied to pos_i, subtracted)
    b1,b1b  : (1, H) ;  w1b : (H, H)
    w2h     : (H, H), w2r : (3, H), b2,b2b : (1, H), w2b : (H, H)
    wc      : (H, 128) zero-padded classifier weight; bc : (1, 128)
    out_ref : (1, 8, 128) lane-dense logits slab (row 0 of the 8 is used)
    """
    npg = pos_ref.shape[0]
    k_nb = idx_ref.shape[1]
    pos = pos_ref[...]                   # (npg, 3)
    idx = idx_ref[...]                   # (npg, K) int32
    # Hoisted out of the K loops (JAX does not CSE broadcast/iota inside loops).
    node_ids = jax.lax.broadcasted_iota(jnp.int32, (npg, npg), 1)

    def edge_mlp_max(table, base, w_b, b_b):
        """max_k relu( table[idx[:,k]] + base ) @ w_b + b_b, then post-layer ReLU."""
        acc = None
        for k in range(k_nb):            # short static loop, fully unrolled
            # One-hot matmul gather of rows table[idx[:, k]] (runs on the MXU).
            sel = (idx[:, k:k + 1] == node_ids).astype(jnp.float32)      # (npg, npg)
            msg = jnp.dot(sel, table, preferred_element_type=jnp.float32) + base
            msg = jnp.maximum(msg, 0.0)                                  # ReLU of first Linear
            msg = jnp.dot(msg, w_b, preferred_element_type=jnp.float32) + b_b
            acc = msg if acc is None else jnp.maximum(acc, msg)          # running VPU max (aggr='max')
        return jnp.maximum(acc, 0.0)                                     # post-layer ReLU

    # ---- conv1: message = cat([pos_j, pos_j - pos_i]) @ W1 + b1 ------------
    #            = pos_j @ (W1_h + W1_rel) - pos_i @ W1_rel + b1
    a1 = jnp.dot(pos, w1j_ref[...], preferred_element_type=jnp.float32)          # (npg, H)
    base1 = b1_ref[...] - jnp.dot(pos, w1r_ref[...],
                                  preferred_element_type=jnp.float32)            # (npg, H)
    h = edge_mlp_max(a1, base1, w1b_ref[...], b1b_ref[...])                      # (npg, H)

    # ---- conv2: message = cat([h_j, pos_j - pos_i]) @ W2 + b2 --------------
    d2 = jnp.dot(pos, w2r_ref[...], preferred_element_type=jnp.float32)          # pos @ W2_rel
    a2 = jnp.dot(h, w2h_ref[...], preferred_element_type=jnp.float32) + d2       # per-node (npg, H)
    base2 = b2_ref[...] - d2
    h = edge_mlp_max(a2, base2, w2b_ref[...], b2b_ref[...])                      # (npg, H)

    # ---- global max pool over nodes + classifier ---------------------------
    pooled = jnp.broadcast_to(jnp.max(h, axis=0, keepdims=True), (8, h.shape[1]))
    logits = jnp.dot(pooled, wc_ref[...], preferred_element_type=jnp.float32) + bc_ref[...]
    out_ref[0] = logits.astype(out_ref.dtype)                                    # (8, 128) lane-dense


# ----------------------------------------------------------------------------
# JAX glue: kNN graph + parameter preprocessing + the pallas_call wrapper
# ----------------------------------------------------------------------------
def knn_neighbor_idx(pos, batch, k):
    """knn_graph(pos, k, batch, loop=True): for every node i, the indices of its
    k nearest nodes (same graph only, self included)."""
    d2 = jnp.sum((pos[:, None, :] - pos[None, :, :]) ** 2, axis=-1)   # (N, N)
    same_graph = batch[:, None] == batch[None, :]
    d2 = jnp.where(same_graph, d2, jnp.inf)
    # TODO(synk): top-k neighbor selection has no clean Pallas equivalent; done in JAX.
    # NOTE: assumes every graph has >= k nodes (true for this synthetic setup).
    _, idx = jax.lax.top_k(-d2, k)                                    # k smallest distances
    return idx                                                        # (N, k), global indices


def pointnet_forward(params, pos, batch, *, num_graphs, nodes_per_graph):
    n = pos.shape[0]
    assert n == num_graphs * nodes_per_graph, "graphs must be contiguous & equal-sized"
    assert nodes_per_graph % 8 == 0, "nodes_per_graph must be a multiple of 8 (sublane tile)"

    # ---- kNN graph (plain JAX), converted to graph-local indices -----------
    idx = knn_neighbor_idx(pos, batch, K_NEIGHBORS)                              # (N, K)
    idx_local = (idx - (batch.astype(jnp.int32) * nodes_per_graph)[:, None]).astype(jnp.int32)

    # ---- split the concat weights: cat([h_j, rel]) @ W == h_j@W_h + rel@W_rel
    w1h, w1r = params["w1a"][:3], params["w1a"][3:]
    w1j = w1h + w1r                                   # applied directly to pos_j
    w2h, w2r = params["w2a"][:HIDDEN], params["w2a"][HIDDEN:]

    # ---- classifier padded to a full 128-lane output slab (lane-dense store)
    wc = jnp.zeros((HIDDEN, LANES), jnp.float32).at[:, :NUM_CLASSES].set(params["wc"])
    bc = jnp.zeros((1, LANES), jnp.float32).at[:, :NUM_CLASSES].set(params["bc"])

    npg = nodes_per_graph
    # Advisory cost estimate (helps XLA schedule the surrounding top_k / slices).
    per_graph_edge = 2 * K_NEIGHBORS * (2 * npg * npg * HIDDEN + 2 * npg * HIDDEN * HIDDEN)
    per_graph_node = 2 * npg * (2 * 3 * HIDDEN + HIDDEN * HIDDEN + 3 * HIDDEN) + 2 * 8 * HIDDEN * LANES
    flops = num_graphs * (per_graph_edge + per_graph_node)
    bytes_accessed = 4 * (pos.size + idx_local.size + w1j.size + w1r.size
                          + params["b1a"].size + params["w1b"].size + params["b1b"].size
                          + w2h.size + w2r.size + params["b2a"].size
                          + params["w2b"].size + params["b2b"].size
                          + wc.size + bc.size + num_graphs * 8 * LANES)

    out = pl.pallas_call(
        _pointnet_fused_kernel,
        out_shape=jax.ShapeDtypeStruct((num_graphs, 8, LANES), jnp.float32),
        grid=(num_graphs,),
        in_specs=[
            pl.BlockSpec((npg, 3), lambda g: (g, 0)),                 # pos (per graph)
            pl.BlockSpec((npg, K_NEIGHBORS), lambda g: (g, 0)),       # idx (per graph)
            pl.BlockSpec((3, HIDDEN), lambda g: (0, 0)),              # w1j = W1_h + W1_rel
            pl.BlockSpec((3, HIDDEN), lambda g: (0, 0)),              # w1r = W1_rel
            pl.BlockSpec((1, HIDDEN), lambda g: (0, 0)),              # b1
            pl.BlockSpec((HIDDEN, HIDDEN), lambda g: (0, 0)),         # w1b
            pl.BlockSpec((1, HIDDEN), lambda g: (0, 0)),              # b1b
            pl.BlockSpec((HIDDEN, HIDDEN), lambda g: (0, 0)),         # w2h
            pl.BlockSpec((3, HIDDEN), lambda g: (0, 0)),              # w2r
            pl.BlockSpec((1, HIDDEN), lambda g: (0, 0)),              # b2
            pl.BlockSpec((HIDDEN, HIDDEN), lambda g: (0, 0)),         # w2b
            pl.BlockSpec((1, HIDDEN), lambda g: (0, 0)),              # b2b
            pl.BlockSpec((HIDDEN, LANES), lambda g: (0, 0)),          # wc (padded)
            pl.BlockSpec((1, LANES), lambda g: (0, 0)),               # bc (padded)
        ],
        out_specs=pl.BlockSpec((1, 8, LANES), lambda g: (g, 0, 0)),
        compiler_params=pltpu.CompilerParams(
            dimension_semantics=("parallel",)),                       # graphs -> both v7x TCs
        cost_estimate=pl.CostEstimate(flops=flops, transcendentals=0,
                                      bytes_accessed=bytes_accessed),
    )(pos, idx_local,
      w1j, w1r, params["b1a"], params["w1b"], params["b1b"],
      w2h, w2r, params["b2a"], params["w2b"], params["b2b"],
      wc, bc)

    return out[:, 0, :NUM_CLASSES]                                    # (num_graphs, NUM_CLASSES)


# ----------------------------------------------------------------------------
# Pure-JAX reference (mirrors the PyTorch module) for a correctness check.
# ----------------------------------------------------------------------------
def pointnet_reference(params, pos, batch, num_graphs, nodes_per_graph):
    pp = jax.lax.Precision.HIGHEST
    idx = knn_neighbor_idx(pos, batch, K_NEIGHBORS)                   # (N, K)
    rel = pos[idx] - pos[:, None, :]                                  # (N, K, 3)

    x1 = jnp.concatenate([pos[idx], rel], axis=-1)                    # (N, K, 6)
    m = jnp.maximum(jnp.matmul(x1, params["w1a"], precision=pp) + params["b1a"], 0.0)
    m = jnp.matmul(m, params["w1b"], precision=pp) + params["b1b"]
    h = jnp.maximum(m.max(axis=1), 0.0)                               # (N, H)

    x2 = jnp.concatenate([h[idx], rel], axis=-1)                      # (N, K, 35)
    m = jnp.maximum(jnp.matmul(x2, params["w2a"], precision=pp) + params["b2a"], 0.0)
    m = jnp.matmul(m, params["w2b"], precision=pp) + params["b2b"]
    h = jnp.maximum(m.max(axis=1), 0.0)                               # (N, H)

    pooled = h.reshape(num_graphs, nodes_per_graph, HIDDEN).max(axis=1)
    return jnp.matmul(pooled, params["wc"], precision=pp) + params["bc"]


# ----------------------------------------------------------------------------
# Deterministic parameter init (PyTorch Linear default: U(-1/sqrt(fan_in), ...))
# ----------------------------------------------------------------------------
def _linear_params(key, fan_in, fan_out):
    kw, kb = jax.random.split(key)
    bound = 1.0 / jnp.sqrt(fan_in)
    w = jax.random.uniform(kw, (fan_in, fan_out), jnp.float32, -bound, bound)
    b = jax.random.uniform(kb, (1, fan_out), jnp.float32, -bound, bound)
    return w, b


def init_params(key):
    keys = jax.random.split(key, 5)
    w1a, b1a = _linear_params(keys[0], 3 + 3, HIDDEN)        # conv1.mlp[0]
    w1b, b1b = _linear_params(keys[1], HIDDEN, HIDDEN)       # conv1.mlp[2]
    w2a, b2a = _linear_params(keys[2], HIDDEN + 3, HIDDEN)   # conv2.mlp[0]
    w2b, b2b = _linear_params(keys[3], HIDDEN, HIDDEN)       # conv2.mlp[2]
    wc, bc = _linear_params(keys[4], HIDDEN, NUM_CLASSES)    # classifier
    return dict(w1a=w1a, b1a=b1a, w1b=w1b, b1b=b1b,
                w2a=w2a, b2a=b2a, w2b=w2b, b2b=b2b, wc=wc, bc=bc)


# ----------------------------------------------------------------------------
if __name__ == "__main__":
    key = jax.random.PRNGKey(0)
    k_params, k_pos = jax.random.split(key)

    num_graphs = 2
    nodes_per_graph = 32
    n = num_graphs * nodes_per_graph

    pos = jax.random.normal(k_pos, (n, 3), dtype=jnp.float32)
    batch = jnp.repeat(jnp.arange(num_graphs, dtype=jnp.int32), nodes_per_graph)

    params = init_params(k_params)

    fwd = jax.jit(functools.partial(pointnet_forward,
                                    num_graphs=num_graphs,
                                    nodes_per_graph=nodes_per_graph))
    logits = jax.block_until_ready(fwd(params, pos, batch))

    assert logits.shape == (num_graphs, NUM_CLASSES)
    assert jnp.all(jnp.isfinite(logits))

    # Correctness vs. a straightforward JAX implementation of the PyTorch module.
    ref = jax.block_until_ready(
        pointnet_reference(params, pos, batch, num_graphs, nodes_per_graph))
    max_err = float(jnp.max(jnp.abs(logits - ref)))
    assert max_err < 5e-2, f"mismatch vs reference: max abs err = {max_err}"

    print("KERNEL_OK")
</pallas_src>

<mosaic_0001>
module attributes {stable_mosaic.version = 11 : i64} {
  func.func @_pointnet_fused_kernel(%arg0: i32, %arg1: memref<32x3xf32, #tpu.memory_space<vmem>>, %arg2: memref<32x16xi32, #tpu.memory_space<vmem>>, %arg3: memref<3x32xf32, #tpu.memory_space<vmem>>, %arg4: memref<3x32xf32, #tpu.memory_space<vmem>>, %arg5: memref<1x32xf32, #tpu.memory_space<vmem>>, %arg6: memref<32x32xf32, #tpu.memory_space<vmem>>, %arg7: memref<1x32xf32, #tpu.memory_space<vmem>>, %arg8: memref<32x32xf32, #tpu.memory_space<vmem>>, %arg9: memref<3x32xf32, #tpu.memory_space<vmem>>, %arg10: memref<1x32xf32, #tpu.memory_space<vmem>>, %arg11: memref<32x32xf32, #tpu.memory_space<vmem>>, %arg12: memref<1x32xf32, #tpu.memory_space<vmem>>, %arg13: memref<32x128xf32, #tpu.memory_space<vmem>>, %arg14: memref<1x128xf32, #tpu.memory_space<vmem>>, %arg15: memref<1x8x128xf32, #tpu.memory_space<vmem>>) attributes {dimension_semantics = [#tpu.dimension_semantics<parallel>], iteration_bounds = array<i64: 2>, scalar_prefetch = 0 : i64, scratch_operands = 0 : i64, tpu.core_type = #tpu.core_type<tc>, window_params = [{transform_indices = @transform_0, window_bounds = array<i64: 32, 3>}, {transform_indices = @transform_1, window_bounds = array<i64: 32, 16>}, {pipeline_mode = #tpu.pipeline_mode<synchronous>, transform_indices = @transform_2, window_bounds = array<i64: 3, 32>}, {pipeline_mode = #tpu.pipeline_mode<synchronous>, transform_indices = @transform_3, window_bounds = array<i64: 3, 32>}, {pipeline_mode = #tpu.pipeline_mode<synchronous>, transform_indices = @transform_4, window_bounds = array<i64: 1, 32>}, {pipeline_mode = #tpu.pipeline_mode<synchronous>, transform_indices = @transform_5, window_bounds = array<i64: 32, 32>}, {pipeline_mode = #tpu.pipeline_mode<synchronous>, transform_indices = @transform_6, window_bounds = array<i64: 1, 32>}, {pipeline_mode = #tpu.pipeline_mode<synchronous>, transform_indices = @transform_7, window_bounds = array<i64: 32, 32>}, {pipeline_mode = #tpu.pipeline_mode<synchronous>, transform_indices = @transform_8, window_bounds = array<i64: 3, 32>}, {pipeline_mode = #tpu.pipeline_mode<synchronous>, transform_indices = @transform_9, window_bounds = array<i64: 1, 32>}, {pipeline_mode = #tpu.pipeline_mode<synchronous>, transform_indices = @transform_10, window_bounds = array<i64: 32, 32>}, {pipeline_mode = #tpu.pipeline_mode<synchronous>, transform_indices = @transform_11, window_bounds = array<i64: 1, 32>}, {pipeline_mode = #tpu.pipeline_mode<synchronous>, transform_indices = @transform_12, window_bounds = array<i64: 32, 128>}, {pipeline_mode = #tpu.pipeline_mode<synchronous>, transform_indices = @transform_13, window_bounds = array<i64: 1, 128>}, {transform_indices = @transform_14, window_bounds = array<i64: 1, 8, 128>}]} {
    %c0 = arith.constant 0 : index
    %c0_0 = arith.constant 0 : index
    %0 = vector.load %arg1[%c0, %c0_0] : memref<32x3xf32, #tpu.memory_space<vmem>>, vector<32x3xf32>
    %c0_1 = arith.constant 0 : index
    %c0_2 = arith.constant 0 : index
    %1 = vector.load %arg2[%c0_1, %c0_2] : memref<32x16xi32, #tpu.memory_space<vmem>>, vector<32x16xi32>
    %2 = tpu.iota {dimensions = array<i32: 1>} : vector<32x32xi32>
    %c0_3 = arith.constant 0 : index
    %c0_4 = arith.constant 0 : index
    %3 = vector.load %arg3[%c0_3, %c0_4] : memref<3x32xf32, #tpu.memory_space<vmem>>, vector<3x32xf32>
    %cst = arith.constant dense<0.000000e+00> : vector<32x32xf32>
    %4 = tpu.matmul %0, %3, %cst {dimension_numbers = #tpu.dot_dimension_numbers<[1], [0], [0], [1], [0, 0, 1, 1], [], []>} : vector<32x3xf32>, vector<3x32xf32>, vector<32x32xf32> -> vector<32x32xf32>
    %c0_5 = arith.constant 0 : index
    %c0_6 = arith.constant 0 : index
    %5 = vector.load %arg5[%c0_5, %c0_6] : memref<1x32xf32, #tpu.memory_space<vmem>>, vector<1x32xf32>
    %c0_7 = arith.constant 0 : index
    %c0_8 = arith.constant 0 : index
    %6 = vector.load %arg4[%c0_7, %c0_8] : memref<3x32xf32, #tpu.memory_space<vmem>>, vector<3x32xf32>
    %cst_9 = arith.constant dense<0.000000e+00> : vector<32x32xf32>
    %7 = tpu.matmul %0, %6, %cst_9 {dimension_numbers = #tpu.dot_dimension_numbers<[1], [0], [0], [1], [0, 0, 1, 1], [], []>} : vector<32x3xf32>, vector<3x32xf32>, vector<32x32xf32> -> vector<32x32xf32>
    %8 = vector.broadcast %5 : vector<1x32xf32> to vector<32x32xf32>
    %9 = arith.subf %8, %7 : vector<32x32xf32>
    %c0_10 = arith.constant 0 : index
    %c0_11 = arith.constant 0 : index
    %10 = vector.load %arg6[%c0_10, %c0_11] : memref<32x32xf32, #tpu.memory_space<vmem>>, vector<32x32xf32>
    %c0_12 = arith.constant 0 : index
    %c0_13 = arith.constant 0 : index
    %11 = vector.load %arg7[%c0_12, %c0_13] : memref<1x32xf32, #tpu.memory_space<vmem>>, vector<1x32xf32>
    %12 = vector.extract_strided_slice %1 {offsets = [0, 0], sizes = [32, 1], strides = [1, 1]} : vector<32x16xi32> to vector<32x1xi32>
    %13 = vector.broadcast %12 : vector<32x1xi32> to vector<32x32xi32>
    %14 = arith.cmpi eq, %13, %2 : vector<32x32xi32>
    %15 = arith.extui %14 : vector<32x32xi1> to vector<32x32xi32>
    %16 = arith.sitofp %15 : vector<32x32xi32> to vector<32x32xf32>
    %cst_14 = arith.constant dense<0.000000e+00> : vector<32x32xf32>
    %17 = tpu.matmul %16, %4, %cst_14 {dimension_numbers = #tpu.dot_dimension_numbers<[1], [0], [0], [1], [0, 0, 1, 1], [], []>} : vector<32x32xf32>, vector<32x32xf32>, vector<32x32xf32> -> vector<32x32xf32>
    %18 = arith.addf %17, %9 : vector<32x32xf32>
    %cst_15 = arith.constant 0.000000e+00 : f32
    %19 = vector.broadcast %cst_15 : f32 to vector<32x32xf32>
    %20 = arith.maximumf %18, %19 : vector<32x32xf32>
    %cst_16 = arith.constant dense<0.000000e+00> : vector<32x32xf32>
    %21 = tpu.matmul %20, %10, %cst_16 {dimension_numbers = #tpu.dot_dimension_numbers<[1], [0], [0], [1], [0, 0, 1, 1], [], []>} : vector<32x32xf32>, vector<32x32xf32>, vector<32x32xf32> -> vector<32x32xf32>
    %22 = vector.broadcast %11 : vector<1x32xf32> to vector<32x32xf32>
    %23 = arith.addf %21, %22 : vector<32x32xf32>
    %24 = vector.extract_strided_slice %1 {offsets = [0, 1], sizes = [32, 1], strides = [1, 1]} : vector<32x16xi32> to vector<32x1xi32>
    %25 = vector.broadcast %24 : vector<32x1xi32> to vector<32x32xi32>
    %26 = arith.cmpi eq, %25, %2 : vector<32x32xi32>
    %27 = arith.extui %26 : vector<32x32xi1> to vector<32x32xi32>
    %28 = arith.sitofp %27 : vector<32x32xi32> to vector<32x32xf32>
    %cst_17 = arith.constant dense<0.000000e+00> : vector<32x32xf32>
    %29 = tpu.matmul %28, %4, %cst_17 {dimension_numbers = #tpu.dot_dimension_numbers<[1], [0], [0], [1], [0, 0, 1, 1], [], []>} : vector<32x32xf32>, vector<32x32xf32>, vector<32x32xf32> -> vector<32x32xf32>
    %30 = arith.addf %29, %9 : vector<32x32xf32>
    %cst_18 = arith.constant 0.000000e+00 : f32
    %31 = vector.broadcast %cst_18 : f32 to vector<32x32xf32>
    %32 = arith.maximumf %30, %31 : vector<32x32xf32>
    %cst_19 = arith.constant dense<0.000000e+00> : vector<32x32xf32>
    %33 = tpu.matmul %32, %10, %cst_19 {dimension_numbers = #tpu.dot_dimension_numbers<[1], [0], [0], [1], [0, 0, 1, 1], [], []>} : vector<32x32xf32>, vector<32x32xf32>, vector<32x32xf32> -> vector<32x32xf32>
    %34 = vector.broadcast %11 : vector<1x32xf32> to vector<32x32xf32>
    %35 = arith.addf %33, %34 : vector<32x32xf32>
    %36 = arith.maximumf %23, %35 : vector<32x32xf32>
    %37 = vector.extract_strided_slice %1 {offsets = [0, 2], sizes = [32, 1], strides = [1, 1]} : vector<32x16xi32> to vector<32x1xi32>
    %38 = vector.broadcast %37 : vector<32x1xi32> to vector<32x32xi32>
    %39 = arith.cmpi eq, %38, %2 : vector<32x32xi32>
    %40 = arith.extui %39 : vector<32x32xi1> to vector<32x32xi32>
    %41 = arith.sitofp %40 : vector<32x32xi32> to vector<32x32xf32>
    %cst_20 = arith.constant dense<0.000000e+00> : vector<32x32xf32>
    %42 = tpu.matmul %41, %4, %cst_20 {dimension_numbers = #tpu.dot_dimension_numbers<[1], [0], [0], [1], [0, 0, 1, 1], [], []>} : vector<32x32xf32>, vector<32x32xf32>, vector<32x32xf32> -> vector<32x32xf32>
    %43 = arith.addf %42, %9 : vector<32x32xf32>
    %cst_21 = arith.constant 0.000000e+00 : f32
    %44 = vector.broadcast %cst_21 : f32 to vector<32x32xf32>
    %45 = arith.maximumf %43, %44 : vector<32x32xf32>
    %cst_22 = arith.constant dense<0.000000e+00> : vector<32x32xf32>
    %46 = tpu.matmul %45, %10, %cst_22 {dimension_numbers = #tpu.dot_dimension_numbers<[1], [0], [0], [1], [0, 0, 1, 1], [], []>} : vector<32x32xf32>, vector<32x32xf32>, vector<32x32xf32> -> vector<32x32xf32>
    %47 = vector.broadcast %11 : vector<1x32xf32> to vector<32x32xf32>
    %48 = arith.addf %46, %47 : vector<32x32xf32>
    %49 = arith.maximumf %36, %48 : vector<32x32xf32>
    %50 = vector.extract_strided_slice %1 {offsets = [0, 3], sizes = [32, 1], strides = [1, 1]} : vector<32x16xi32> to vector<32x1xi32>
    %51 = vector.broadcast %50 : vector<32x1xi32> to vector<32x32xi32>
    %52 = arith.cmpi eq, %51, %2 : vector<32x32xi32>
    %53 = arith.extui %52 : vector<32x32xi1> to vector<32x32xi32>
    %54 = arith.sitofp %53 : vector<32x32xi32> to vector<32x32xf32>
    %cst_23 = arith.constant dense<0.000000e+00> : vector<32x32xf32>
    %55 = tpu.matmul %54, %4, %cst_23 {dimension_numbers = #tpu.dot_dimension_numbers<[1], [0], [0], [1], [0, 0, 1, 1], [], []>} : vector<32x32xf32>, vector<32x32xf32>, vector<32x32xf32> -> vector<32x32xf32>
    %56 = arith.addf %55, %9 : vector<32x32xf32>
    %cst_24 = arith.constant 0.000000e+00 : f32
    %57 = vector.broadcast %cst_24 : f32 to vector<32x32xf32>
    %58 = arith.maximumf %56, %57 : vector<32x32xf32>
    %cst_25 = arith.constant dense<0.000000e+00> : vector<32x32xf32>
    %59 = tpu.matmul %58, %10, %cst_25 {dimension_numbers = #tpu.dot_dimension_numbers<[1], [0], [0], [1], [0, 0, 1, 1], [], []>} : vector<32x32xf32>, vector<32x32xf32>, vector<32x32xf32> -> vector<32x32xf32>
    %60 = vector.broadcast %11 : vector<1x32xf32> to vector<32x32xf32>
    %61 = arith.addf %59, %60 : vector<32x32xf32>
    %62 = arith.maximumf %49, %61 : vector<32x32xf32>
    %63 = vector.extract_strided_slice %1 {offsets = [0, 4], sizes = [32, 1], strides = [1, 1]} : vector<32x16xi32> to vector<32x1xi32>
    %64 = vector.broadcast %63 : vector<32x1xi32> to vector<32x32xi32>
    %65 = arith.cmpi eq, %64, %2 : vector<32x32xi32>
    %66 = arith.extui %65 : vector<32x32xi1> to vector<32x32xi32>
    %67 = arith.sitofp %66 : vector<32x32xi32> to vector<32x32xf32>
    %cst_26 = arith.constant dense<0.000000e+00> : vector<32x32xf32>
    %68 = tpu.matmul %67, %4, %cst_26 {dimension_numbers = #tpu.dot_dimension_numbers<[1], [0], [0], [1], [0, 0, 1, 1], [], []>} : vector<32x32xf32>, vector<32x32xf32>, vector<32x32xf32> -> vector<32x32xf32>
    %69 = arith.addf %68, %9 : vector<32x32xf32>
    %cst_27 = arith.constant 0.000000e+00 : f32
    %70 = vector.broadcast %cst_27 : f32 to vector<32x32xf32>
    %71 = arith.maximumf %69, %70 : vector<32x32xf32>
    %cst_28 = arith.constant dense<0.000000e+00> : vector<32x32xf32>
    %72 = tpu.matmul %71, %10, %cst_28 {dimension_numbers = #tpu.dot_dimension_numbers<[1], [0], [0], [1], [0, 0, 1, 1], [], []>} : vector<32x32xf32>, vector<32x32xf32>, vector<32x32xf32> -> vector<32x32xf32>
    %73 = vector.broadcast %11 : vector<1x32xf32> to vector<32x32xf32>
    %74 = arith.addf %72, %73 : vector<32x32xf32>
    %75 = arith.maximumf %62, %74 : vector<32x32xf32>
    %76 = vector.extract_strided_slice %1 {offsets = [0, 5], sizes = [32, 1], strides = [1, 1]} : vector<32x16xi32> to vector<32x1xi32>
    %77 = vector.broadcast %76 : vector<32x1xi32> to vector<32x32xi32>
    %78 = arith.cmpi eq, %77, %2 : vector<32x32xi32>
    %79 = arith.extui %78 : vector<32x32xi1> to vector<32x32xi32>
    %80 = arith.sitofp %79 : vector<32x32xi32> to vector<32x32xf32>
    %cst_29 = arith.constant dense<0.000000e+00> : vector<32x32xf32>
    %81 = tpu.matmul %80, %4, %cst_29 {dimension_numbers = #tpu.dot_dimension_numbers<[1], [0], [0], [1], [0, 0, 1, 1], [], []>} : vector<32x32xf32>, vector<32x32xf32>, vector<32x32xf32> -> vector<32x32xf32>
    %82 = arith.addf %81, %9 : vector<32x32xf32>
    %cst_30 = arith.constant 0.000000e+00 : f32
    %83 = vector.broadcast %cst_30 : f32 to vector<32x32xf32>
    %84 = arith.maximumf %82, %83 : vector<32x32xf32>
    %cst_31 = arith.constant dense<0.000000e+00> : vector<32x32xf32>
    %85 = tpu.matmul %84, %10, %cst_31 {dimension_numbers = #tpu.dot_dimension_numbers<[1], [0], [0], [1], [0, 0, 1, 1], [], []>} : vector<32x32xf32>, vector<32x32xf32>, vector<32x32xf32> -> vector<32x32xf32>
    %86 = vector.broadcast %11 : vector<1x32xf32> to vector<32x32xf32>
    %87 = arith.addf %85, %86 : vector<32x32xf32>
    %88 = arith.maximumf %75, %87 : vector<32x32xf32>
    %89 = vector.extract_strided_slice %1 {offsets = [0, 6], sizes = [32, 1], strides = [1, 1]} : vector<32x16xi32> to vector<32x1xi32>
    %90 = vector.broadcast %89 : vector<32x1xi32> to vector<32x32xi32>
    %91 = arith.cmpi eq, %90, %2 : vector<32x32xi32>
    %92 = arith.extui %91 : vector<32x32xi1> to vector<32x32xi32>
    %93 = arith.sitofp %92 : vector<32x32xi32> to vector<32x32xf32>
    %cst_32 = arith.constant dense<0.000000e+00> : vector<32x32xf32>
    %94 = tpu.matmul %93, %4, %cst_32 {dimension_numbers = #tpu.dot_dimension_numbers<[1], [0], [0], [1], [0, 0, 1, 1], [], []>} : vector<32x32xf32>, vector<32x32xf32>, vector<32x32xf32> -> vector<32x32xf32>
    %95 = arith.addf %94, %9 : vector<32x32xf32>
    %cst_33 = arith.constant 0.000000e+00 : f32
    %96 = vector.broadcast %cst_33 : f32 to vector<32x32xf32>
    %97 = arith.maximumf %95, %96 : vector<32x32xf32>
    %cst_34 = arith.constant dense<0.000000e+00> : vector<32x32xf32>
    %98 = tpu.matmul %97, %10, %cst_34 {dimension_numbers = #tpu.dot_dimension_numbers<[1], [0], [0], [1], [0, 0, 1, 1], [], []>} : vector<32x32xf32>, vector<32x32xf32>, vector<32x32xf32> -> vector<32x32xf32>
    %99 = vector.broadcast %11 : vector<1x32xf32> to vector<32x32xf32>
    %100 = arith.addf %98, %99 : vector<32x32xf32>
    %101 = arith.maximumf %88, %100 : vector<32x32xf32>
    %102 = vector.extract_strided_slice %1 {offsets = [0, 7], sizes = [32, 1], strides = [1, 1]} : vector<32x16xi32> to vector<32x1xi32>
    %103 = vector.broadcast %102 : vector<32x1xi32> to vector<32x32xi32>
    %104 = arith.cmpi eq, %103, %2 : vector<32x32xi32>
    %105 = arith.extui %104 : vector<32x32xi1> to vector<32x32xi32>
    %106 = arith.sitofp %105 : vector<32x32xi32> to vector<32x32xf32>
    %cst_35 = arith.constant dense<0.000000e+00> : vector<32x32xf32>
    %107 = tpu.matmul %106, %4, %cst_35 {dimension_numbers = #tpu.dot_dimension_numbers<[1], [0], [0], [1], [0, 0, 1, 1], [], []>} : vector<32x32xf32>, vector<32x32xf32>, vector<32x32xf32> -> vector<32x32xf32>
    %108 = arith.addf %107, %9 : vector<32x32xf32>
    %cst_36 = arith.constant 0.000000e+00 : f32
    %109 = vector.broadcast %cst_36 : f32 to vector<32x32xf32>
    %110 = arith.maximumf %108, %109 : vector<32x32xf32>
    %cst_37 = arith.constant dense<0.000000e+00> : vector<32x32xf32>
    %111 = tpu.matmul %110, %10, %cst_37 {dimension_numbers = #tpu.dot_dimension_numbers<[1], [0], [0], [1], [0, 0, 1, 1], [], []>} : vector<32x32xf32>, vector<32x32xf32>, vector<32x32xf32> -> vector<32x32xf32>
    %112 = vector.broadcast %11 : vector<1x32xf32> to vector<32x32xf32>
    %113 = arith.addf %111, %112 : vector<32x32xf32>
    %114 = arith.maximumf %101, %113 : vector<32x32xf32>
    %115 = vector.extract_strided_slice %1 {offsets = [0, 8], sizes = [32, 1], strides = [1, 1]} : vector<32x16xi32> to vector<32x1xi32>
    %116 = vector.broadcast %115 : vector<32x1xi32> to vector<32x32xi32>
    %117 = arith.cmpi eq, %116, %2 : vector<32x32xi32>
    %118 = arith.extui %117 : vector<32x32xi1> to vector<32x32xi32>
    %119 = arith.sitofp %118 : vector<32x32xi32> to vector<32x32xf32>
    %cst_38 = arith.constant dense<0.000000e+00> : vector<32x32xf32>
    %120 = tpu.matmul %119, %4, %cst_38 {dimension_numbers = #tpu.dot_dimension_numbers<[1], [0], [0], [1], [0, 0, 1, 1], [], []>} : vector<32x32xf32>, vector<32x32xf32>, vector<32x32xf32> -> vector<32x32xf32>
    %121 = arith.addf %120, %9 : vector<32x32xf32>
    %cst_39 = arith.constant 0.000000e+00 : f32
    %122 = vector.broadcast %cst_39 : f32 to vector<32x32xf32>
    %123 = arith.maximumf %121, %122 : vector<32x32xf32>
    %cst_40 = arith.constant dense<0.000000e+00> : vector<32x32xf32>
    %124 = tpu.matmul %123, %10, %cst_40 {dimension_numbers = #tpu.dot_dimension_numbers<[1], [0], [0], [1], [0, 0, 1, 1], [], []>} : vector<32x32xf32>, vector<32x32xf32>, vector<32x32xf32> -> vector<32x32xf32>
    %125 = vector.broadcast %11 : vector<1x32xf32> to vector<32x32xf32>
    %126 = arith.addf %124, %125 : vector<32x32xf32>
    %127 = arith.maximumf %114, %126 : vector<32x32xf32>
    %128 = vector.extract_strided_slice %1 {offsets = [0, 9], sizes = [32, 1], strides = [1, 1]} : vector<32x16xi32> to vector<32x1xi32>
    %129 = vector.broadcast %128 : vector<32x1xi32> to vector<32x32xi32>
    %130 = arith.cmpi eq, %129, %2 : vector<32x32xi32>
    %131 = arith.extui %130 : vector<32x32xi1> to vector<32x32xi32>
    %132 = arith.sitofp %131 : vector<32x32xi32> to vector<32x32xf32>
    %cst_41 = arith.constant dense<0.000000e+00> : vector<32x32xf32>
    %133 = tpu.matmul %132, %4, %cst_41 {dimension_numbers = #tpu.dot_dimension_numbers<[1], [0], [0], [1], [0, 0, 1, 1], [], []>} : vector<32x32xf32>, vector<32x32xf32>, vector<32x32xf32> -> vector<32x32xf32>
    %134 = arith.addf %133, %9 : vector<32x32xf32>
    %cst_42 = arith.constant 0.000000e+00 : f32
    %135 = vector.broadcast %cst_42 : f32 to vector<32x32xf32>
    %136 = arith.maximumf %134, %135 : vector<32x32xf32>
    %cst_43 = arith.constant dense<0.000000e+00> : vector<32x32xf32>
    %137 = tpu.matmul %136, %10, %cst_43 {dimension_numbers = #tpu.dot_dimension_numbers<[1], [0], [0], [1], [0, 0, 1, 1], [], []>} : vector<32x32xf32>, vector<32x32xf32>, vector<32x32xf32> -> vector<32x32xf32>
    %138 = vector.broadcast %11 : vector<1x32xf32> to vector<32x32xf32>
    %139 = arith.addf %137, %138 : vector<32x32xf32>
    %140 = arith.maximumf %127, %139 : vector<32x32xf32>
    %141 = vector.extract_strided_slice %1 {offsets = [0, 10], sizes = [32, 1], strides = [1, 1]} : vector<32x16xi32> to vector<32x1xi32>
    %142 = vector.broadcast %141 : vector<32x1xi32> to vector<32x32xi32>
    %143 = arith.cmpi eq, %142, %2 : vector<32x32xi32>
    %144 = arith.extui %143 : vector<32x32xi1> to vector<32x32xi32>
    %145 = arith.sitofp %144 : vector<32x32xi32> to vector<32x32xf32>
    %cst_44 = arith.constant dense<0.000000e+00> : vector<32x32xf32>
    %146 = tpu.matmul %145, %4, %cst_44 {dimension_numbers = #tpu.dot_dimension_numbers<[1], [0], [0], [1], [0, 0, 1, 1], [], []>} : vector<32x32xf32>, vector<32x32xf32>, vector<32x32xf32> -> vector<32x32xf32>
    %147 = arith.addf %146, %9 : vector<32x32xf32>
    %cst_45 = arith.constant 0.000000e+00 : f32
    %148 = vector.broadcast %cst_45 : f32 to vector<32x32xf32>
    %149 = arith.maximumf %147, %148 : vector<32x32xf32>
    %cst_46 = arith.constant dense<0.000000e+00> : vector<32x32xf32>
    %150 = tpu.matmul %149, %10, %cst_46 {dimension_numbers = #tpu.dot_dimension_numbers<[1], [0], [0], [1], [0, 0, 1, 1], [], []>} : vector<32x32xf32>, vector<32x32xf32>, vector<32x32xf32> -> vector<32x32xf32>
    %151 = vector.broadcast %11 : vector<1x32xf32> to vector<32x32xf32>
    %152 = arith.addf %150, %151 : vector<32x32xf32>
    %153 = arith.maximumf %140, %152 : vector<32x32xf32>
    %154 = vector.extract_strided_slice %1 {offsets = [0, 11], sizes = [32, 1], strides = [1, 1]} : vector<32x16xi32> to vector<32x1xi32>
    %155 = vector.broadcast %154 : vector<32x1xi32> to vector<32x32xi32>
    %156 = arith.cmpi eq, %155, %2 : vector<32x32xi32>
    %157 = arith.extui %156 : vector<32x32xi1> to vector<32x32xi32>
    %158 = arith.sitofp %157 : vector<32x32xi32> to vector<32x32xf32>
    %cst_47 = arith.constant dense<0.000000e+00> : vector<32x32xf32>
    %159 = tpu.matmul %158, %4, %cst_47 {dimension_numbers = #tpu.dot_dimension_numbers<[1], [0], [0], [1], [0, 0, 1, 1], [], []>} : vector<32x32xf32>, vector<32x32xf32>, vector<32x32xf32> -> vector<32x32xf32>
    %160 = arith.addf %159, %9 : vector<32x32xf32>
    %cst_48 = arith.constant 0.000000e+00 : f32
    %161 = vector.broadcast %cst_48 : f32 to vector<32x32xf32>
    %162 = arith.maximumf %160, %161 : vector<32x32xf32>
    %cst_49 = arith.constant dense<0.000000e+00> : vector<32x32xf32>
    %163 = tpu.matmul %162, %10, %cst_49 {dimension_numbers = #tpu.dot_dimension_numbers<[1], [0], [0], [1], [0, 0, 1, 1], [], []>} : vector<32x32xf32>, vector<32x32xf32>, vector<32x32xf32> -> vector<32x32xf32>
    %164 = vector.broadcast %11 : vector<1x32xf32> to vector<32x32xf32>
    %165 = arith.addf %163, %164 : vector<32x32xf32>
    %166 = arith.maximumf %153, %165 : vector<32x32xf32>
    %167 = vector.extract_strided_slice %1 {offsets = [0, 12], sizes = [32, 1], strides = [1, 1]} : vector<32x16xi32> to vector<32x1xi32>
    %168 = vector.broadcast %167 : vector<32x1xi32> to vector<32x32xi32>
    %169 = arith.cmpi eq, %168, %2 : vector<32x32xi32>
    %170 = arith.extui %169 : vector<32x32xi1> to vector<32x32xi32>
    %171 = arith.sitofp %170 : vector<32x32xi32> to vector<32x32xf32>
    %cst_50 = arith.constant dense<0.000000e+00> : vector<32x32xf32>
    %172 = tpu.matmul %171, %4, %cst_50 {dimension_numbers = #tpu.dot_dimension_numbers<[1], [0], [0], [1], [0, 0, 1, 1], [], []>} : vector<32x32xf32>, vector<32x32xf32>, vector<32x32xf32> -> vector<32x32xf32>
    %173 = arith.addf %172, %9 : vector<32x32xf32>
    %cst_51 = arith.constant 0.000000e+00 : f32
    %174 = vector.broadcast %cst_51 : f32 to vector<32x32xf32>
    %175 = arith.maximumf %173, %174 : vector<32x32xf32>
    %cst_52 = arith.constant dense<0.000000e+00> : vector<32x32xf32>
    %176 = tpu.matmul %175, %10, %cst_52 {dimension_numbers = #tpu.dot_dimension_numbers<[1], [0], [0], [1], [0, 0, 1, 1], [], []>} : vector<32x32xf32>, vector<32x32xf32>, vector<32x32xf32> -> vector<32x32xf32>
    %177 = vector.broadcast %11 : vector<1x32xf32> to vector<32x32xf32>
    %178 = arith.addf %176, %177 : vector<32x32xf32>
    %179 = arith.maximumf %166, %178 : vector<32x32xf32>
    %180 = vector.extract_strided_slice %1 {offsets = [0, 13], sizes = [32, 1], strides = [1, 1]} : vector<32x16xi32> to vector<32x1xi32>
    %181 = vector.broadcast %180 : vector<32x1xi32> to vector<32x32xi32>
    %182 = arith.cmpi eq, %181, %2 : vector<32x32xi32>
    %183 = arith.extui %182 : vector<32x32xi1> to vector<32x32xi32>
    %184 = arith.sitofp %183 : vector<32x32xi32> to vector<32x32xf32>
    %cst_53 = arith.constant dense<0.000000e+00> : vector<32x32xf32>
    %185 = tpu.matmul %184, %4, %cst_53 {dimension_numbers = #tpu.dot_dimension_numbers<[1], [0], [0], [1], [0, 0, 1, 1], [], []>} : vector<32x32xf32>, vector<32x32xf32>, vector<32x32xf32> -> vector<32x32xf32>
    %186 = arith.addf %185, %9 : vector<32x32xf32>
    %cst_54 = arith.constant 0.000000e+00 : f32
    %187 = vector.broadcast %cst_54 : f32 to vector<32x32xf32>
    %188 = arith.maximumf %186, %187 : vector<32x32xf32>
    %cst_55 = arith.constant dense<0.000000e+00> : vector<32x32xf32>
    %189 = tpu.matmul %188, %10, %cst_55 {dimension_numbers = #tpu.dot_dimension_numbers<[1], [0], [0], [1], [0, 0, 1, 1], [], []>} : vector<32x32xf32>, vector<32x32xf32>, vector<32x32xf32> -> vector<32x32xf32>
    %190 = vector.broadcast %11 : vector<1x32xf32> to vector<32x32xf32>
    %191 = arith.addf %189, %190 : vector<32x32xf32>
    %192 = arith.maximumf %179, %191 : vector<32x32xf32>
    %193 = vector.extract_strided_slice %1 {offsets = [0, 14], sizes = [32, 1], strides = [1, 1]} : vector<32x16xi32> to vector<32x1xi32>
    %194 = vector.broadcast %193 : vector<32x1xi32> to vector<32x32xi32>
    %195 = arith.cmpi eq, %194, %2 : vector<32x32xi32>
    %196 = arith.extui %195 : vector<32x32xi1> to vector<32x32xi32>
    %197 = arith.sitofp %196 : vector<32x32xi32> to vector<32x32xf32>
    %cst_56 = arith.constant dense<0.000000e+00> : vector<32x32xf32>
    %198 = tpu.matmul %197, %4, %cst_56 {dimension_numbers = #tpu.dot_dimension_numbers<[1], [0], [0], [1], [0, 0, 1, 1], [], []>} : vector<32x32xf32>, vector<32x32xf32>, vector<32x32xf32> -> vector<32x32xf32>
    %199 = arith.addf %198, %9 : vector<32x32xf32>
    %cst_57 = arith.constant 0.000000e+00 : f32
    %200 = vector.broadcast %cst_57 : f32 to vector<32x32xf32>
    %201 = arith.maximumf %199, %200 : vector<32x32xf32>
    %cst_58 = arith.constant dense<0.000000e+00> : vector<32x32xf32>
    %202 = tpu.matmul %201, %10, %cst_58 {dimension_numbers = #tpu.dot_dimension_numbers<[1], [0], [0], [1], [0, 0, 1, 1], [], []>} : vector<32x32xf32>, vector<32x32xf32>, vector<32x32xf32> -> vector<32x32xf32>
    %203 = vector.broadcast %11 : vector<1x32xf32> to vector<32x32xf32>
    %204 = arith.addf %202, %203 : vector<32x32xf32>
    %205 = arith.maximumf %192, %204 : vector<32x32xf32>
    %206 = vector.extract_strided_slice %1 {offsets = [0, 15], sizes = [32, 1], strides = [1, 1]} : vector<32x16xi32> to vector<32x1xi32>
    %207 = vector.broadcast %206 : vector<32x1xi32> to vector<32x32xi32>
    %208 = arith.cmpi eq, %207, %2 : vector<32x32xi32>
    %209 = arith.extui %208 : vector<32x32xi1> to vector<32x32xi32>
    %210 = arith.sitofp %209 : vector<32x32xi32> to vector<32x32xf32>
    %cst_59 = arith.constant dense<0.000000e+00> : vector<32x32xf32>
    %211 = tpu.matmul %210, %4, %cst_59 {dimension_numbers = #tpu.dot_dimension_numbers<[1], [0], [0], [1], [0, 0, 1, 1], [], []>} : vector<32x32xf32>, vector<32x32xf32>, vector<32x32xf32> -> vector<32x32xf32>
    %212 = arith.addf %211, %9 : vector<32x32xf32>
    %cst_60 = arith.constant 0.000000e+00 : f32
    %213 = vector.broadcast %cst_60 : f32 to vector<32x32xf32>
    %214 = arith.maximumf %212, %213 : vector<32x32xf32>
    %cst_61 = arith.constant dense<0.000000e+00> : vector<32x32xf32>
    %215 = tpu.matmul %214, %10, %cst_61 {dimension_numbers = #tpu.dot_dimension_numbers<[1], [0], [0], [1], [0, 0, 1, 1], [], []>} : vector<32x32xf32>, vector<32x32xf32>, vector<32x32xf32> -> vector<32x32xf32>
    %216 = vector.broadcast %11 : vector<1x32xf32> to vector<32x32xf32>
    %217 = arith.addf %215, %216 : vector<32x32xf32>
    %218 = arith.maximumf %205, %217 : vector<32x32xf32>
    %cst_62 = arith.constant 0.000000e+00 : f32
    %219 = vector.broadcast %cst_62 : f32 to vector<32x32xf32>
    %220 = arith.maximumf %218, %219 : vector<32x32xf32>
    %c0_63 = arith.constant 0 : index
    %c0_64 = arith.constant 0 : index
    %221 = vector.load %arg9[%c0_63, %c0_64] : memref<3x32xf32, #tpu.memory_space<vmem>>, vector<3x32xf32>
    %cst_65 = arith.constant dense<0.000000e+00> : vector<32x32xf32>
    %222 = tpu.matmul %0, %221, %cst_65 {dimension_numbers = #tpu.dot_dimension_numbers<[1], [0], [0], [1], [0, 0, 1, 1], [], []>} : vector<32x3xf32>, vector<3x32xf32>, vector<32x32xf32> -> vector<32x32xf32>
    %c0_66 = arith.constant 0 : index
    %c0_67 = arith.constant 0 : index
    %223 = vector.load %arg8[%c0_66, %c0_67] : memref<32x32xf32, #tpu.memory_space<vmem>>, vector<32x32xf32>
    %cst_68 = arith.constant dense<0.000000e+00> : vector<32x32xf32>
    %224 = tpu.matmul %220, %223, %cst_68 {dimension_numbers = #tpu.dot_dimension_numbers<[1], [0], [0], [1], [0, 0, 1, 1], [], []>} : vector<32x32xf32>, vector<32x32xf32>, vector<32x32xf32> -> vector<32x32xf32>
    %225 = arith.addf %224, %222 : vector<32x32xf32>
    %c0_69 = arith.constant 0 : index
    %c0_70 = arith.constant 0 : index
    %226 = vector.load %arg10[%c0_69, %c0_70] : memref<1x32xf32, #tpu.memory_space<vmem>>, vector<1x32xf32>
    %227 = vector.broadcast %226 : vector<1x32xf32> to vector<32x32xf32>
    %228 = arith.subf %227, %222 : vector<32x32xf32>
    %c0_71 = arith.constant 0 : index
    %c0_72 = arith.constant 0 : index
    %229 = vector.load %arg11[%c0_71, %c0_72] : memref<32x32xf32, #tpu.memory_space<vmem>>, vector<32x32xf32>
    %c0_73 = arith.constant 0 : index
    %c0_74 = arith.constant 0 : index
    %230 = vector.load %arg12[%c0_73, %c0_74] : memref<1x32xf32, #tpu.memory_space<vmem>>, vector<1x32xf32>
    %231 = vector.extract_strided_slice %1 {offsets = [0, 0], sizes = [32, 1], strides = [1, 1]} : vector<32x16xi32> to vector<32x1xi32>
    %232 = vector.broadcast %231 : vector<32x1xi32> to vector<32x32xi32>
    %233 = arith.cmpi eq, %232, %2 : vector<32x32xi32>
    %234 = arith.extui %233 : vector<32x32xi1> to vector<32x32xi32>
    %235 = arith.sitofp %234 : vector<32x32xi32> to vector<32x32xf32>
    %cst_75 = arith.constant dense<0.000000e+00> : vector<32x32xf32>
    %236 = tpu.matmul %235, %225, %cst_75 {dimension_numbers = #tpu.dot_dimension_numbers<[1], [0], [0], [1], [0, 0, 1, 1], [], []>} : vector<32x32xf32>, vector<32x32xf32>, vector<32x32xf32> -> vector<32x32xf32>
    %237 = arith.addf %236, %228 : vector<32x32xf32>
    %cst_76 = arith.constant 0.000000e+00 : f32
    %238 = vector.broadcast %cst_76 : f32 to vector<32x32xf32>
    %239 = arith.maximumf %237, %238 : vector<32x32xf32>
    %cst_77 = arith.constant dense<0.000000e+00> : vector<32x32xf32>
    %240 = tpu.matmul %239, %229, %cst_77 {dimension_numbers = #tpu.dot_dimension_numbers<[1], [0], [0], [1], [0, 0, 1, 1], [], []>} : vector<32x32xf32>, vector<32x32xf32>, vector<32x32xf32> -> vector<32x32xf32>
    %241 = vector.broadcast %230 : vector<1x32xf32> to vector<32x32xf32>
    %242 = arith.addf %240, %241 : vector<32x32xf32>
    %243 = vector.extract_strided_slice %1 {offsets = [0, 1], sizes = [32, 1], strides = [1, 1]} : vector<32x16xi32> to vector<32x1xi32>
    %244 = vector.broadcast %243 : vector<32x1xi32> to vector<32x32xi32>
    %245 = arith.cmpi eq, %244, %2 : vector<32x32xi32>
    %246 = arith.extui %245 : vector<32x32xi1> to vector<32x32xi32>
    %247 = arith.sitofp %246 : vector<32x32xi32> to vector<32x32xf32>
    %cst_78 = arith.constant dense<0.000000e+00> : vector<32x32xf32>
    %248 = tpu.matmul %247, %225, %cst_78 {dimension_numbers = #tpu.dot_dimension_numbers<[1], [0], [0], [1], [0, 0, 1, 1], [], []>} : vector<32x32xf32>, vector<32x32xf32>, vector<32x32xf32> -> vector<32x32xf32>
    %249 = arith.addf %248, %228 : vector<32x32xf32>
    %cst_79 = arith.constant 0.000000e+00 : f32
    %250 = vector.broadcast %cst_79 : f32 to vector<32x32xf32>
    %251 = arith.maximumf %249, %250 : vector<32x32xf32>
    %cst_80 = arith.constant dense<0.000000e+00> : vector<32x32xf32>
    %252 = tpu.matmul %251, %229, %cst_80 {dimension_numbers = #tpu.dot_dimension_numbers<[1], [0], [0], [1], [0, 0, 1, 1], [], []>} : vector<32x32xf32>, vector<32x32xf32>, vector<32x32xf32> -> vector<32x32xf32>
    %253 = vector.broadcast %230 : vector<1x32xf32> to vector<32x32xf32>
    %254 = arith.addf %252, %253 : vector<32x32xf32>
    %255 = arith.maximumf %242, %254 : vector<32x32xf32>
    %256 = vector.extract_strided_slice %1 {offsets = [0, 2], sizes = [32, 1], strides = [1, 1]} : vector<32x16xi32> to vector<32x1xi32>
    %257 = vector.broadcast %256 : vector<32x1xi32> to vector<32x32xi32>
    %258 = arith.cmpi eq, %257, %2 : vector<32x32xi32>
    %259 = arith.extui %258 : vector<32x32xi1> to vector<32x32xi32>
    %260 = arith.sitofp %259 : vector<32x32xi32> to vector<32x32xf32>
    %cst_81 = arith.constant dense<0.000000e+00> : vector<32x32xf32>
    %261 = tpu.matmul %260, %225, %cst_81 {dimension_numbers = #tpu.dot_dimension_numbers<[1], [0], [0], [1], [0, 0, 1, 1], [], []>} : vector<32x32xf32>, vector<32x32xf32>, vector<32x32xf32> -> vector<32x32xf32>
    %262 = arith.addf %261, %228 : vector<32x32xf32>
    %cst_82 = arith.constant 0.000000e+00 : f32
    %263 = vector.broadcast %cst_82 : f32 to vector<32x32xf32>
    %264 = arith.maximumf %262, %263 : vector<32x32xf32>
    %cst_83 = arith.constant dense<0.000000e+00> : vector<32x32xf32>
    %265 = tpu.matmul %264, %229, %cst_83 {dimension_numbers = #tpu.dot_dimension_numbers<[1], [0], [0], [1], [0, 0, 1, 1], [], []>} : vector<32x32xf32>, vector<32x32xf32>, vector<32x32xf32> -> vector<32x32xf32>
    %266 = vector.broadcast %230 : vector<1x32xf32> to vector<32x32xf32>
    %267 = arith.addf %265, %266 : vector<32x32xf32>
    %268 = arith.maximumf %255, %267 : vector<32x32xf32>
    %269 = vector.extract_strided_slice %1 {offsets = [0, 3], sizes = [32, 1], strides = [1, 1]} : vector<32x16xi32> to vector<32x1xi32>
    %270 = vector.broadcast %269 : vector<32x1xi32> to vector<32x32xi32>
    %271 = arith.cmpi eq, %270, %2 : vector<32x32xi32>
    %272 = arith.extui %271 : vector<32x32xi1> to vector<32x32xi32>
    %273 = arith.sitofp %272 : vector<32x32xi32> to vector<32x32xf32>
    %cst_84 = arith.constant dense<0.000000e+00> : vector<32x32xf32>
    %274 = tpu.matmul %273, %225, %cst_84 {dimension_numbers = #tpu.dot_dimension_numbers<[1], [0], [0], [1], [0, 0, 1, 1], [], []>} : vector<32x32xf32>, vector<32x32xf32>, vector<32x32xf32> -> vector<32x32xf32>
    %275 = arith.addf %274, %228 : vector<32x32xf32>
    %cst_85 = arith.constant 0.000000e+00 : f32
    %276 = vector.broadcast %cst_85 : f32 to vector<32x32xf32>
    %277 = arith.maximumf %275, %276 : vector<32x32xf32>
    %cst_86 = arith.constant dense<0.000000e+00> : vector<32x32xf32>
    %278 = tpu.matmul %277, %229, %cst_86 {dimension_numbers = #tpu.dot_dimension_numbers<[1], [0], [0], [1], [0, 0, 1, 1], [], []>} : vector<32x32xf32>, vector<32x32xf32>, vector<32x32xf32> -> vector<32x32xf32>
    %279 = vector.broadcast %230 : vector<1x32xf32> to vector<32x32xf32>
    %280 = arith.addf %278, %279 : vector<32x32xf32>
    %281 = arith.maximumf %268, %280 : vector<32x32xf32>
    %282 = vector.extract_strided_slice %1 {offsets = [0, 4], sizes = [32, 1], strides = [1, 1]} : vector<32x16xi32> to vector<32x1xi32>
    %283 = vector.broadcast %282 : vector<32x1xi32> to vector<32x32xi32>
    %284 = arith.cmpi eq, %283, %2 : vector<32x32xi32>
    %285 = arith.extui %284 : vector<32x32xi1> to vector<32x32xi32>
    %286 = arith.sitofp %285 : vector<32x32xi32> to vector<32x32xf32>
    %cst_87 = arith.constant dense<0.000000e+00> : vector<32x32xf32>
    %287 = tpu.matmul %286, %225, %cst_87 {dimension_numbers = #tpu.dot_dimension_numbers<[1], [0], [0], [1], [0, 0, 1, 1], [], []>} : vector<32x32xf32>, vector<32x32xf32>, vector<32x32xf32> -> vector<32x32xf32>
    %288 = arith.addf %287, %228 : vector<32x32xf32>
    %cst_88 = arith.constant 0.000000e+00 : f32
    %289 = vector.broadcast %cst_88 : f32 to vector<32x32xf32>
    %290 = arith.maximumf %288, %289 : vector<32x32xf32>
    %cst_89 = arith.constant dense<0.000000e+00> : vector<32x32xf32>
    %291 = tpu.matmul %290, %229, %cst_89 {dimension_numbers = #tpu.dot_dimension_numbers<[1], [0], [0], [1], [0, 0, 1, 1], [], []>} : vector<32x32xf32>, vector<32x32xf32>, vector<32x32xf32> -> vector<32x32xf32>
    %292 = vector.broadcast %230 : vector<1x32xf32> to vector<32x32xf32>
    %293 = arith.addf %291, %292 : vector<32x32xf32>
    %294 = arith.maximumf %281, %293 : vector<32x32xf32>
    %295 = vector.extract_strided_slice %1 {offsets = [0, 5], sizes = [32, 1], strides = [1, 1]} : vector<32x16xi32> to vector<32x1xi32>
    %296 = vector.broadcast %295 : vector<32x1xi32> to vector<32x32xi32>
    %297 = arith.cmpi eq, %296, %2 : vector<32x32xi32>
    %298 = arith.extui %297 : vector<32x32xi1> to vector<32x32xi32>
    %299 = arith.sitofp %298 : vector<32x32xi32> to vector<32x32xf32>
    %cst_90 = arith.constant dense<0.000000e+00> : vector<32x32xf32>
    %300 = tpu.matmul %299, %225, %cst_90 {dimension_numbers = #tpu.dot_dimension_numbers<[1], [0], [0], [1], [0, 0, 1, 1], [], []>} : vector<32x32xf32>, vector<32x32xf32>, vector<32x32xf32> -> vector<32x32xf32>
    %301 = arith.addf %300, %228 : vector<32x32xf32>
    %cst_91 = arith.constant 0.000000e+00 : f32
    %302 = vector.broadcast %cst_91 : f32 to vector<32x32xf32>
    %303 = arith.maximumf %301, %302 : vector<32x32xf32>
    %cst_92 = arith.constant dense<0.000000e+00> : vector<32x32xf32>
    %304 = tpu.matmul %303, %229, %cst_92 {dimension_numbers = #tpu.dot_dimension_numbers<[1], [0], [0], [1], [0, 0, 1, 1], [], []>} : vector<32x32xf32>, vector<32x32xf32>, vector<32x32xf32> -> vector<32x32xf32>
    %305 = vector.broadcast %230 : vector<1x32xf32> to vector<32x32xf32>
    %306 = arith.addf %304, %305 : vector<32x32xf32>
    %307 = arith.maximumf %294, %306 : vector<32x32xf32>
    %308 = vector.extract_strided_slice %1 {offsets = [0, 6], sizes = [32, 1], strides = [1, 1]} : vector<32x16xi32> to vector<32x1xi32>
    %309 = vector.broadcast %308 : vector<32x1xi32> to vector<32x32xi32>
    %310 = arith.cmpi eq, %309, %2 : vector<32x32xi32>
    %311 = arith.extui %310 : vector<32x32xi1> to vector<32x32xi32>
    %312 = arith.sitofp %311 : vector<32x32xi32> to vector<32x32xf32>
    %cst_93 = arith.constant dense<0.000000e+00> : vector<32x32xf32>
    %313 = tpu.matmul %312, %225, %cst_93 {dimension_numbers = #tpu.dot_dimension_numbers<[1], [0], [0], [1], [0, 0, 1, 1], [], []>} : vector<32x32xf32>, vector<32x32xf32>, vector<32x32xf32> -> vector<32x32xf32>
    %314 = arith.addf %313, %228 : vector<32x32xf32>
    %cst_94 = arith.constant 0.000000e+00 : f32
    %315 = vector.broadcast %cst_94 : f32 to vector<32x32xf32>
    %316 = arith.maximumf %314, %315 : vector<32x32xf32>
    %cst_95 = arith.constant dense<0.000000e+00> : vector<32x32xf32>
    %317 = tpu.matmul %316, %229, %cst_95 {dimension_numbers = #tpu.dot_dimension_numbers<[1], [0], [0], [1], [0, 0, 1, 1], [], []>} : vector<32x32xf32>, vector<32x32xf32>, vector<32x32xf32> -> vector<32x32xf32>
    %318 = vector.broadcast %230 : vector<1x32xf32> to vector<32x32xf32>
    %319 = arith.addf %317, %318 : vector<32x32xf32>
    %320 = arith.maximumf %307, %319 : vector<32x32xf32>
    %321 = vector.extract_strided_slice %1 {offsets = [0, 7], sizes = [32, 1], strides = [1, 1]} : vector<32x16xi32> to vector<32x1xi32>
    %322 = vector.broadcast %321 : vector<32x1xi32> to vector<32x32xi32>
    %323 = arith.cmpi eq, %322, %2 : vector<32x32xi32>
    %324 = arith.extui %323 : vector<32x32xi1> to vector<32x32xi32>
    %325 = arith.sitofp %324 : vector<32x32xi32> to vector<32x32xf32>
    %cst_96 = arith.constant dense<0.000000e+00> : vector<32x32xf32>
    %326 = tpu.matmul %325, %225, %cst_96 {dimension_numbers = #tpu.dot_dimension_numbers<[1], [0], [0], [1], [0, 0, 1, 1], [], []>} : vector<32x32xf32>, vector<32x32xf32>, vector<32x32xf32> -> vector<32x32xf32>
    %327 = arith.addf %326, %228 : vector<32x32xf32>
    %cst_97 = arith.constant 0.000000e+00 : f32
    %328 = vector.broadcast %cst_97 : f32 to vector<32x32xf32>
    %329 = arith.maximumf %327, %328 : vector<32x32xf32>
    %cst_98 = arith.constant dense<0.000000e+00> : vector<32x32xf32>
    %330 = tpu.matmul %329, %229, %cst_98 {dimension_numbers = #tpu.dot_dimension_numbers<[1], [0], [0], [1], [0, 0, 1, 1], [], []>} : vector<32x32xf32>, vector<32x32xf32>, vector<32x32xf32> -> vector<32x32xf32>
    %331 = vector.broadcast %230 : vector<1x32xf32> to vector<32x32xf32>
    %332 = arith.addf %330, %331 : vector<32x32xf32>
    %333 = arith.maximumf %320, %332 : vector<32x32xf32>
    %334 = vector.extract_strided_slice %1 {offsets = [0, 8], sizes = [32, 1], strides = [1, 1]} : vector<32x16xi32> to vector<32x1xi32>
    %335 = vector.broadcast %334 : vector<32x1xi32> to vector<32x32xi32>
    %336 = arith.cmpi eq, %335, %2 : vector<32x32xi32>
    %337 = arith.extui %336 : vector<32x32xi1> to vector<32x32xi32>
    %338 = arith.sitofp %337 : vector<32x32xi32> to vector<32x32xf32>
    %cst_99 = arith.constant dense<0.000000e+00> : vector<32x32xf32>
    %339 = tpu.matmul %338, %225, %cst_99 {dimension_numbers = #tpu.dot_dimension_numbers<[1], [0], [0], [1], [0, 0, 1, 1], [], []>} : vector<32x32xf32>, vector<32x32xf32>, vector<32x32xf32> -> vector<32x32xf32>
    %340 = arith.addf %339, %228 : vector<32x32xf32>
    %cst_100 = arith.constant 0.000000e+00 : f32
    %341 = vector.broadcast %cst_100 : f32 to vector<32x32xf32>
    %342 = arith.maximumf %340, %341 : vector<32x32xf32>
    %cst_101 = arith.constant dense<0.000000e+00> : vector<32x32xf32>
    %343 = tpu.matmul %342, %229, %cst_101 {dimension_numbers = #tpu.dot_dimension_numbers<[1], [0], [0], [1], [0, 0, 1, 1], [], []>} : vector<32x32xf32>, vector<32x32xf32>, vector<32x32xf32> -> vector<32x32xf32>
    %344 = vector.broadcast %230 : vector<1x32xf32> to vector<32x32xf32>
    %345 = arith.addf %343, %344 : vector<32x32xf32>
    %346 = arith.maximumf %333, %345 : vector<32x32xf32>
    %347 = vector.extract_strided_slice %1 {offsets = [0, 9], sizes = [32, 1], strides = [1, 1]} : vector<32x16xi32> to vector<32x1xi32>
    %348 = vector.broadcast %347 : vector<32x1xi32> to vector<32x32xi32>
    %349 = arith.cmpi eq, %348, %2 : vector<32x32xi32>
    %350 = arith.extui %349 : vector<32x32xi1> to vector<32x32xi32>
    %351 = arith.sitofp %350 : vector<32x32xi32> to vector<32x32xf32>
    %cst_102 = arith.constant dense<0.000000e+00> : vector<32x32xf32>
    %352 = tpu.matmul %351, %225, %cst_102 {dimension_numbers = #tpu.dot_dimension_numbers<[1], [0], [0], [1], [0, 0, 1, 1], [], []>} : vector<32x32xf32>, vector<32x32xf32>, vector<32x32xf32> -> vector<32x32xf32>
    %353 = arith.addf %352, %228 : vector<32x32xf32>
    %cst_103 = arith.constant 0.000000e+00 : f32
    %354 = vector.broadcast %cst_103 : f32 to vector<32x32xf32>
    %355 = arith.maximumf %353, %354 : vector<32x32xf32>
    %cst_104 = arith.constant dense<0.000000e+00> : vector<32x32xf32>
    %356 = tpu.matmul %355, %229, %cst_104 {dimension_numbers = #tpu.dot_dimension_numbers<[1], [0], [0], [1], [0, 0, 1, 1], [], []>} : vector<32x32xf32>, vector<32x32xf32>, vector<32x32xf32> -> vector<32x32xf32>
    %357 = vector.broadcast %230 : vector<1x32xf32> to vector<32x32xf32>
    %358 = arith.addf %356, %357 : vector<32x32xf32>
    %359 = arith.maximumf %346, %358 : vector<32x32xf32>
    %360 = vector.extract_strided_slice %1 {offsets = [0, 10], sizes = [32, 1], strides = [1, 1]} : vector<32x16xi32> to vector<32x1xi32>
    %361 = vector.broadcast %360 : vector<32x1xi32> to vector<32x32xi32>
    %362 = arith.cmpi eq, %361, %2 : vector<32x32xi32>
    %363 = arith.extui %362 : vector<32x32xi1> to vector<32x32xi32>
    %364 = arith.sitofp %363 : vector<32x32xi32> to vector<32x32xf32>
    %cst_105 = arith.constant dense<0.000000e+00> : vector<32x32xf32>
    %365 = tpu.matmul %364, %225, %cst_105 {dimension_numbers = #tpu.dot_dimension_numbers<[1], [0], [0], [1], [0, 0, 1, 1], [], []>} : vector<32x32xf32>, vector<32x32xf32>, vector<32x32xf32> -> vector<32x32xf32>
    %366 = arith.addf %365, %228 : vector<32x32xf32>
    %cst_106 = arith.constant 0.000000e+00 : f32
    %367 = vector.broadcast %cst_106 : f32 to vector<32x32xf32>
    %368 = arith.maximumf %366, %367 : vector<32x32xf32>
    %cst_107 = arith.constant dense<0.000000e+00> : vector<32x32xf32>
    %369 = tpu.matmul %368, %229, %cst_107 {dimension_numbers = #tpu.dot_dimension_numbers<[1], [0], [0], [1], [0, 0, 1, 1], [], []>} : vector<32x32xf32>, vector<32x32xf32>, vector<32x32xf32> -> vector<32x32xf32>
    %370 = vector.broadcast %230 : vector<1x32xf32> to vector<32x32xf32>
    %371 = arith.addf %369, %370 : vector<32x32xf32>
    %372 = arith.maximumf %359, %371 : vector<32x32xf32>
    %373 = vector.extract_strided_slice %1 {offsets = [0, 11], sizes = [32, 1], strides = [1, 1]} : vector<32x16xi32> to vector<32x1xi32>
    %374 = vector.broadcast %373 : vector<32x1xi32> to vector<32x32xi32>
    %375 = arith.cmpi eq, %374, %2 : vector<32x32xi32>
    %376 = arith.extui %375 : vector<32x32xi1> to vector<32x32xi32>
    %377 = arith.sitofp %376 : vector<32x32xi32> to vector<32x32xf32>
    %cst_108 = arith.constant dense<0.000000e+00> : vector<32x32xf32>
    %378 = tpu.matmul %377, %225, %cst_108 {dimension_numbers = #tpu.dot_dimension_numbers<[1], [0], [0], [1], [0, 0, 1, 1], [], []>} : vector<32x32xf32>, vector<32x32xf32>, vector<32x32xf32> -> vector<32x32xf32>
    %379 = arith.addf %378, %228 : vector<32x32xf32>
    %cst_109 = arith.constant 0.000000e+00 : f32
    %380 = vector.broadcast %cst_109 : f32 to vector<32x32xf32>
    %381 = arith.maximumf %379, %380 : vector<32x32xf32>
    %cst_110 = arith.constant dense<0.000000e+00> : vector<32x32xf32>
    %382 = tpu.matmul %381, %229, %cst_110 {dimension_numbers = #tpu.dot_dimension_numbers<[1], [0], [0], [1], [0, 0, 1, 1], [], []>} : vector<32x32xf32>, vector<32x32xf32>, vector<32x32xf32> -> vector<32x32xf32>
    %383 = vector.broadcast %230 : vector<1x32xf32> to vector<32x32xf32>
    %384 = arith.addf %382, %383 : vector<32x32xf32>
    %385 = arith.maximumf %372, %384 : vector<32x32xf32>
    %386 = vector.extract_strided_slice %1 {offsets = [0, 12], sizes = [32, 1], strides = [1, 1]} : vector<32x16xi32> to vector<32x1xi32>
    %387 = vector.broadcast %386 : vector<32x1xi32> to vector<32x32xi32>
    %388 = arith.cmpi eq, %387, %2 : vector<32x32xi32>
    %389 = arith.extui %388 : vector<32x32xi1> to vector<32x32xi32>
    %390 = arith.sitofp %389 : vector<32x32xi32> to vector<32x32xf32>
    %cst_111 = arith.constant dense<0.000000e+00> : vector<32x32xf32>
    %391 = tpu.matmul %390, %225, %cst_111 {dimension_numbers = #tpu.dot_dimension_numbers<[1], [0], [0], [1], [0, 0, 1, 1], [], []>} : vector<32x32xf32>, vector<32x32xf32>, vector<32x32xf32> -> vector<32x32xf32>
    %392 = arith.addf %391, %228 : vector<32x32xf32>
    %cst_112 = arith.constant 0.000000e+00 : f32
    %393 = vector.broadcast %cst_112 : f32 to vector<32x32xf32>
    %394 = arith.maximumf %392, %393 : vector<32x32xf32>
    %cst_113 = arith.constant dense<0.000000e+00> : vector<32x32xf32>
    %395 = tpu.matmul %394, %229, %cst_113 {dimension_numbers = #tpu.dot_dimension_numbers<[1], [0], [0], [1], [0, 0, 1, 1], [], []>} : vector<32x32xf32>, vector<32x32xf32>, vector<32x32xf32> -> vector<32x32xf32>
    %396 = vector.broadcast %230 : vector<1x32xf32> to vector<32x32xf32>
    %397 = arith.addf %395, %396 : vector<32x32xf32>
    %398 = arith.maximumf %385, %397 : vector<32x32xf32>
    %399 = vector.extract_strided_slice %1 {offsets = [0, 13], sizes = [32, 1], strides = [1, 1]} : vector<32x16xi32> to vector<32x1xi32>
    %400 = vector.broadcast %399 : vector<32x1xi32> to vector<32x32xi32>
    %401 = arith.cmpi eq, %400, %2 : vector<32x32xi32>
    %402 = arith.extui %401 : vector<32x32xi1> to vector<32x32xi32>
    %403 = arith.sitofp %402 : vector<32x32xi32> to vector<32x32xf32>
    %cst_114 = arith.constant dense<0.000000e+00> : vector<32x32xf32>
    %404 = tpu.matmul %403, %225, %cst_114 {dimension_numbers = #tpu.dot_dimension_numbers<[1], [0], [0], [1], [0, 0, 1, 1], [], []>} : vector<32x32xf32>, vector<32x32xf32>, vector<32x32xf32> -> vector<32x32xf32>
    %405 = arith.addf %404, %228 : vector<32x32xf32>
    %cst_115 = arith.constant 0.000000e+00 : f32
    %406 = vector.broadcast %cst_115 : f32 to vector<32x32xf32>
    %407 = arith.maximumf %405, %406 : vector<32x32xf32>
    %cst_116 = arith.constant dense<0.000000e+00> : vector<32x32xf32>
    %408 = tpu.matmul %407, %229, %cst_116 {dimension_numbers = #tpu.dot_dimension_numbers<[1], [0], [0], [1], [0, 0, 1, 1], [], []>} : vector<32x32xf32>, vector<32x32xf32>, vector<32x32xf32> -> vector<32x32xf32>
    %409 = vector.broadcast %230 : vector<1x32xf32> to vector<32x32xf32>
    %410 = arith.addf %408, %409 : vector<32x32xf32>
    %411 = arith.maximumf %398, %410 : vector<32x32xf32>
    %412 = vector.extract_strided_slice %1 {offsets = [0, 14], sizes = [32, 1], strides = [1, 1]} : vector<32x16xi32> to vector<32x1xi32>
    %413 = vector.broadcast %412 : vector<32x1xi32> to vector<32x32xi32>
    %414 = arith.cmpi eq, %413, %2 : vector<32x32xi32>
    %415 = arith.extui %414 : vector<32x32xi1> to vector<32x32xi32>
    %416 = arith.sitofp %415 : vector<32x32xi32> to vector<32x32xf32>
    %cst_117 = arith.constant dense<0.000000e+00> : vector<32x32xf32>
    %417 = tpu.matmul %416, %225, %cst_117 {dimension_numbers = #tpu.dot_dimension_numbers<[1], [0], [0], [1], [0, 0, 1, 1], [], []>} : vector<32x32xf32>, vector<32x32xf32>, vector<32x32xf32> -> vector<32x32xf32>
    %418 = arith.addf %417, %228 : vector<32x32xf32>
    %cst_118 = arith.constant 0.000000e+00 : f32
    %419 = vector.broadcast %cst_118 : f32 to vector<32x32xf32>
    %420 = arith.maximumf %418, %419 : vector<32x32xf32>
    %cst_119 = arith.constant dense<0.000000e+00> : vector<32x32xf32>
    %421 = tpu.matmul %420, %229, %cst_119 {dimension_numbers = #tpu.dot_dimension_numbers<[1], [0], [0], [1], [0, 0, 1, 1], [], []>} : vector<32x32xf32>, vector<32x32xf32>, vector<32x32xf32> -> vector<32x32xf32>
    %422 = vector.broadcast %230 : vector<1x32xf32> to vector<32x32xf32>
    %423 = arith.addf %421, %422 : vector<32x32xf32>
    %424 = arith.maximumf %411, %423 : vector<32x32xf32>
    %425 = vector.extract_strided_slice %1 {offsets = [0, 15], sizes = [32, 1], strides = [1, 1]} : vector<32x16xi32> to vector<32x1xi32>
    %426 = vector.broadcast %425 : vector<32x1xi32> to vector<32x32xi32>
    %427 = arith.cmpi eq, %426, %2 : vector<32x32xi32>
    %428 = arith.extui %427 : vector<32x32xi1> to vector<32x32xi32>
    %429 = arith.sitofp %428 : vector<32x32xi32> to vector<32x32xf32>
    %cst_120 = arith.constant dense<0.000000e+00> : vector<32x32xf32>
    %430 = tpu.matmul %429, %225, %cst_120 {dimension_numbers = #tpu.dot_dimension_numbers<[1], [0], [0], [1], [0, 0, 1, 1], [], []>} : vector<32x32xf32>, vector<32x32xf32>, vector<32x32xf32> -> vector<32x32xf32>
    %431 = arith.addf %430, %228 : vector<32x32xf32>
    %cst_121 = arith.constant 0.000000e+00 : f32
    %432 = vector.broadcast %cst_121 : f32 to vector<32x32xf32>
    %433 = arith.maximumf %431, %432 : vector<32x32xf32>
    %cst_122 = arith.constant dense<0.000000e+00> : vector<32x32xf32>
    %434 = tpu.matmul %433, %229, %cst_122 {dimension_numbers = #tpu.dot_dimension_numbers<[1], [0], [0], [1], [0, 0, 1, 1], [], []>} : vector<32x32xf32>, vector<32x32xf32>, vector<32x32xf32> -> vector<32x32xf32>
    %435 = vector.broadcast %230 : vector<1x32xf32> to vector<32x32xf32>
    %436 = arith.addf %434, %435 : vector<32x32xf32>
    %437 = arith.maximumf %424, %436 : vector<32x32xf32>
    %cst_123 = arith.constant 0.000000e+00 : f32
    %438 = vector.broadcast %cst_123 : f32 to vector<32x32xf32>
    %439 = arith.maximumf %437, %438 : vector<32x32xf32>
    %cst_124 = arith.constant dense<0xFF800000> : vector<32xf32>
    %440 = vector.multi_reduction <maximumf>, %439, %cst_124 [0] : vector<32x32xf32> to vector<32xf32>
    %441 = vector.shape_cast %440 : vector<32xf32> to vector<1x32xf32>
    %442 = vector.shape_cast %441 : vector<1x32xf32> to vector<1x32xf32>
    %443 = vector.broadcast %442 : vector<1x32xf32> to vector<8x32xf32>
    %c0_125 = arith.constant 0 : index
    %c0_126 = arith.constant 0 : index
    %444 = vector.load %arg13[%c0_125, %c0_126] : memref<32x128xf32, #tpu.memory_space<vmem>>, vector<32x128xf32>
    %cst_127 = arith.constant dense<0.000000e+00> : vector<8x128xf32>
    %445 = tpu.matmul %443, %444, %cst_127 {dimension_numbers = #tpu.dot_dimension_numbers<[1], [0], [0], [1], [0, 0, 1, 1], [], []>} : vector<8x32xf32>, vector<32x128xf32>, vector<8x128xf32> -> vector<8x128xf32>
    %c0_128 = arith.constant 0 : index
    %c0_129 = arith.constant 0 : index
    %446 = vector.load %arg14[%c0_128, %c0_129] : memref<1x128xf32, #tpu.memory_space<vmem>>, vector<1x128xf32>
    %447 = vector.broadcast %446 : vector<1x128xf32> to vector<8x128xf32>
    %448 = arith.addf %445, %447 : vector<8x128xf32>
    %c0_130 = arith.constant 0 : index
    %c0_131 = arith.constant 0 : index
    %c0_132 = arith.constant 0 : index
    %449 = vector.load %arg15[%c0_130, %c0_131, %c0_132] : memref<1x8x128xf32, #tpu.memory_space<vmem>>, vector<1x8x128xf32>
    %450 = vector.shape_cast %449 : vector<1x8x128xf32> to vector<8x128xf32>
    %451 = vector.shape_cast %448 : vector<8x128xf32> to vector<1x8x128xf32>
    tpu.vector_store %arg15[%c0_130, %c0_131, %c0_132], %451 {strides = array<i32>} : memref<1x8x128xf32, #tpu.memory_space<vmem>>, vector<1x8x128xf32>,
    return
  }
  func.func @transform_0(%arg0: i32) -> (i32, i32) {
    %c0_i32 = arith.constant 0 : i32
    %c0_i32_0 = arith.constant 0 : i32
    return %arg0, %c0_i32 : i32, i32
  }
  func.func @transform_1(%arg0: i32) -> (i32, i32) {
    %c0_i32 = arith.constant 0 : i32
    %c0_i32_0 = arith.constant 0 : i32
    return %arg0, %c0_i32 : i32, i32
  }
  func.func @transform_2(%arg0: i32) -> (i32, i32) {
    %c0_i32 = arith.constant 0 : i32
    %c0_i32_0 = arith.constant 0 : i32
    %c0_i32_1 = arith.constant 0 : i32
    return %c0_i32, %c0_i32_0 : i32, i32
  }
  func.func @transform_3(%arg0: i32) -> (i32, i32) {
    %c0_i32 = arith.constant 0 : i32
    %c0_i32_0 = arith.constant 0 : i32
    %c0_i32_1 = arith.constant 0 : i32
    return %c0_i32, %c0_i32_0 : i32, i32
  }
  func.func @transform_4(%arg0: i32) -> (i32, i32) {
    %c0_i32 = arith.constant 0 : i32
    %c0_i32_0 = arith.constant 0 : i32
    %c0_i32_1 = arith.constant 0 : i32
    return %c0_i32, %c0_i32_0 : i32, i32
  }
  func.func @transform_5(%arg0: i32) -> (i32, i32) {
    %c0_i32 = arith.constant 0 : i32
    %c0_i32_0 = arith.constant 0 : i32
    %c0_i32_1 = arith.constant 0 : i32
    return %c0_i32, %c0_i32_0 : i32, i32
  }
  func.func @transform_6(%arg0: i32) -> (i32, i32) {
    %c0_i32 = arith.constant 0 : i32
    %c0_i32_0 = arith.constant 0 : i32
    %c0_i32_1 = arith.constant 0 : i32
    return %c0_i32, %c0_i32_0 : i32, i32
  }
  func.func @transform_7(%arg0: i32) -> (i32, i32) {
    %c0_i32 = arith.constant 0 : i32
    %c0_i32_0 = arith.constant 0 : i32
    %c0_i32_1 = arith.constant 0 : i32
    return %c0_i32, %c0_i32_0 : i32, i32
  }
  func.func @transform_8(%arg0: i32) -> (i32, i32) {
    %c0_i32 = arith.constant 0 : i32
    %c0_i32_0 = arith.constant 0 : i32
    %c0_i32_1 = arith.constant 0 : i32
    return %c0_i32, %c0_i32_0 : i32, i32
  }
  func.func @transform_9(%arg0: i32) -> (i32, i32) {
    %c0_i32 = arith.constant 0 : i32
    %c0_i32_0 = arith.constant 0 : i32
    %c0_i32_1 = arith.constant 0 : i32
    return %c0_i32, %c0_i32_0 : i32, i32
  }
  func.func @transform_10(%arg0: i32) -> (i32, i32) {
    %c0_i32 = arith.constant 0 : i32
    %c0_i32_0 = arith.constant 0 : i32
    %c0_i32_1 = arith.constant 0 : i32
    return %c0_i32, %c0_i32_0 : i32, i32
  }
  func.func @transform_11(%arg0: i32) -> (i32, i32) {
    %c0_i32 = arith.constant 0 : i32
    %c0_i32_0 = arith.constant 0 : i32
    %c0_i32_1 = arith.constant 0 : i32
    return %c0_i32, %c0_i32_0 : i32, i32
  }
  func.func @transform_12(%arg0: i32) -> (i32, i32) {
    %c0_i32 = arith.constant 0 : i32
    %c0_i32_0 = arith.constant 0 : i32
    %c0_i32_1 = arith.constant 0 : i32
    return %c0_i32, %c0_i32_0 : i32, i32
  }
  func.func @transform_13(%arg0: i32) -> (i32, i32) {
    %c0_i32 = arith.constant 0 : i32
    %c0_i32_0 = arith.constant 0 : i32
    %c0_i32_1 = arith.constant 0 : i32
    return %c0_i32, %c0_i32_0 : i32, i32
  }
  func.func @transform_14(%arg0: i32) -> (i32, i32, i32) {
    %c0_i32 = arith.constant 0 : i32
    %c0_i32_0 = arith.constant 0 : i32
    %c0_i32_1 = arith.constant 0 : i32
    return %arg0, %c0_i32, %c0_i32_0 : i32, i32, i32
  }
}

</mosaic_0001>

<bundles_post_ra>
// kernel: pointnet_forward.1
= control target key start
LH: loop header
LB: loop body
LE: loop exit
PB: predicated region body
PF: predicated region fallthrough
CT: control target
= control target key end

     0   :  { %s10275_s29 = smov 0   ;;  %s11800_s0 = inlined_call_operand.vmem [shape: f32[64,3], index: 0, kind: input, shape index: {}]   ;;  %s11801_s1 = inlined_call_operand.vmem [shape: s32[64,16], index: 1, kind: input, shape index: {}]   ;;  %s11802_s2 = inlined_call_operand.vmem [shape: f32[3,32], index: 2, kind: input, shape index: {}]   ;;  %s11803_s3 = inlined_call_operand.vmem [shape: f32[3,32], index: 3, kind: input, shape index: {}]   ;;  %s11804_s4 = inlined_call_operand.vmem [shape: f32[1,32], index: 4, kind: input, shape index: {}]   ;;  %s11805_s5 = inlined_call_operand.vmem [shape: f32[32,32], index: 5, kind: input, shape index: {}]   ;;  %s11806_s6 = inlined_call_operand.vmem [shape: f32[1,32], index: 6, kind: input, shape index: {}]   ;;  %s11807_s7 = inlined_call_operand.vmem [shape: f32[32,32], index: 7, kind: input, shape index: {}]   ;;  %s11808_s8 = inlined_call_operand.vmem [shape: f32[3,32], index: 8, kind: input, shape index: {}]   ;;  %s11809_s9 = inlined_call_operand.vmem [shape: f32[1,32], index: 9, kind: input, shape index: {}]   ;;  %s11810_s10 = inlined_call_operand.vmem [shape: f32[32,32], index: 10, kind: input, shape index: {}]   ;;  %s11811_s11 = inlined_call_operand.vmem [shape: f32[1,32], index: 11, kind: input, shape index: {}]   ;;  %s11812_s12 = inlined_call_operand.vmem [shape: f32[32,128], index: 12, kind: input, shape index: {}]   ;;  %s11813_s13 = inlined_call_operand.vmem [shape: f32[1,128], index: 13, kind: input, shape index: {}]   ;;  %s11814_s14 = inlined_call_operand.vmem [shape: f32[2,8,128], index: 14, kind: output, shape index: {}]  }
   0x1 LB: > { %s10281_s30 = sadd.s32 4294967295, %s10179_s29   ;;  %p7750_p0 = scmp.ge.s32.totalorder %s10179_s29, 1  ;;  %s10179_s29 = sphi %s10275_s29, %s24_s29  }
   0x2   : > { %p424_p1 = scmp.lt.s32.totalorder %s10179_s29, 3 }
   0x4   : > { %p425_p2 = pnand %p7750_p0, %p424_p1 }
   0x6   : > { %428 = sbr.rel (%p425_p2) target bundleno = 1820 (0x71c), region = 76 }
   0xd   : > { %v500_v0 = vld [vmem:[%s11802_s2] sm:$0x7]  ;;  %vm514_vm0 = vcmask 1042432   ;;  %s7751_s17 = sshll.u32 %s10281_s30, 2  ;;  %v10181_v1 = vmov 0   ;;  %vm501_vm1 = vcmask 23552   ;;  %v498_v26 = vlaneseq }
   0xe   : > { %8643 = vmatprep.subr.msk.mxu0 %vm514_vm0, %v500_v0  ;;  %p475_p3 = scmp.lt.s32.totalorder %s7751_s17, 7  ;;  %10142 = vset.pattern.permute.xlu1 %v10181_v1  ;;  %v10182_v10 = vmov 1   ;;  %v10183_v11 = vmov 2   ;;  %v10184_v12 = vmov 3   ;;  %v10185_v13 = vmov 4   ;;  %v703_v63 = vld [vmem:[%s11805_s5] sm:$0xff] }
   0xf   : > { %8644 = vmatpush3.msk.msra.mxu0 %vm514_vm0, %v500_v0  ;;  %10141 = vset.pattern.permute.xlu0 %v10181_v1  ;;  %v10186_v14 = vmov 5   ;;  %v10187_v15 = vmov 6   ;;  %v10188_v16 = vmov 7   ;;  %v10189_v17 = vmov 8   ;;  %v604_v22 = vld [vmem:[%s11803_s3] sm:$0x7] }
  0x10   : > { %s11893_s17 = smov (!%p475_p3, %s7751_s17), 7  ;;  %v10190_v18 = vmov 9   ;;  %v10191_v19 = vmov 10   ;;  %v10192_v20 = vmov 11   ;;  %v10193_v21 = vmov 12   ;;  %8651 = vmatprep.subr.msk.mxu1 %vm514_vm0, %v604_v22  ;;  %v704_v0 = vld [vmem:[%s11805_s5 + $0x8] sm:$0xff] }
  0x11   : > { %s7752_s18 = sshll.u32 %s11893_s17, 3  ;;  %v10194_v23 = vmov 13   ;;  %8652 = vmatpush3.msk.msra.mxu1 %vm514_vm0, %v604_v22  ;;  %v10195_v24 = vmov 14   ;;  %v10196_v25 = vmov 15   ;;  %v10388_v27 = vand.u32 127, %v498_v26  ;;  %p486_p4 = scmp.lt.s32.totalorder %s10281_s30, 1 }
  0x12   : > { %s478_s21 = scalar_lea.vmem %s11800_s0, %s7752_s18  ;;  %s484_s24 = scalar_lea.vmem %s11801_s1, %s7752_s18  ;;  %vm732_vm2 = vcmask 261120   ;;  %v11817_v30 = vmov 0.0   ;;  %v10487_v1 = vpack.c.bf16 %v704_v0, %v703_v63 }
  0x13   : > { %v10297_v2 = vld [vmem:[%s478_s21] sm:$0xff]  ;;  %v10301_v4 = vld [vmem:[%s484_s24 + $0x10] sm:$0xff]  ;;  %v10305_v5 = vld [vmem:[%s478_s21 + $0x8] sm:$0xff]  ;;  %s11895_s30 = smov (!%p486_p4, %s10281_s30), 1 }
  0x14   : > { %v10299_v3 = vld [vmem:[%s484_s24] sm:$0xff]  ;;  %8645 = vmatprep.mubr.msk.f32.mxu0 %vm501_vm1, %v10297_v2  ;;  %v10310_v6 = vld [vmem:[%s478_s21 + $0x10] sm:$0xff]  ;;  %715 = vperm.xlu1 %10142, %v10301_v4   ;;  %v10313_v7 = vld [vmem:[%s484_s24 + $0x18] sm:$0xff]  ;;  %s7755_s27 = sshll.u32 %s11895_s30, 3 }
  0x15   : > { %709 = vperm.xlu0 %10141, %v10299_v3   ;;  %8646 = vmatmul.mubr.msk.f32.vlgmr.msra.gmra.mrb[0].mxu0 %vm501_vm1, %v10305_v5  ;;  %v10317_v8 = vld [vmem:[%s478_s21 + $0x18] sm:$0xff]  ;;  %v10321_v9 = vld [vmem:[%s484_s24 + $0x8] sm:$0xff]  ;;  %s489_s18 = scalar_lea.vmem %s11814_s14, %s7755_s27 }
  0x16   : > { %8648 = vmatprep.mubr.msk.f32.mxu0 %vm501_vm1, %v10310_v6  ;;  %8653 = vmatprep.mubr.msk.f32.mxu1 %vm501_vm1, %v10297_v2 }
  0x17   : > { %8654 = vmatmul.mubr.msk.f32.vlgmr.msra.gmra.mrb[0].mxu1 %vm501_vm1, %v10305_v5  ;;  %9597 = vmatprep.subr.bf16.mxu1 %v10487_v1 }
  0x18   : > { %718 = vperm.xlu1 %10142, %v10313_v7   ;;  %8656 = vmatprep.mubr.msk.f32.mxu1 %vm501_vm1, %v10310_v6 }
  0x19   : > { %712 = vperm.xlu0 %10141, %v10321_v9   ;;  %8649 = vmatmul.mubr.msk.f32.gmra.mrb[2].mxu0 %vm501_vm1, %v10317_v8 }
  0x1a   : > { %9599 = vmatpush3.bf16.msra.mxu1 %v10487_v1 }
  0x1b   : > { %8657 = vmatmul.mubr.msk.f32.gmra.mrb[2].mxu1 %vm501_vm1, %v10317_v8 }
  0x1c   : > { %10144 = vset.pattern.permute.xlu1 %v10182_v10 }
  0x1d   : > { %10143 = vset.pattern.permute.xlu0 %v10182_v10  ;;  %941 = vperm.xlu1 %10144, %v10321_v9  }
  0x1e   : > { %938 = vperm.xlu0 %10143, %v10299_v3  }
  0x21   : > { %944 = vperm.xlu1 %10144, %v10301_v4  }
  0x22   : > { %947 = vperm.xlu0 %10143, %v10313_v7  }
  0x25   : > { %10145 = vset.pattern.permute.xlu1 %v10183_v11 }
  0x26   : > { %10146 = vset.pattern.permute.xlu0 %v10183_v11  ;;  %1164 = vperm.xlu1 %10145, %v10299_v3  }
  0x27   : > { %1167 = vperm.xlu0 %10146, %v10321_v9  }
  0x2a   : > { %1170 = vperm.xlu1 %10145, %v10301_v4  }
  0x2b   : > { %10147 = vset.pattern.permute.xlu0 %v10184_v12 }
  0x2c   : > { %1390 = vperm.xlu0 %10147, %v10299_v3  }
  0x2e   : > { %1173 = vperm.xlu1 %10145, %v10313_v7  }
  0x30   : > { %1399 = vperm.xlu0 %10147, %v10313_v7  }
  0x32   : > { %10148 = vset.pattern.permute.xlu1 %v10184_v12 }
  0x33   : > { %1393 = vperm.xlu1 %10148, %v10321_v9  }
  0x34   : > { %10150 = vset.pattern.permute.xlu0 %v10185_v13 }
  0x35   : > { %1619 = vperm.xlu0 %10150, %v10321_v9  }
  0x37   : > { %1396 = vperm.xlu1 %10148, %v10301_v4  }
  0x39   : > { %10151 = vset.pattern.permute.xlu0 %v10186_v14 }
  0x3a   : > { %1842 = vperm.xlu0 %10151, %v10299_v3  }
  0x3b   : > { %10149 = vset.pattern.permute.xlu1 %v10185_v13 }
  0x3c   : > { %1616 = vperm.xlu1 %10149, %v10299_v3  }
  0x3e   : > { %1851 = vperm.xlu0 %10151, %v10313_v7  }
  0x40   : > { %1622 = vperm.xlu1 %10149, %v10301_v4  }
  0x42   : > { %10154 = vset.pattern.permute.xlu0 %v10187_v15 }
  0x43   : > { %2071 = vperm.xlu0 %10154, %v10321_v9  }
  0x44   : > { %1625 = vperm.xlu1 %10149, %v10313_v7  }
  0x47   : > { %10155 = vset.pattern.permute.xlu0 %v10188_v16 }
  0x48   : > { %2294 = vperm.xlu0 %10155, %v10299_v3   ;;  %10152 = vset.pattern.permute.xlu1 %v10186_v14 }
  0x49   : > { %1845 = vperm.xlu1 %10152, %v10321_v9  }
  0x4c   : > { %2303 = vperm.xlu0 %10155, %v10313_v7  }
  0x4d   : > { %1848 = vperm.xlu1 %10152, %v10301_v4  }
  0x50   : > { %10158 = vset.pattern.permute.xlu0 %v10189_v17 }
  0x51   : > { %2523 = vperm.xlu0 %10158, %v10321_v9   ;;  %10153 = vset.pattern.permute.xlu1 %v10187_v15 }
  0x52   : > { %2068 = vperm.xlu1 %10153, %v10299_v3  }
  0x55   : > { %10159 = vset.pattern.permute.xlu0 %v10190_v18 }
  0x56   : > { %2746 = vperm.xlu0 %10159, %v10299_v3   ;;  %2074 = vperm.xlu1 %10153, %v10301_v4  }
  0x5a   : > { %2755 = vperm.xlu0 %10159, %v10313_v7   ;;  %2077 = vperm.xlu1 %10153, %v10313_v7  }
  0x5e   : > { %10162 = vset.pattern.permute.xlu0 %v10191_v19  ;;  %10156 = vset.pattern.permute.xlu1 %v10188_v16 }
  0x5f   : > { %2975 = vperm.xlu0 %10162, %v10321_v9   ;;  %2297 = vperm.xlu1 %10156, %v10321_v9  }
  0x63   : > { %10163 = vset.pattern.permute.xlu0 %v10192_v20  ;;  %2300 = vperm.xlu1 %10156, %v10301_v4  }
  0x64   : > { %3198 = vperm.xlu0 %10163, %v10299_v3  }
  0x67   : > { %10157 = vset.pattern.permute.xlu1 %v10189_v17 }
  0x68   : > { %3207 = vperm.xlu0 %10163, %v10313_v7   ;;  %2520 = vperm.xlu1 %10157, %v10299_v3  }
  0x6c   : > { %10166 = vset.pattern.permute.xlu0 %v10193_v21  ;;  %2526 = vperm.xlu1 %10157, %v10301_v4  }
  0x6d   : > { %3427 = vperm.xlu0 %10166, %v10321_v9  }
  0x70   : > { %2529 = vperm.xlu1 %10157, %v10313_v7  }
  0x71   : > { %10167 = vset.pattern.permute.xlu0 %v10194_v23 }
  0x72   : > { %3650 = vperm.xlu0 %10167, %v10299_v3  }
  0x74   : > { %10160 = vset.pattern.permute.xlu1 %v10190_v18 }
  0x75   : > { %2749 = vperm.xlu1 %10160, %v10321_v9  }
  0x76   : > { %3659 = vperm.xlu0 %10167, %v10313_v7  }
  0x79   : > { %2752 = vperm.xlu1 %10160, %v10301_v4  }
  0x7a   : > { %10170 = vset.pattern.permute.xlu0 %v10195_v24 }
  0x7b   : > { %3879 = vperm.xlu0 %10170, %v10321_v9  }
  0x7d   : > { %10161 = vset.pattern.permute.xlu1 %v10191_v19 }
  0x7e   : > { %2972 = vperm.xlu1 %10161, %v10299_v3  }
  0x7f   : > { %10171 = vset.pattern.permute.xlu0 %v10196_v25 }
  0x80   : > { %4102 = vperm.xlu0 %10171, %v10299_v3  }
  0x82   : > { %2978 = vperm.xlu1 %10161, %v10301_v4  }
  0x84   : > { %4111 = vperm.xlu0 %10171, %v10313_v7  }
  0x86   : > { %2981 = vperm.xlu1 %10161, %v10313_v7  }
  0x8a   : > { %10164 = vset.pattern.permute.xlu1 %v10192_v20 }
  0x8b   : > { %3201 = vperm.xlu1 %10164, %v10321_v9  }
  0x8f   : > { %3204 = vperm.xlu1 %10164, %v10301_v4  }
  0x93   : > { %10165 = vset.pattern.permute.xlu1 %v10193_v21  ;;  %v716_v29 = vpop.permute.xlu1 %715 }
  0x94   : > { %v710_v28 = vpop.permute.xlu0 %709  ;;  %3424 = vperm.xlu1 %10165, %v10299_v3   ;;  %vm722_vm5 = vcmp.eq.s32.totalorder %v716_v29, %v10388_v27 }
  0x95   : > { %vm720_vm3 = vcmp.eq.s32.totalorder %v710_v28, %v10388_v27  ;;  %v10454_v58 = vsel %vm722_vm5, 1.0, %v11817_v30 }
  0x96   : > { %v10393_v31 = vsel %vm720_vm3, 1.0, %v11817_v30 }
  0x97   : > { %8667 = vmatprep.mubr.msk.f32.mxu0 %vm732_vm2, %v10393_v31  ;;  %v719_v32 = vpop.permute.xlu1 %718 }
  0x98   : > { %3430 = vperm.xlu1 %10165, %v10301_v4   ;;  %v713_v52 = vpop.permute.xlu0 %712  ;;  %vm723_vm7 = vcmp.eq.s32.totalorder %v719_v32, %v10388_v27 }
  0x99   : > { %vm721_vm4 = vcmp.eq.s32.totalorder %v713_v52, %v10388_v27  ;;  %v10469_v61 = vsel %vm723_vm7, 1.0, %v11817_v30 }
  0x9a   : > { %v10450_v57 = vsel %vm721_vm4, 1.0, %v11817_v30 }
  0x9c   : > { %3433 = vperm.xlu1 %10165, %v10313_v7   ;;  %v10399_v33 = vpop.permute.xlu1 %941 }
  0x9d   : > { %v939_v56 = vpop.permute.xlu0 %938  ;;  %vm950_vm8 = vcmp.eq.s32.totalorder %v10399_v33, %v10388_v27 }
  0x9e   : > { %vm949_vm6 = vcmp.eq.s32.totalorder %v939_v56, %v10388_v27 }
  0x9f   : > { %v10463_v59 = vsel %vm949_vm6, 1.0, %v11817_v30 }
  0xa0   : > { %10168 = vset.pattern.permute.xlu1 %v10194_v23  ;;  %v10401_v34 = vpop.permute.xlu1 %944 }
  0xa1   : > { %3653 = vperm.xlu1 %10168, %v10321_v9   ;;  %v948_v62 = vpop.permute.xlu0 %947  ;;  %vm951_vm9 = vcmp.eq.s32.totalorder %v10401_v34, %v10388_v27 }
  0xa2   : > { %vm952_vm10 = vcmp.eq.s32.totalorder %v948_v62, %v10388_v27 }
  0xa3   : > { %v10510_v10 = vsel %vm952_vm10, 1.0, %v11817_v30 }
  0xa5   : > { %3656 = vperm.xlu1 %10168, %v10301_v4   ;;  %v10405_v35 = vpop.permute.xlu1 %1164 }
  0xa6   : > { %vm1175_vm11 = vcmp.eq.s32.totalorder %v10405_v35, %v10388_v27 }
  0xa7   : > { %v10513_v11 = vsel %vm1175_vm11, 1.0, %v11817_v30 }
  0xa9   : > { %10169 = vset.pattern.permute.xlu1 %v10195_v24  ;;  %v10408_v36 = vpop.permute.xlu1 %1170 }
  0xaa   : > { %3876 = vperm.xlu1 %10169, %v10299_v3   ;;  %v10490_v3 = vsel %vm950_vm8, 1.0, %v11817_v30  ;;  %vm1177_vm13 = vcmp.eq.s32.totalorder %v10408_v36, %v10388_v27 }
  0xab   : > { %v10530_v15 = vsel %vm1177_vm13, 1.0, %v11817_v30 }
  0xad   : > { %v10412_v37 = vpop.permute.xlu1 %1173 }
  0xae   : > { %3882 = vperm.xlu1 %10169, %v10301_v4   ;;  %vm1178_vm15 = vcmp.eq.s32.totalorder %v10412_v37, %v10388_v27 }
  0xaf   : > { %v10544_v17 = vsel %vm1178_vm15, 1.0, %v11817_v30 }
  0xb2   : > { %3885 = vperm.xlu1 %10169, %v10313_v7   ;;  %v10414_v38 = vpop.permute.xlu1 %1393  ;;  %v10493_v7 = vsel %vm951_vm9, 1.0, %v11817_v30 }
  0xb3   : > { %vm1402_vm3 = vcmp.eq.s32.totalorder %v10414_v38, %v10388_v27 }
  0xb4   : > { %v10559_v20 = vsel %vm1402_vm3, 1.0, %v11817_v30 }
  0xb6   : > { %10172 = vset.pattern.permute.xlu1 %v10196_v25  ;;  %v10418_v39 = vpop.permute.xlu1 %1396 }
  0xb7   : > { %4105 = vperm.xlu1 %10172, %v10321_v9   ;;  %vm1403_vm4 = vcmp.eq.s32.totalorder %v10418_v39, %v10388_v27 }
  0xb8   : > { %v10562_v22 = vsel %vm1403_vm4, 1.0, %v11817_v30 }
  0xbb   : > { %4108 = vperm.xlu1 %10172, %v10301_v4   ;;  %v10420_v40 = vpop.permute.xlu1 %1616  ;;  %v1168_v4 = vpop.permute.xlu0 %1167 }
  0xbc   : > { %vm1176_vm12 = vcmp.eq.s32.totalorder %v1168_v4, %v10388_v27  ;;  %vm1627_vm6 = vcmp.eq.s32.totalorder %v10420_v40, %v10388_v27 }
  0xbd   : > { %v10520_v12 = vsel %vm1176_vm12, 1.0, %v11817_v30  ;;  %v10580_v25 = vsel %vm1627_vm6, 1.0, %v11817_v30 }
  0xbf   : > { %v10422_v41 = vpop.permute.xlu1 %1622  ;;  %v1391_v13 = vpop.permute.xlu0 %1390 }
  0xc0   : > { %vm1401_vm14 = vcmp.eq.s32.totalorder %v1391_v13, %v10388_v27  ;;  %vm1629_vm8 = vcmp.eq.s32.totalorder %v10422_v41, %v10388_v27 }
  0xc1   : > { %v10540_v16 = vsel %vm1401_vm14, 1.0, %v11817_v30  ;;  %v10597_v32 = vsel %vm1629_vm8, 1.0, %v11817_v30 }
  0xc3   : > { %v10424_v42 = vpop.permute.xlu1 %1625  ;;  %v1400_v18 = vpop.permute.xlu0 %1399 }
  0xc4   : > { %vm1404_vm5 = vcmp.eq.s32.totalorder %v1400_v18, %v10388_v27  ;;  %vm1630_vm10 = vcmp.eq.s32.totalorder %v10424_v42, %v10388_v27 }
  0xc5   : > { %v10577_v24 = vsel %vm1404_vm5, 1.0, %v11817_v30  ;;  %v10611_v34 = vsel %vm1630_vm10, 1.0, %v11817_v30 }
  0xc7   : > { %v1620_v21 = vpop.permute.xlu0 %1619 }
  0xc8   : > { %v10426_v43 = vpop.permute.xlu1 %1845  ;;  %vm1628_vm7 = vcmp.eq.s32.totalorder %v1620_v21, %v10388_v27 }
  0xc9   : > { %v10587_v26 = vsel %vm1628_vm7, 1.0, %v11817_v30  ;;  %vm1854_vm11 = vcmp.eq.s32.totalorder %v10426_v43, %v10388_v27 }
  0xca   : > { %v10626_v37 = vsel %vm1854_vm11, 1.0, %v11817_v30 }
  0xcb   : > { %v1843_v28 = vpop.permute.xlu0 %1842 }
  0xcc   : > { %v10428_v44 = vpop.permute.xlu1 %1848  ;;  %vm1853_vm9 = vcmp.eq.s32.totalorder %v1843_v28, %v10388_v27 }
  0xcd   : > { %v10607_v33 = vsel %vm1853_vm9, 1.0, %v11817_v30  ;;  %vm1855_vm12 = vcmp.eq.s32.totalorder %v10428_v44, %v10388_v27 }
  0xce   : > { %v10629_v39 = vsel %vm1855_vm12, 1.0, %v11817_v30 }
  0xcf   : > { %v1852_v35 = vpop.permute.xlu0 %1851 }
  0xd0   : > { %vm1856_vm13 = vcmp.eq.s32.totalorder %v1852_v35, %v10388_v27 }
  0xd1   : > { %v10430_v45 = vpop.permute.xlu1 %2068  ;;  %v10644_v41 = vsel %vm1856_vm13, 1.0, %v11817_v30 }
  0xd2   : > { %vm2079_vm14 = vcmp.eq.s32.totalorder %v10430_v45, %v10388_v27 }
  0xd3   : > { %v2072_v38 = vpop.permute.xlu0 %2071  ;;  %v10647_v42 = vsel %vm2079_vm14, 1.0, %v11817_v30 }
  0xd4   : > { %vm2080_vm15 = vcmp.eq.s32.totalorder %v2072_v38, %v10388_v27 }
  0xd5   : > { %v10432_v46 = vpop.permute.xlu1 %2074  ;;  %v10654_v43 = vsel %vm2080_vm15, 1.0, %v11817_v30 }
  0xd6   : > { %vm2081_vm3 = vcmp.eq.s32.totalorder %v10432_v46, %v10388_v27 }
  0xd7   : > { %v2295_v44 = vpop.permute.xlu0 %2294  ;;  %v10662_v45 = vsel %vm2081_vm3, 1.0, %v11817_v30 }
  0xd8   : > { %vm2305_vm4 = vcmp.eq.s32.totalorder %v2295_v44, %v10388_v27 }
  0xd9   : > { %v10437_v51 = vpop.permute.xlu1 %2077 }
  0xda   : > { %vm2082_vm5 = vcmp.eq.s32.totalorder %v10437_v51, %v10388_v27 }
  0xde   : > { %v10444_v55 = vpop.permute.xlu1 %2297 }
  0xdf   : > { %vm2306_vm6 = vcmp.eq.s32.totalorder %v10444_v55, %v10388_v27 }
  0xe0   : > { %v10693_v52 = vsel %vm2306_vm6, 1.0, %v11817_v30 }
  0xe2   : > { %v10466_v60 = vpop.permute.xlu1 %2300 }
  0xe3   : > { %vm2307_vm7 = vcmp.eq.s32.totalorder %v10466_v60, %v10388_v27 }
  0xe4   : > { %v10696_v55 = vsel %vm2307_vm7, 1.0, %v11817_v30 }
  0xe7   : > { %v10498_v9 = vpop.permute.xlu1 %2520 }
  0xe8   : > { %v8647_v47 = vpop.f32.mrb[0].mxu0  ;;  %vm2531_vm9 = vcmp.eq.s32.totalorder %v10498_v9, %v10388_v27 }
  0xe9   : > { %v584_v48 = vpop.f32.mrb[1].mxu0  ;;  %v10714_v62 = vsel %vm2531_vm9, 1.0, %v11817_v30 }
  0xea   : > { %v10434_v49 = vpack.c.bf16 %v8647_v47, %v584_v48  ;;  %v10674_v47 = vsel %vm2305_vm4, 1.0, %v11817_v30  ;;  %v10678_v48 = vsel %vm2082_vm5, 1.0, %v11817_v30 }
  0xeb   : > { %v10526_v14 = vpop.permute.xlu1 %2526 }
  0xec   : > { %v8650_v50 = vpop.f32.mrb[2].mxu0  ;;  %9589 = vmatprep.subr.bf16.mxu0 %v10434_v49  ;;  %vm2533_vm11 = vcmp.eq.s32.totalorder %v10526_v14, %v10388_v27 }
  0xed   : > { %v594_v53 = vpop.f32.mrb[3].mxu0  ;;  %9591 = vmatpush3.bf16.msra.mxu0 %v10434_v49  ;;  %v10729_v4 = vsel %vm2533_vm11, 1.0, %v11817_v30 }
  0xee   : > { %v10440_v54 = vpack.c.bf16 %v8650_v50, %v594_v53  ;;  %v2304_v50 = vpop.permute.xlu0 %2303 }
  0xef   : > { %v10550_v19 = vpop.permute.xlu1 %2529  ;;  %vm2308_vm8 = vcmp.eq.s32.totalorder %v2304_v50, %v10388_v27 }
  0xf0   : > { %9593 = vmatprep.subr.bf16.mxu0 %v10440_v54  ;;  %v10711_v60 = vsel %vm2308_vm8, 1.0, %v11817_v30  ;;  %vm2534_vm13 = vcmp.eq.s32.totalorder %v10550_v19, %v10388_v27 }
  0xf1   : > { %9595 = vmatpush3.bf16.msra.mxu0 %v10440_v54  ;;  %v10745_v14 = vsel %vm2534_vm13, 1.0, %v11817_v30 }
  0xf2   : > { %9605 = vmatprep.subr.bf16.mxu0 %v10434_v49  ;;  %v2524_v53 = vpop.permute.xlu0 %2523 }
  0xf3   : > { %vm2532_vm10 = vcmp.eq.s32.totalorder %v2524_v53, %v10388_v27  ;;  %v10805_v53 = vpop.f32.mrb[0].mxu1 }
  0xf4   : > { %8668 = vmatmul.mubr.msk.f32.vlgmr.msra.gmra.mrb[4].mxu0 %vm732_vm2, %v10450_v57  ;;  %v10567_v23 = vpop.permute.xlu1 %2749  ;;  %v10721_v63 = vsel %vm2532_vm10, 1.0, %v11817_v30 }
  0xf5   : > { %8670 = vmatprep.mubr.msk.f32.mxu0 %vm732_vm2, %v10454_v58  ;;  %9607 = vmatpush3.bf16.msra.mxu0 %v10434_v49  ;;  %vm2758_vm14 = vcmp.eq.s32.totalorder %v10567_v23, %v10388_v27 }
  0xf6   : > { %9609 = vmatprep.subr.bf16.mxu0 %v10440_v54  ;;  %v2747_v0 = vpop.permute.xlu0 %2746  ;;  %v10760_v21 = vsel %vm2758_vm14, 1.0, %v11817_v30 }
  0xf7   : > { %vm2757_vm12 = vcmp.eq.s32.totalorder %v2747_v0, %v10388_v27 }
  0xf8   : > { %8671 = vmatmul.mubr.msk.f32.gmra.mrb[6].mxu0 %vm732_vm2, %v10469_v61  ;;  %v10593_v29 = vpop.permute.xlu1 %2752  ;;  %v10741_v13 = vsel %vm2757_vm12, 1.0, %v11817_v30 }
  0xf9   : > { %9611 = vmatpush3.bf16.msra.mxu0 %v10440_v54  ;;  %8695 = vmatprep.mubr.msk.f32.mxu0 %vm732_vm2, %v10463_v59  ;;  %vm2759_vm15 = vcmp.eq.s32.totalorder %v10593_v29, %v10388_v27 }
  0xfa   : > { %9621 = vmatprep.subr.bf16.mxu0 %v10434_v49  ;;  %v2756_v18 = vpop.permute.xlu0 %2755  ;;  %v10763_v23 = vsel %vm2759_vm15, 1.0, %v11817_v30 }
  0xfb   : > { %vm2760_vm3 = vcmp.eq.s32.totalorder %v2756_v18, %v10388_v27  ;;  %v10811_v18 = vpop.f32.mrb[1].mxu1 }
  0xfc   : > { %8696 = vmatmul.mubr.msk.f32.vlgmr.msra.gmra.mrb[8].mxu0 %vm732_vm2, %v10490_v3  ;;  %v10776_v29 = vsel %vm2760_vm3, 1.0, %v11817_v30 }
  0xfd   : > { %8698 = vmatprep.mubr.msk.f32.mxu0 %vm732_vm2, %v10493_v7  ;;  %9623 = vmatpush3.bf16.msra.mxu0 %v10434_v49  ;;  %v10617_v36 = vpop.permute.xlu1 %2972  ;;  %11842 = vst [vmem:[#allocation2_spill] sm:$0xff] %v10776_v29 }
  0xfe   : > { %9625 = vmatprep.subr.bf16.mxu0 %v10440_v54  ;;  %v2976_v28 = vpop.permute.xlu0 %2975  ;;  %vm2983_vm4 = vcmp.eq.s32.totalorder %v10617_v36, %v10388_v27 }
  0xff   : > { %vm2984_vm5 = vcmp.eq.s32.totalorder %v2976_v28, %v10388_v27  ;;  %v10779_v35 = vsel %vm2983_vm4, 1.0, %v11817_v30 }
 0x100   : > { %8699 = vmatmul.mubr.msk.f32.gmra.mrb[10].mxu0 %vm732_vm2, %v10510_v10  ;;  %11843 = vst [vmem:[#allocation3_spill] sm:$0xff] %v10779_v35  ;;  %v10788_v36 = vsel %vm2984_vm5, 1.0, %v11817_v30 }
 0x101   : > { %9627 = vmatpush3.bf16.msra.mxu0 %v10440_v54  ;;  %8723 = vmatprep.mubr.msk.f32.mxu0 %vm732_vm2, %v10513_v11  ;;  %v10641_v40 = vpop.permute.xlu1 %2978  ;;  %11844 = vst [vmem:[#allocation4_spill] sm:$0xff] %v10788_v36 }
 0x102   : > { %9637 = vmatprep.subr.bf16.mxu0 %v10434_v49  ;;  %vm2985_vm6 = vcmp.eq.s32.totalorder %v10641_v40, %v10388_v27  ;;  %v3199_v44 = vpop.permute.xlu0 %3198 }
 0x103   : > { %vm3209_vm7 = vcmp.eq.s32.totalorder %v3199_v44, %v10388_v27  ;;  %v10796_v50 = vsel %vm2985_vm6, 1.0, %v11817_v30  ;;  %v705_v44 = vld [vmem:[%s11805_s5 + $0x10] sm:$0xff] }
 0x104   : > { %8724 = vmatmul.mubr.msk.f32.vlgmr.msra.gmra.mrb[12].mxu0 %vm732_vm2, %v10520_v12  ;;  %11845 = vst [vmem:[#allocation5_spill] sm:$0xff] %v10796_v50  ;;  %v10808_v0 = vsel %vm3209_vm7, 1.0, %v11817_v30 }
 0x105   : > { %8726 = vmatprep.mubr.msk.f32.mxu0 %vm732_vm2, %v10530_v15  ;;  %9639 = vmatpush3.bf16.msra.mxu0 %v10434_v49  ;;  %v10668_v46 = vpop.permute.xlu1 %2981  ;;  %11846 = vst [vmem:[#allocation6_spill] sm:$0xff] %v10808_v0 }
 0x106   : > { %9641 = vmatprep.subr.bf16.mxu0 %v10440_v54  ;;  %vm2986_vm8 = vcmp.eq.s32.totalorder %v10668_v46, %v10388_v27  ;;  %v3208_v28 = vpop.permute.xlu0 %3207 }
 0x107   : > { %v10814_v46 = vsel %vm2986_vm8, 1.0, %v11817_v30  ;;  %v10833_v30 = vpop.f32.mrb[2].mxu1  ;;  %vm3212_vm11 = vcmp.eq.s32.totalorder %v3208_v28, %v10388_v27 }
 0x108   : > { %8727 = vmatmul.mubr.msk.f32.gmra.mrb[14].mxu0 %vm732_vm2, %v10544_v17 }
 0x109   : > { %9643 = vmatpush3.bf16.msra.mxu0 %v10440_v54  ;;  %8751 = vmatprep.mubr.msk.f32.mxu0 %vm732_vm2, %v10540_v16 }
 0x10a   : > { %9653 = vmatprep.subr.bf16.mxu0 %v10434_v49  ;;  %v10684_v51 = vpop.permute.xlu1 %3201 }
 0x10b   : > { %vm3210_vm9 = vcmp.eq.s32.totalorder %v10684_v51, %v10388_v27  ;;  %v11847_v51 = vmov 0.0  }
 0x10c   : > { %8752 = vmatmul.mubr.msk.f32.vlgmr.msra.gmra.mrb[16].mxu0 %vm732_vm2, %v10559_v20 }
 0x10d   : > { %8754 = vmatprep.mubr.msk.f32.mxu0 %vm732_vm2, %v10562_v22  ;;  %9655 = vmatpush3.bf16.msra.mxu0 %v10434_v49 }
 0x10e   : > { %9657 = vmatprep.subr.bf16.mxu0 %v10440_v54  ;;  %v10708_v56 = vpop.permute.xlu1 %3204 }
 0x10f   : > { %vm3211_vm10 = vcmp.eq.s32.totalorder %v10708_v56, %v10388_v27 }
 0x110   : > { %8755 = vmatmul.mubr.msk.f32.gmra.mrb[18].mxu0 %vm732_vm2, %v10577_v24  ;;  %v10844_v56 = vsel %vm3211_vm10, 1.0, %v11847_v51 }
 0x111   : > { %9659 = vmatpush3.bf16.msra.mxu0 %v10440_v54  ;;  %8779 = vmatprep.mubr.msk.f32.mxu0 %vm732_vm2, %v10580_v25  ;;  %11849 = vst [vmem:[#allocation8_spill] sm:$0xff] %v10844_v56 }
 0x112   : > { %9669 = vmatprep.subr.bf16.mxu0 %v10434_v49 }
 0x113   : > { %v10735_v9 = vpop.permute.xlu1 %3424 }
 0x114   : > { %8780 = vmatmul.mubr.msk.f32.vlgmr.msra.gmra.mrb[20].mxu0 %vm732_vm2, %v10587_v26  ;;  %vm3435_vm12 = vcmp.eq.s32.totalorder %v10735_v9, %v10388_v27 }
 0x115   : > { %8782 = vmatprep.mubr.msk.f32.mxu0 %vm732_vm2, %v10597_v32  ;;  %9671 = vmatpush3.bf16.msra.mxu0 %v10434_v49  ;;  %v10861_v28 = vsel %vm3435_vm12, 1.0, %v11847_v51 }
 0x116   : > { %9673 = vmatprep.subr.bf16.mxu0 %v10440_v54  ;;  %11851 = vst [vmem:[#allocation10_spill] sm:$0xff] %v10861_v28 }
 0x117   : > { %v10757_v19 = vpop.permute.xlu1 %3430 }
 0x118   : > { %8783 = vmatmul.mubr.msk.f32.gmra.mrb[22].mxu0 %vm732_vm2, %v10611_v34  ;;  %vm3437_vm14 = vcmp.eq.s32.totalorder %v10757_v19, %v10388_v27 }
 0x119   : > { %9675 = vmatpush3.bf16.msra.mxu0 %v10440_v54  ;;  %8807 = vmatprep.mubr.msk.f32.mxu0 %vm732_vm2, %v10607_v33 }
 0x11a   : > { %9685 = vmatprep.subr.bf16.mxu0 %v10434_v49 }
 0x11b   : > { %v10783_v38 = vpop.permute.xlu1 %3433 }
 0x11c   : > { %8808 = vmatmul.mubr.msk.f32.vlgmr.msra.gmra.mrb[24].mxu0 %vm732_vm2, %v10626_v37  ;;  %vm3438_vm3 = vcmp.eq.s32.totalorder %v10783_v38, %v10388_v27 }
 0x11d   : > { %8810 = vmatprep.mubr.msk.f32.mxu0 %vm732_vm2, %v10629_v39  ;;  %9687 = vmatpush3.bf16.msra.mxu0 %v10434_v49 }
 0x11e   : > { %9689 = vmatprep.subr.bf16.mxu0 %v10440_v54 }
 0x120   : > { %8811 = vmatmul.mubr.msk.f32.gmra.mrb[26].mxu0 %vm732_vm2, %v10644_v41  ;;  %v3654_v40 = vpop.permute.xlu1 %3653 }
 0x121   : > { %9691 = vmatpush3.bf16.msra.mxu0 %v10440_v54  ;;  %8835 = vmatprep.mubr.msk.f32.mxu0 %vm732_vm2, %v10647_v42  ;;  %vm3662_vm4 = vcmp.eq.s32.totalorder %v3654_v40, %v10388_v27 }
 0x122   : > { %9701 = vmatprep.subr.bf16.mxu0 %v10434_v49  ;;  %v10901_v38 = vsel %vm3662_vm4, 1.0, %v11847_v51 }
 0x123   : > { %11856 = vst [vmem:[#allocation15_spill] sm:$0xff] %v10901_v38 }
 0x124   : > { %8836 = vmatmul.mubr.msk.f32.vlgmr.msra.gmra.mrb[28].mxu0 %vm732_vm2, %v10654_v43 }
 0x125   : > { %8838 = vmatprep.mubr.msk.f32.mxu0 %vm732_vm2, %v10662_v45  ;;  %9703 = vmatpush3.bf16.msra.mxu0 %v10434_v49 }
 0x126   : > { %9705 = vmatprep.subr.bf16.mxu0 %v10440_v54 }
 0x128   : > { %8839 = vmatmul.mubr.msk.f32.gmra.mrb[30].mxu0 %vm732_vm2, %v10678_v48 }
 0x129   : > { %9707 = vmatpush3.bf16.msra.mxu0 %v10440_v54  ;;  %8863 = vmatprep.mubr.msk.f32.mxu0 %vm732_vm2, %v10674_v47 }
 0x12a   : > { %9717 = vmatprep.subr.bf16.mxu0 %v10434_v49 }
 0x12c   : > { %8864 = vmatmul.mubr.msk.f32.vlgmr.msra.gmra.mrb[32].mxu0 %vm732_vm2, %v10693_v52 }
 0x12d   : > { %8866 = vmatprep.mubr.msk.f32.mxu0 %vm732_vm2, %v10696_v55  ;;  %9719 = vmatpush3.bf16.msra.mxu0 %v10434_v49 }
 0x12e   : > { %9721 = vmatprep.subr.bf16.mxu0 %v10440_v54 }
 0x130   : > { %8867 = vmatmul.mubr.msk.f32.gmra.mrb[34].mxu0 %vm732_vm2, %v10711_v60 }
 0x131   : > { %9723 = vmatpush3.bf16.msra.mxu0 %v10440_v54  ;;  %8891 = vmatprep.mubr.msk.f32.mxu0 %vm732_vm2, %v10714_v62 }
 0x132   : > { %9733 = vmatprep.subr.bf16.mxu0 %v10434_v49 }
 0x134   : > { %8892 = vmatmul.mubr.msk.f32.vlgmr.msra.gmra.mrb[36].mxu0 %vm732_vm2, %v10721_v63 }
 0x135   : > { %8894 = vmatprep.mubr.msk.f32.mxu0 %vm732_vm2, %v10729_v4  ;;  %9735 = vmatpush3.bf16.msra.mxu0 %v10434_v49 }
 0x136   : > { %9737 = vmatprep.subr.bf16.mxu0 %v10440_v54 }
 0x138   : > { %8895 = vmatmul.mubr.msk.f32.gmra.mrb[38].mxu0 %vm732_vm2, %v10745_v14 }
 0x139   : > { %9739 = vmatpush3.bf16.msra.mxu0 %v10440_v54  ;;  %8919 = vmatprep.mubr.msk.f32.mxu0 %vm732_vm2, %v10741_v13 }
 0x13a   : > { %9749 = vmatprep.subr.bf16.mxu0 %v10434_v49 }
 0x13c   : > { %8920 = vmatmul.mubr.msk.f32.vlgmr.msra.gmra.mrb[40].mxu0 %vm732_vm2, %v10760_v21 }
 0x13d   : > { %8922 = vmatprep.mubr.msk.f32.mxu0 %vm732_vm2, %v10763_v23  ;;  %9751 = vmatpush3.bf16.msra.mxu0 %v10434_v49 }
 0x13e   : > { %9753 = vmatprep.subr.bf16.mxu0 %v10440_v54 }
 0x140   : > { %8923 = vmatmul.mubr.msk.f32.gmra.mrb[42].mxu0 %vm732_vm2, %v10776_v29  ;;  %v10836_v29 = vpop.f32.mrb[3].mxu1 }
 0x141   : > { %9755 = vmatpush3.bf16.msra.mxu0 %v10440_v54  ;;  %8947 = vmatprep.mubr.msk.f32.mxu0 %vm732_vm2, %v10779_v35  ;;  %v3657_v35 = vpop.permute.xlu1 %3656 }
 0x142   : > { %9765 = vmatprep.subr.bf16.mxu0 %v10434_v49  ;;  %vm3663_vm5 = vcmp.eq.s32.totalorder %v3657_v35, %v10388_v27 }
 0x144   : > { %8948 = vmatmul.mubr.msk.f32.vlgmr.msra.gmra.mrb[44].mxu0 %vm732_vm2, %v10788_v36 }
 0x145   : > { %8950 = vmatprep.mubr.msk.f32.mxu0 %vm732_vm2, %v10796_v50  ;;  %9767 = vmatpush3.bf16.msra.mxu0 %v10434_v49  ;;  %v706_v50 = vld [vmem:[%s11805_s5 + $0x18] sm:$0xff] }
 0x146   : > { %9769 = vmatprep.subr.bf16.mxu0 %v10440_v54  ;;  %v10826_v36 = vpack.c.bf16 %v706_v50, %v705_v44  ;;  %v10840_v50 = vsel %vm3210_vm9, 1.0, %v11847_v51  ;;  %v3428_v44 = vpop.permute.xlu0 %3427 }
 0x147   : > { %11848 = vst [vmem:[#allocation7_spill] sm:$0xff] %v10840_v50  ;;  %vm3436_vm13 = vcmp.eq.s32.totalorder %v3428_v44, %v10388_v27 }
 0x148   : > { %8951 = vmatmul.mubr.msk.f32.gmra.mrb[46].mxu0 %vm732_vm2, %v10814_v46  ;;  %9601 = vmatprep.subr.bf16.mxu1 %v10826_v36  ;;  %v10868_v9 = vsel %vm3436_vm13, 1.0, %v11847_v51 }
 0x149   : > { %9771 = vmatpush3.bf16.msra.mxu0 %v10440_v54  ;;  %8975 = vmatprep.mubr.msk.f32.mxu0 %vm732_vm2, %v10808_v0  ;;  %v10858_v0 = vsel %vm3212_vm11, 1.0, %v11847_v51  ;;  %11852 = vst [vmem:[#allocation11_spill] sm:$0xff] %v10868_v9 }
 0x14a   : > { %9781 = vmatprep.subr.bf16.mxu0 %v10434_v49  ;;  %9603 = vmatpush3.bf16.msra.mxu1 %v10826_v36  ;;  %11850 = vst [vmem:[#allocation9_spill] sm:$0xff] %v10858_v0  ;;  %v3651_v44 = vpop.permute.xlu0 %3650 }
 0x14b   : > { %9613 = vmatprep.subr.bf16.mxu1 %v10487_v1  ;;  %vm3661_vm15 = vcmp.eq.s32.totalorder %v3651_v44, %v10388_v27 }
 0x14c   : > { %8976 = vmatmul.mubr.msk.f32.vlgmr.msra.gmra.mrb[48].mxu0 %vm732_vm2, %v10840_v50  ;;  %v3877_v50 = vpop.permute.xlu1 %3876  ;;  %v10886_v19 = vsel %vm3661_vm15, 1.0, %v11847_v51 }
 0x14d   : > { %8978 = vmatprep.mubr.msk.f32.mxu0 %vm732_vm2, %v10844_v56  ;;  %9783 = vmatpush3.bf16.msra.mxu0 %v10434_v49  ;;  %v10876_v56 = vsel %vm3437_vm14, 1.0, %v11847_v51  ;;  %11854 = vst [vmem:[#allocation13_spill] sm:$0xff] %v10886_v19  ;;  %vm3887_vm7 = vcmp.eq.s32.totalorder %v3877_v50, %v10388_v27 }
 0x14e   : > { %9785 = vmatprep.subr.bf16.mxu0 %v10440_v54  ;;  %11853 = vst [vmem:[#allocation12_spill] sm:$0xff] %v10876_v56 }
 0x150   : > { %8979 = vmatmul.mubr.msk.f32.gmra.mrb[50].mxu0 %vm732_vm2, %v10858_v0  ;;  %v3883_v44 = vpop.permute.xlu1 %3882  ;;  %v3660_v0 = vpop.permute.xlu0 %3659 }
 0x151   : > { %9787 = vmatpush3.bf16.msra.mxu0 %v10440_v54  ;;  %9003 = vmatprep.mubr.msk.f32.mxu0 %vm732_vm2, %v10861_v28  ;;  %v10890_v28 = vsel %vm3438_vm3, 1.0, %v11847_v51  ;;  %vm3664_vm6 = vcmp.eq.s32.totalorder %v3660_v0, %v10388_v27  ;;  %v10919_v0 = vsel %vm3887_vm7, 1.0, %v11847_v51  ;;  %vm3889_vm9 = vcmp.eq.s32.totalorder %v3883_v44, %v10388_v27 }
 0x152   : > { %9797 = vmatprep.subr.bf16.mxu0 %v10434_v49  ;;  %11855 = vst [vmem:[#allocation14_spill] sm:$0xff] %v10890_v28  ;;  %v10916_v35 = vsel %vm3664_vm6, 1.0, %v11847_v51  ;;  %11859 = vst [vmem:[#allocation18_spill] sm:$0xff] %v10919_v0 }
 0x153   : > { %11858 = vst [vmem:[#allocation17_spill] sm:$0xff] %v10916_v35 }
 0x154   : > { %9004 = vmatmul.mubr.msk.f32.vlgmr.msra.gmra.mrb[52].mxu0 %vm732_vm2, %v10868_v9  ;;  %v10904_v9 = vsel %vm3663_vm5, 1.0, %v11847_v51  ;;  %v3886_v40 = vpop.permute.xlu1 %3885 }
 0x155   : > { %9006 = vmatprep.mubr.msk.f32.mxu0 %vm732_vm2, %v10876_v56  ;;  %9799 = vmatpush3.bf16.msra.mxu0 %v10434_v49  ;;  %v3880_v56 = vpop.permute.xlu0 %3879  ;;  %11857 = vst [vmem:[#allocation16_spill] sm:$0xff] %v10904_v9  ;;  %vm3890_vm11 = vcmp.eq.s32.totalorder %v3886_v40, %v10388_v27  ;;  %v4331_v40 = vld [vmem:[%s11808_s8] sm:$0x7] }
 0x156   : > { %9801 = vmatprep.subr.bf16.mxu0 %v10440_v54  ;;  %vm3888_vm8 = vcmp.eq.s32.totalorder %v3880_v56, %v10388_v27 }
 0x157   : > { %v10925_v50 = vsel %vm3888_vm8, 1.0, %v11847_v51 }
 0x158   : > { %9007 = vmatmul.mubr.msk.f32.gmra.mrb[54].mxu0 %vm732_vm2, %v10890_v28  ;;  %11860 = vst [vmem:[#allocation19_spill] sm:$0xff] %v10925_v50 }
 0x159   : > { %9803 = vmatpush3.bf16.msra.mxu0 %v10440_v54  ;;  %9031 = vmatprep.mubr.msk.f32.mxu0 %vm732_vm2, %v10886_v19  ;;  %v4103_v56 = vpop.permute.xlu0 %4102 }
 0x15a   : > { %9813 = vmatprep.subr.bf16.mxu0 %v10434_v49  ;;  %vm4113_vm10 = vcmp.eq.s32.totalorder %v4103_v56, %v10388_v27 }
 0x15b   : > { %v10943_v44 = vsel %vm4113_vm10, 1.0, %v11847_v51 }
 0x15c   : > { %9032 = vmatmul.mubr.msk.f32.vlgmr.msra.gmra.mrb[56].mxu0 %vm732_vm2, %v10901_v38  ;;  %v4106_v38 = vpop.permute.xlu1 %4105  ;;  %11862 = vst [vmem:[#allocation21_spill] sm:$0xff] %v10943_v44 }
 0x15d   : > { %9034 = vmatprep.mubr.msk.f32.mxu0 %vm732_vm2, %v10904_v9  ;;  %9815 = vmatpush3.bf16.msra.mxu0 %v10434_v49  ;;  %v10933_v9 = vsel %vm3889_vm9, 1.0, %v11847_v51  ;;  %vm4114_vm12 = vcmp.eq.s32.totalorder %v4106_v38, %v10388_v27  ;;  %v4112_v38 = vpop.permute.xlu0 %4111 }
 0x15e   : > { %9817 = vmatprep.subr.bf16.mxu0 %v10440_v54  ;;  %11861 = vst [vmem:[#allocation20_spill] sm:$0xff] %v10933_v9  ;;  %vm4116_vm14 = vcmp.eq.s32.totalorder %v4112_v38, %v10388_v27 }
 0x160   : > { %9035 = vmatmul.mubr.msk.f32.gmra.mrb[58].mxu0 %vm732_vm2, %v10916_v35  ;;  %v4109_v56 = vpop.permute.xlu1 %4108 }
 0x161   : > { %9819 = vmatpush3.bf16.msra.mxu0 %v10440_v54  ;;  %9059 = vmatprep.mubr.msk.f32.mxu0 %vm732_vm2, %v10919_v0  ;;  %v10947_v0 = vsel %vm3890_vm11, 1.0, %v11847_v51  ;;  %vm4115_vm13 = vcmp.eq.s32.totalorder %v4109_v56, %v10388_v27  ;;  %v7766_v27 = vld [vmem:[%s11804_s4] ss:$0 sm:$0xff] }
 0x162   : > { %9829 = vmatprep.subr.bf16.mxu0 %v10434_v49  ;;  %11863 = vst [vmem:[#allocation22_spill] sm:$0xff] %v10947_v0  ;;  %v10990_v56 = vsub.f32 %v7766_v27, %v10805_v53 }
 0x164   : > { %9060 = vmatmul.mubr.msk.f32.vlgmr.msra.gmra.mrb[60].mxu0 %vm732_vm2, %v10925_v50 }
 0x165   : > { %9062 = vmatprep.mubr.msk.f32.mxu0 %vm732_vm2, %v10933_v9  ;;  %9831 = vmatpush3.bf16.msra.mxu0 %v10434_v49  ;;  %v10955_v49 = vsel %vm4114_vm12, 1.0, %v11847_v51  ;;  %v10963_v9 = vsel %vm4115_vm13, 1.0, %v11847_v51 }
 0x166   : > { %9833 = vmatprep.subr.bf16.mxu0 %v10440_v54  ;;  %11864 = vst [vmem:[#allocation23_spill] sm:$0xff] %v10955_v49  ;;  %11865 = vst [vmem:[#allocation24_spill] sm:$0xff] %v10963_v9 }
 0x168   : > { %9063 = vmatmul.mubr.msk.f32.gmra.mrb[62].mxu0 %vm732_vm2, %v10947_v0 }
 0x169   : > { %9835 = vmatpush3.bf16.msra.mxu0 %v10440_v54  ;;  %9087 = vmatprep.mubr.msk.f32.mxu0 %vm732_vm2, %v10943_v44  ;;  %v10972_v54 = vsel %vm4116_vm14, 1.0, %v11847_v51 }
 0x16a   : > { %9107 = vmatprep.subr.msk.mxu0 %vm514_vm0, %v4331_v40  ;;  %11866 = vst [vmem:[#allocation25_spill] sm:$0xff] %v10972_v54 }
 0x16c   : > { %9088 = vmatmul.mubr.msk.f32.vlgmr.msra.gmra.mrb[64].mxu0 %vm732_vm2, %v10955_v49 }
 0x16d   : > { %9090 = vmatprep.mubr.msk.f32.mxu0 %vm732_vm2, %v10963_v9  ;;  %9108 = vmatpush3.msk.msra.mxu0 %vm514_vm0, %v4331_v40  ;;  %vm10199_vm0 = vmmov 0  }
 0x170   : > { %9091 = vmatmul.mubr.msk.f32.gmra.mrb[66].mxu0 %vm732_vm2, %v10972_v54 }
 0x171   : > { %9109 = vmatprep.mubr.msk.f32.mxu0 %vm501_vm1, %v10297_v2  ;;  %v10993_v2 = vsub.f32 %v7766_v27, %v10811_v18 }
 0x174   : > { %9110 = vmatmul.mubr.msk.f32.vlgmr.msra.gmra.mrb[68].mxu0 %vm501_vm1, %v10305_v5 }
 0x175   : > { %9112 = vmatprep.mubr.msk.f32.mxu0 %vm501_vm1, %v10310_v6  ;;  %v10997_v6 = vsub.f32 %v7766_v27, %v10833_v30 }
 0x178   : > { %9113 = vmatmul.mubr.msk.f32.gmra.mrb[70].mxu0 %vm501_vm1, %v10317_v8 }
 0x179   : > { %9137 = vmatprep.mubr.msk.f32.mxu0 %vm732_vm2, %v10393_v31  ;;  %v11001_v31 = vsub.f32 %v7766_v27, %v10836_v29 }
 0x1c7   : > { %v8669_v5 = vpop.f32.mrb[4].mxu0 }
 0x1c8   : > { %v817_v40 = vadd.f32 %v8669_v5, %v10990_v56  ;;  %v811_v8 = vpop.f32.mrb[5].mxu0 }
 0x1c9   : > { %v812_v38 = vadd.f32 %v811_v8, %v10993_v2 }
 0x1ca   : > { %v831_v9 = vmax.f32 %v817_v40, 0.0 }
 0x1cb   : > { %v830_v51 = vmax.f32 %v812_v38, 0.0  ;;  %v8672_v54 = vpop.f32.mrb[6].mxu0 }
 0x1cc   : > { %v827_v53 = vadd.f32 %v8672_v54, %v10997_v6  ;;  %v821_v49 = vpop.f32.mrb[7].mxu0 }
 0x1cd   : > { %v822_v18 = vadd.f32 %v821_v49, %v11001_v31  ;;  %8681 = vmatprep.mubr.msk.f32.mxu1 %vm732_vm2, %v830_v51 }
 0x1ce   : > { %8682 = vmatmul.mubr.msk.f32.vlgmr.msra.gmra.mrb[4].mxu1 %vm732_vm2, %v831_v9  ;;  %v833_v8 = vmax.f32 %v827_v53, 0.0 }
 0x1cf   : > { %v832_v30 = vmax.f32 %v822_v18, 0.0  ;;  %v8697_v5 = vpop.f32.mrb[8].mxu0  ;;  %9615 = vmatpush3.bf16.msra.mxu1 %v10487_v1 }
 0x1d0   : > { %v1045_v29 = vadd.f32 %v8697_v5, %v10990_v56  ;;  %v1039_v27 = vpop.f32.mrb[9].mxu0  ;;  %9617 = vmatprep.subr.bf16.mxu1 %v10826_v36 }
 0x1d1   : > { %v1040_v40 = vadd.f32 %v1039_v27, %v10993_v2  ;;  %8684 = vmatprep.mubr.msk.f32.mxu1 %vm732_vm2, %v832_v30 }
 0x1d2   : > { %8685 = vmatmul.mubr.msk.f32.gmra.mrb[6].mxu1 %vm732_vm2, %v833_v8  ;;  %v1059_v9 = vmax.f32 %v1045_v29, 0.0 }
 0x1d3   : > { %v1058_v49 = vmax.f32 %v1040_v40, 0.0  ;;  %v8700_v51 = vpop.f32.mrb[10].mxu0  ;;  %9619 = vmatpush3.bf16.msra.mxu1 %v10826_v36 }
 0x1d4   : > { %v1055_v54 = vadd.f32 %v8700_v51, %v10997_v6  ;;  %v1049_v38 = vpop.f32.mrb[11].mxu0  ;;  %9629 = vmatprep.subr.bf16.mxu1 %v10487_v1 }
 0x1d5   : > { %v1050_v53 = vadd.f32 %v1049_v38, %v11001_v31  ;;  %8709 = vmatprep.mubr.msk.f32.mxu1 %vm732_vm2, %v1058_v49 }
 0x1d6   : > { %8710 = vmatmul.mubr.msk.f32.vlgmr.msra.gmra.mrb[8].mxu1 %vm732_vm2, %v1059_v9  ;;  %v1061_v5 = vmax.f32 %v1055_v54, 0.0 }
 0x1d7   : > { %v1060_v18 = vmax.f32 %v1050_v53, 0.0  ;;  %v8725_v30 = vpop.f32.mrb[12].mxu0  ;;  %9631 = vmatpush3.bf16.msra.mxu1 %v10487_v1 }
 0x1d8   : > { %v1271_v8 = vadd.f32 %v8725_v30, %v10990_v56  ;;  %v1265_v27 = vpop.f32.mrb[13].mxu0  ;;  %9633 = vmatprep.subr.bf16.mxu1 %v10826_v36 }
 0x1d9   : > { %v1266_v29 = vadd.f32 %v1265_v27, %v10993_v2  ;;  %8712 = vmatprep.mubr.msk.f32.mxu1 %vm732_vm2, %v1060_v18 }
 0x1da   : > { %8713 = vmatmul.mubr.msk.f32.gmra.mrb[10].mxu1 %vm732_vm2, %v1061_v5  ;;  %v1285_v51 = vmax.f32 %v1271_v8, 0.0 }
 0x1db   : > { %v1284_v40 = vmax.f32 %v1266_v29, 0.0  ;;  %v8728_v49 = vpop.f32.mrb[14].mxu0  ;;  %9635 = vmatpush3.bf16.msra.mxu1 %v10826_v36 }
 0x1dc   : > { %v1281_v9 = vadd.f32 %v8728_v49, %v10997_v6  ;;  %v1275_v38 = vpop.f32.mrb[15].mxu0  ;;  %9645 = vmatprep.subr.bf16.mxu1 %v10487_v1 }
 0x1dd   : > { %v1276_v54 = vadd.f32 %v1275_v38, %v11001_v31  ;;  %8737 = vmatprep.mubr.msk.f32.mxu1 %vm732_vm2, %v1284_v40 }
 0x1de   : > { %8738 = vmatmul.mubr.msk.f32.vlgmr.msra.gmra.mrb[12].mxu1 %vm732_vm2, %v1285_v51  ;;  %v1287_v30 = vmax.f32 %v1281_v9, 0.0 }
 0x1df   : > { %v1286_v53 = vmax.f32 %v1276_v54, 0.0  ;;  %v8753_v18 = vpop.f32.mrb[16].mxu0  ;;  %9647 = vmatpush3.bf16.msra.mxu1 %v10487_v1 }
 0x1e0   : > { %v1497_v5 = vadd.f32 %v8753_v18, %v10990_v56  ;;  %v1491_v27 = vpop.f32.mrb[17].mxu0  ;;  %9649 = vmatprep.subr.bf16.mxu1 %v10826_v36 }
 0x1e1   : > { %v1492_v8 = vadd.f32 %v1491_v27, %v10993_v2  ;;  %8740 = vmatprep.mubr.msk.f32.mxu1 %vm732_vm2, %v1286_v53 }
 0x1e2   : > { %8741 = vmatmul.mubr.msk.f32.gmra.mrb[14].mxu1 %vm732_vm2, %v1287_v30  ;;  %v1511_v49 = vmax.f32 %v1497_v5, 0.0 }
 0x1e3   : > { %v1510_v29 = vmax.f32 %v1492_v8, 0.0  ;;  %v8756_v40 = vpop.f32.mrb[18].mxu0  ;;  %9651 = vmatpush3.bf16.msra.mxu1 %v10826_v36 }
 0x1e4   : > { %v1507_v51 = vadd.f32 %v8756_v40, %v10997_v6  ;;  %v1501_v38 = vpop.f32.mrb[19].mxu0  ;;  %9661 = vmatprep.subr.bf16.mxu1 %v10487_v1 }
 0x1e5   : > { %v1502_v9 = vadd.f32 %v1501_v38, %v11001_v31  ;;  %8765 = vmatprep.mubr.msk.f32.mxu1 %vm732_vm2, %v1510_v29 }
 0x1e6   : > { %8766 = vmatmul.mubr.msk.f32.vlgmr.msra.gmra.mrb[16].mxu1 %vm732_vm2, %v1511_v49  ;;  %v1513_v18 = vmax.f32 %v1507_v51, 0.0 }
 0x1e7   : > { %v1512_v54 = vmax.f32 %v1502_v9, 0.0  ;;  %v8781_v53 = vpop.f32.mrb[20].mxu0  ;;  %9663 = vmatpush3.bf16.msra.mxu1 %v10487_v1 }
 0x1e8   : > { %v1723_v30 = vadd.f32 %v8781_v53, %v10990_v56  ;;  %v1717_v27 = vpop.f32.mrb[21].mxu0  ;;  %9665 = vmatprep.subr.bf16.mxu1 %v10826_v36 }
 0x1e9   : > { %v1718_v5 = vadd.f32 %v1717_v27, %v10993_v2  ;;  %8768 = vmatprep.mubr.msk.f32.mxu1 %vm732_vm2, %v1512_v54 }
 0x1ea   : > { %8769 = vmatmul.mubr.msk.f32.gmra.mrb[18].mxu1 %vm732_vm2, %v1513_v18  ;;  %v1737_v40 = vmax.f32 %v1723_v30, 0.0 }
 0x1eb   : > { %v1736_v8 = vmax.f32 %v1718_v5, 0.0  ;;  %v8784_v29 = vpop.f32.mrb[22].mxu0  ;;  %9667 = vmatpush3.bf16.msra.mxu1 %v10826_v36 }
 0x1ec   : > { %v1733_v49 = vadd.f32 %v8784_v29, %v10997_v6  ;;  %v1727_v38 = vpop.f32.mrb[23].mxu0  ;;  %9677 = vmatprep.subr.bf16.mxu1 %v10487_v1 }
 0x1ed   : > { %v1728_v51 = vadd.f32 %v1727_v38, %v11001_v31  ;;  %8793 = vmatprep.mubr.msk.f32.mxu1 %vm732_vm2, %v1736_v8 }
 0x1ee   : > { %8794 = vmatmul.mubr.msk.f32.vlgmr.msra.gmra.mrb[20].mxu1 %vm732_vm2, %v1737_v40  ;;  %v1739_v53 = vmax.f32 %v1733_v49, 0.0 }
 0x1ef   : > { %v1738_v9 = vmax.f32 %v1728_v51, 0.0  ;;  %v8809_v54 = vpop.f32.mrb[24].mxu0  ;;  %9679 = vmatpush3.bf16.msra.mxu1 %v10487_v1 }
 0x1f0   : > { %v1949_v18 = vadd.f32 %v8809_v54, %v10990_v56  ;;  %v1943_v27 = vpop.f32.mrb[25].mxu0  ;;  %9681 = vmatprep.subr.bf16.mxu1 %v10826_v36 }
 0x1f1   : > { %v1944_v30 = vadd.f32 %v1943_v27, %v10993_v2  ;;  %8796 = vmatprep.mubr.msk.f32.mxu1 %vm732_vm2, %v1738_v9 }
 0x1f2   : > { %8797 = vmatmul.mubr.msk.f32.gmra.mrb[22].mxu1 %vm732_vm2, %v1739_v53  ;;  %v1963_v29 = vmax.f32 %v1949_v18, 0.0 }
 0x1f3   : > { %v1962_v5 = vmax.f32 %v1944_v30, 0.0  ;;  %v8812_v8 = vpop.f32.mrb[26].mxu0  ;;  %9683 = vmatpush3.bf16.msra.mxu1 %v10826_v36 }
 0x1f4   : > { %v1959_v40 = vadd.f32 %v8812_v8, %v10997_v6  ;;  %v1953_v38 = vpop.f32.mrb[27].mxu0  ;;  %9693 = vmatprep.subr.bf16.mxu1 %v10487_v1 }
 0x1f5   : > { %v1954_v49 = vadd.f32 %v1953_v38, %v11001_v31  ;;  %8821 = vmatprep.mubr.msk.f32.mxu1 %vm732_vm2, %v1962_v5 }
 0x1f6   : > { %8822 = vmatmul.mubr.msk.f32.vlgmr.msra.gmra.mrb[24].mxu1 %vm732_vm2, %v1963_v29  ;;  %v1965_v54 = vmax.f32 %v1959_v40, 0.0 }
 0x1f7   : > { %v1964_v51 = vmax.f32 %v1954_v49, 0.0  ;;  %v8837_v9 = vpop.f32.mrb[28].mxu0  ;;  %9695 = vmatpush3.bf16.msra.mxu1 %v10487_v1 }
 0x1f8   : > { %v2175_v53 = vadd.f32 %v8837_v9, %v10990_v56  ;;  %v2169_v27 = vpop.f32.mrb[29].mxu0  ;;  %9697 = vmatprep.subr.bf16.mxu1 %v10826_v36 }
 0x1f9   : > { %v2170_v18 = vadd.f32 %v2169_v27, %v10993_v2  ;;  %8824 = vmatprep.mubr.msk.f32.mxu1 %vm732_vm2, %v1964_v51 }
 0x1fa   : > { %8825 = vmatmul.mubr.msk.f32.gmra.mrb[26].mxu1 %vm732_vm2, %v1965_v54  ;;  %v2189_v8 = vmax.f32 %v2175_v53, 0.0 }
 0x1fb   : > { %v2188_v30 = vmax.f32 %v2170_v18, 0.0  ;;  %v8840_v5 = vpop.f32.mrb[30].mxu0  ;;  %9699 = vmatpush3.bf16.msra.mxu1 %v10826_v36 }
 0x1fc   : > { %v2185_v29 = vadd.f32 %v8840_v5, %v10997_v6  ;;  %v2179_v38 = vpop.f32.mrb[31].mxu0  ;;  %9709 = vmatprep.subr.bf16.mxu1 %v10487_v1 }
 0x1fd   : > { %v2180_v40 = vadd.f32 %v2179_v38, %v11001_v31  ;;  %8849 = vmatprep.mubr.msk.f32.mxu1 %vm732_vm2, %v2188_v30 }
 0x1fe   : > { %8850 = vmatmul.mubr.msk.f32.vlgmr.msra.gmra.mrb[28].mxu1 %vm732_vm2, %v2189_v8  ;;  %v2191_v9 = vmax.f32 %v2185_v29, 0.0 }
 0x1ff   : > { %v2190_v49 = vmax.f32 %v2180_v40, 0.0  ;;  %v8865_v51 = vpop.f32.mrb[32].mxu0  ;;  %9711 = vmatpush3.bf16.msra.mxu1 %v10487_v1 }
 0x200   : > { %v2401_v54 = vadd.f32 %v8865_v51, %v10990_v56  ;;  %v2395_v27 = vpop.f32.mrb[33].mxu0  ;;  %9713 = vmatprep.subr.bf16.mxu1 %v10826_v36 }
 0x201   : > { %v2396_v53 = vadd.f32 %v2395_v27, %v10993_v2  ;;  %8852 = vmatprep.mubr.msk.f32.mxu1 %vm732_vm2, %v2190_v49 }
 0x202   : > { %8853 = vmatmul.mubr.msk.f32.gmra.mrb[30].mxu1 %vm732_vm2, %v2191_v9  ;;  %v2415_v5 = vmax.f32 %v2401_v54, 0.0 }
 0x203   : > { %v2414_v18 = vmax.f32 %v2396_v53, 0.0  ;;  %v8868_v30 = vpop.f32.mrb[34].mxu0  ;;  %9715 = vmatpush3.bf16.msra.mxu1 %v10826_v36 }
 0x204   : > { %v2411_v8 = vadd.f32 %v8868_v30, %v10997_v6  ;;  %v2405_v38 = vpop.f32.mrb[35].mxu0  ;;  %9725 = vmatprep.subr.bf16.mxu1 %v10487_v1 }
 0x205   : > { %v2406_v29 = vadd.f32 %v2405_v38, %v11001_v31  ;;  %8877 = vmatprep.mubr.msk.f32.mxu1 %vm732_vm2, %v2414_v18 }
 0x206   : > { %8878 = vmatmul.mubr.msk.f32.vlgmr.msra.gmra.mrb[32].mxu1 %vm732_vm2, %v2415_v5  ;;  %v2417_v51 = vmax.f32 %v2411_v8, 0.0 }
 0x207   : > { %v2416_v40 = vmax.f32 %v2406_v29, 0.0  ;;  %v8893_v49 = vpop.f32.mrb[36].mxu0  ;;  %9727 = vmatpush3.bf16.msra.mxu1 %v10487_v1 }
 0x208   : > { %v2627_v9 = vadd.f32 %v8893_v49, %v10990_v56  ;;  %v2621_v27 = vpop.f32.mrb[37].mxu0  ;;  %9729 = vmatprep.subr.bf16.mxu1 %v10826_v36 }
 0x209   : > { %v2622_v54 = vadd.f32 %v2621_v27, %v10993_v2  ;;  %8880 = vmatprep.mubr.msk.f32.mxu1 %vm732_vm2, %v2416_v40 }
 0x20a   : > { %8881 = vmatmul.mubr.msk.f32.gmra.mrb[34].mxu1 %vm732_vm2, %v2417_v51  ;;  %v2641_v30 = vmax.f32 %v2627_v9, 0.0 }
 0x20b   : > { %v2640_v53 = vmax.f32 %v2622_v54, 0.0  ;;  %v8896_v18 = vpop.f32.mrb[38].mxu0  ;;  %9731 = vmatpush3.bf16.msra.mxu1 %v10826_v36 }
 0x20c   : > { %v2637_v5 = vadd.f32 %v8896_v18, %v10997_v6  ;;  %v2631_v38 = vpop.f32.mrb[39].mxu0  ;;  %9741 = vmatprep.subr.bf16.mxu1 %v10487_v1 }
 0x20d   : > { %v2632_v8 = vadd.f32 %v2631_v38, %v11001_v31  ;;  %8905 = vmatprep.mubr.msk.f32.mxu1 %vm732_vm2, %v2640_v53 }
 0x20e   : > { %8906 = vmatmul.mubr.msk.f32.vlgmr.msra.gmra.mrb[36].mxu1 %vm732_vm2, %v2641_v30  ;;  %v2643_v49 = vmax.f32 %v2637_v5, 0.0 }
 0x20f   : > { %v2642_v29 = vmax.f32 %v2632_v8, 0.0  ;;  %v8921_v40 = vpop.f32.mrb[40].mxu0  ;;  %9743 = vmatpush3.bf16.msra.mxu1 %v10487_v1 }
 0x210   : > { %v2853_v51 = vadd.f32 %v8921_v40, %v10990_v56  ;;  %v2847_v27 = vpop.f32.mrb[41].mxu0  ;;  %9745 = vmatprep.subr.bf16.mxu1 %v10826_v36 }
 0x211   : > { %v2848_v9 = vadd.f32 %v2847_v27, %v10993_v2  ;;  %8908 = vmatprep.mubr.msk.f32.mxu1 %vm732_vm2, %v2642_v29 }
 0x212   : > { %8909 = vmatmul.mubr.msk.f32.gmra.mrb[38].mxu1 %vm732_vm2, %v2643_v49  ;;  %v2867_v18 = vmax.f32 %v2853_v51, 0.0 }
 0x213   : > { %v2866_v54 = vmax.f32 %v2848_v9, 0.0  ;;  %v8924_v53 = vpop.f32.mrb[42].mxu0  ;;  %9747 = vmatpush3.bf16.msra.mxu1 %v10826_v36 }
 0x214   : > { %v2863_v30 = vadd.f32 %v8924_v53, %v10997_v6  ;;  %v2857_v38 = vpop.f32.mrb[43].mxu0  ;;  %9757 = vmatprep.subr.bf16.mxu1 %v10487_v1 }
 0x215   : > { %v2858_v5 = vadd.f32 %v2857_v38, %v11001_v31  ;;  %8933 = vmatprep.mubr.msk.f32.mxu1 %vm732_vm2, %v2866_v54 }
 0x216   : > { %8934 = vmatmul.mubr.msk.f32.vlgmr.msra.gmra.mrb[40].mxu1 %vm732_vm2, %v2867_v18  ;;  %v2869_v40 = vmax.f32 %v2863_v30, 0.0 }
 0x217   : > { %v2868_v8 = vmax.f32 %v2858_v5, 0.0  ;;  %v8949_v29 = vpop.f32.mrb[44].mxu0  ;;  %9759 = vmatpush3.bf16.msra.mxu1 %v10487_v1 }
 0x218   : > { %v3079_v49 = vadd.f32 %v8949_v29, %v10990_v56  ;;  %v3073_v27 = vpop.f32.mrb[45].mxu0  ;;  %9761 = vmatprep.subr.bf16.mxu1 %v10826_v36 }
 0x219   : > { %v3074_v51 = vadd.f32 %v3073_v27, %v10993_v2  ;;  %8936 = vmatprep.mubr.msk.f32.mxu1 %vm732_vm2, %v2868_v8 }
 0x21a   : > { %8937 = vmatmul.mubr.msk.f32.gmra.mrb[42].mxu1 %vm732_vm2, %v2869_v40  ;;  %v3093_v53 = vmax.f32 %v3079_v49, 0.0 }
 0x21b   : > { %v3092_v9 = vmax.f32 %v3074_v51, 0.0  ;;  %v8952_v54 = vpop.f32.mrb[46].mxu0  ;;  %9763 = vmatpush3.bf16.msra.mxu1 %v10826_v36 }
 0x21c   : > { %v3089_v18 = vadd.f32 %v8952_v54, %v10997_v6  ;;  %v3083_v38 = vpop.f32.mrb[47].mxu0  ;;  %9773 = vmatprep.subr.bf16.mxu1 %v10487_v1 }
 0x21d   : > { %v3084_v30 = vadd.f32 %v3083_v38, %v11001_v31  ;;  %8961 = vmatprep.mubr.msk.f32.mxu1 %vm732_vm2, %v3092_v9 }
 0x21e   : > { %8962 = vmatmul.mubr.msk.f32.vlgmr.msra.gmra.mrb[44].mxu1 %vm732_vm2, %v3093_v53  ;;  %v3095_v29 = vmax.f32 %v3089_v18, 0.0 }
 0x21f   : > { %v3094_v5 = vmax.f32 %v3084_v30, 0.0  ;;  %v8977_v8 = vpop.f32.mrb[48].mxu0  ;;  %9775 = vmatpush3.bf16.msra.mxu1 %v10487_v1 }
 0x220   : > { %v3305_v40 = vadd.f32 %v8977_v8, %v10990_v56  ;;  %v3299_v27 = vpop.f32.mrb[49].mxu0  ;;  %9777 = vmatprep.subr.bf16.mxu1 %v10826_v36 }
 0x221   : > { %v3300_v49 = vadd.f32 %v3299_v27, %v10993_v2  ;;  %8964 = vmatprep.mubr.msk.f32.mxu1 %vm732_vm2, %v3094_v5 }
 0x222   : > { %8965 = vmatmul.mubr.msk.f32.gmra.mrb[46].mxu1 %vm732_vm2, %v3095_v29  ;;  %v3319_v54 = vmax.f32 %v3305_v40, 0.0 }
 0x223   : > { %v3318_v51 = vmax.f32 %v3300_v49, 0.0  ;;  %v8980_v9 = vpop.f32.mrb[50].mxu0  ;;  %9779 = vmatpush3.bf16.msra.mxu1 %v10826_v36 }
 0x224   : > { %v3315_v53 = vadd.f32 %v8980_v9, %v10997_v6  ;;  %v3309_v38 = vpop.f32.mrb[51].mxu0  ;;  %9789 = vmatprep.subr.bf16.mxu1 %v10487_v1 }
 0x225   : > { %v3310_v18 = vadd.f32 %v3309_v38, %v11001_v31  ;;  %8989 = vmatprep.mubr.msk.f32.mxu1 %vm732_vm2, %v3318_v51 }
 0x226   : > { %8990 = vmatmul.mubr.msk.f32.vlgmr.msra.gmra.mrb[48].mxu1 %vm732_vm2, %v3319_v54  ;;  %v3321_v8 = vmax.f32 %v3315_v53, 0.0 }
 0x227   : > { %v3320_v30 = vmax.f32 %v3310_v18, 0.0  ;;  %v9005_v5 = vpop.f32.mrb[52].mxu0  ;;  %9791 = vmatpush3.bf16.msra.mxu1 %v10487_v1 }
 0x228   : > { %v3531_v29 = vadd.f32 %v9005_v5, %v10990_v56  ;;  %v3525_v27 = vpop.f32.mrb[53].mxu0  ;;  %9793 = vmatprep.subr.bf16.mxu1 %v10826_v36 }
 0x229   : > { %v3526_v40 = vadd.f32 %v3525_v27, %v10993_v2  ;;  %8992 = vmatprep.mubr.msk.f32.mxu1 %vm732_vm2, %v3320_v30 }
 0x22a   : > { %8993 = vmatmul.mubr.msk.f32.gmra.mrb[50].mxu1 %vm732_vm2, %v3321_v8  ;;  %v3545_v9 = vmax.f32 %v3531_v29, 0.0 }
 0x22b   : > { %v3544_v49 = vmax.f32 %v3526_v40, 0.0  ;;  %v9008_v51 = vpop.f32.mrb[54].mxu0  ;;  %9795 = vmatpush3.bf16.msra.mxu1 %v10826_v36 }
 0x22c   : > { %v3541_v54 = vadd.f32 %v9008_v51, %v10997_v6  ;;  %v3535_v38 = vpop.f32.mrb[55].mxu0  ;;  %9805 = vmatprep.subr.bf16.mxu1 %v10487_v1 }
 0x22d   : > { %v3536_v53 = vadd.f32 %v3535_v38, %v11001_v31  ;;  %9017 = vmatprep.mubr.msk.f32.mxu1 %vm732_vm2, %v3544_v49 }
 0x22e   : > { %9018 = vmatmul.mubr.msk.f32.vlgmr.msra.gmra.mrb[52].mxu1 %vm732_vm2, %v3545_v9  ;;  %v3547_v5 = vmax.f32 %v3541_v54, 0.0 }
 0x22f   : > { %v3546_v18 = vmax.f32 %v3536_v53, 0.0  ;;  %v9033_v30 = vpop.f32.mrb[56].mxu0  ;;  %9807 = vmatpush3.bf16.msra.mxu1 %v10487_v1 }
 0x230   : > { %v3757_v8 = vadd.f32 %v9033_v30, %v10990_v56  ;;  %v3751_v27 = vpop.f32.mrb[57].mxu0  ;;  %9809 = vmatprep.subr.bf16.mxu1 %v10826_v36 }
 0x231   : > { %v3752_v29 = vadd.f32 %v3751_v27, %v10993_v2  ;;  %9020 = vmatprep.mubr.msk.f32.mxu1 %vm732_vm2, %v3546_v18 }
 0x232   : > { %9021 = vmatmul.mubr.msk.f32.gmra.mrb[54].mxu1 %vm732_vm2, %v3547_v5  ;;  %v3771_v51 = vmax.f32 %v3757_v8, 0.0 }
 0x233   : > { %v3770_v40 = vmax.f32 %v3752_v29, 0.0  ;;  %v9036_v49 = vpop.f32.mrb[58].mxu0  ;;  %9811 = vmatpush3.bf16.msra.mxu1 %v10826_v36 }
 0x234   : > { %v3767_v9 = vadd.f32 %v9036_v49, %v10997_v6  ;;  %v3761_v38 = vpop.f32.mrb[59].mxu0  ;;  %9821 = vmatprep.subr.bf16.mxu1 %v10487_v1 }
 0x235   : > { %v3762_v54 = vadd.f32 %v3761_v38, %v11001_v31  ;;  %9045 = vmatprep.mubr.msk.f32.mxu1 %vm732_vm2, %v3770_v40 }
 0x236   : > { %9046 = vmatmul.mubr.msk.f32.vlgmr.msra.gmra.mrb[56].mxu1 %vm732_vm2, %v3771_v51  ;;  %v3773_v30 = vmax.f32 %v3767_v9, 0.0 }
 0x237   : > { %v3772_v53 = vmax.f32 %v3762_v54, 0.0  ;;  %v9061_v18 = vpop.f32.mrb[60].mxu0  ;;  %9823 = vmatpush3.bf16.msra.mxu1 %v10487_v1 }
 0x238   : > { %v3983_v5 = vadd.f32 %v9061_v18, %v10990_v56  ;;  %v3977_v27 = vpop.f32.mrb[61].mxu0  ;;  %9825 = vmatprep.subr.bf16.mxu1 %v10826_v36 }
 0x239   : > { %v3978_v8 = vadd.f32 %v3977_v27, %v10993_v2  ;;  %9048 = vmatprep.mubr.msk.f32.mxu1 %vm732_vm2, %v3772_v53 }
 0x23a   : > { %9049 = vmatmul.mubr.msk.f32.gmra.mrb[58].mxu1 %vm732_vm2, %v3773_v30  ;;  %v3997_v49 = vmax.f32 %v3983_v5, 0.0 }
 0x23b   : > { %v3996_v29 = vmax.f32 %v3978_v8, 0.0  ;;  %v9064_v40 = vpop.f32.mrb[62].mxu0  ;;  %9827 = vmatpush3.bf16.msra.mxu1 %v10826_v36 }
 0x23c   : > { %v3993_v51 = vadd.f32 %v9064_v40, %v10997_v6  ;;  %v3987_v38 = vpop.f32.mrb[63].mxu0  ;;  %9837 = vmatprep.subr.bf16.mxu1 %v10487_v1 }
 0x23d   : > { %v3988_v9 = vadd.f32 %v3987_v38, %v11001_v31  ;;  %9073 = vmatprep.mubr.msk.f32.mxu1 %vm732_vm2, %v3996_v29 }
 0x23e   : > { %9074 = vmatmul.mubr.msk.f32.vlgmr.msra.gmra.mrb[60].mxu1 %vm732_vm2, %v3997_v49  ;;  %v3999_v18 = vmax.f32 %v3993_v51, 0.0 }
 0x23f   : > { %v3998_v54 = vmax.f32 %v3988_v9, 0.0  ;;  %v9089_v53 = vpop.f32.mrb[64].mxu0  ;;  %9839 = vmatpush3.bf16.msra.mxu1 %v10487_v1  ;;  %v4423_v9 = vld [vmem:[%s11807_s7 + $0x18] sm:$0xff] }
 0x240   : > { %v4209_v30 = vadd.f32 %v9089_v53, %v10990_v56  ;;  %v4203_v27 = vpop.f32.mrb[65].mxu0  ;;  %9841 = vmatprep.subr.bf16.mxu1 %v10826_v36 }
 0x241   : > { %v4204_v5 = vadd.f32 %v4203_v27, %v10993_v2  ;;  %9076 = vmatprep.mubr.msk.f32.mxu1 %vm732_vm2, %v3998_v54 }
 0x242   : > { %9077 = vmatmul.mubr.msk.f32.gmra.mrb[62].mxu1 %vm732_vm2, %v3999_v18  ;;  %v4223_v40 = vmax.f32 %v4209_v30, 0.0 }
 0x243   : > { %v4222_v8 = vmax.f32 %v4204_v5, 0.0  ;;  %v9092_v29 = vpop.f32.mrb[66].mxu0  ;;  %9843 = vmatpush3.bf16.msra.mxu1 %v10826_v36  ;;  %v4420_v36 = vld [vmem:[%s11807_s7] sm:$0xff] }
 0x244   : > { %v4219_v49 = vadd.f32 %v9092_v29, %v10997_v6  ;;  %v4213_v1 = vpop.f32.mrb[67].mxu0  ;;  %v4421_v6 = vld [vmem:[%s11807_s7 + $0x8] sm:$0xff] }
 0x245   : > { %v4214_v51 = vadd.f32 %v4213_v1, %v11001_v31  ;;  %9101 = vmatprep.mubr.msk.f32.mxu1 %vm732_vm2, %v4222_v8  ;;  %v9844_v38 = vpack.c.bf16 %v4421_v6, %v4420_v36  ;;  %v4422_v31 = vld [vmem:[%s11807_s7 + $0x10] sm:$0xff]  ;;  %v11205_v8 = vld [vmem:[%s11806_s6] ss:$0 sm:$0xff] }
 0x246   : > { %9102 = vmatmul.mubr.msk.f32.vlgmr.msra.gmra.mrb[64].mxu1 %vm732_vm2, %v4223_v40  ;;  %v4225_v2 = vmax.f32 %v4219_v49, 0.0  ;;  %v9848_v54 = vpack.c.bf16 %v4423_v9, %v4422_v31 }
 0x247   : > { %v4224_v56 = vmax.f32 %v4214_v51, 0.0  ;;  %9845 = vmatprep.subr.bf16.mxu1 %v9844_v38  ;;  %v11200_v5 = vpop.f32.mrb[68].mxu0 }
 0x248   : > { %9847 = vmatpush3.bf16.msra.mxu1 %v9844_v38  ;;  %v11207_v29 = vpop.f32.mrb[69].mxu0 }
 0x249   : > { %9104 = vmatprep.mubr.msk.f32.mxu1 %vm732_vm2, %v4224_v56  ;;  %9849 = vmatprep.subr.bf16.mxu1 %v9848_v54 }
 0x24a   : > { %9105 = vmatmul.mubr.msk.f32.gmra.mrb[66].mxu1 %vm732_vm2, %v4225_v2 }
 0x24c   : > { %9851 = vmatpush3.bf16.msra.mxu1 %v9848_v54 }
 0x2a1   : > { %v8683_v53 = vpop.f32.mrb[4].mxu1 }
 0x2a2   : > { %v918_v18 = vpop.f32.mrb[5].mxu1  ;;  %v924_v49 = vadd.f32 %v8683_v53, %v11205_v8 }
 0x2a3   : > { %v919_v56 = vadd.f32 %v11205_v8, %v918_v18 }
 0x2a5   : > { %v8686_v30 = vpop.f32.mrb[6].mxu1 }
 0x2a6   : > { %v928_v27 = vpop.f32.mrb[7].mxu1  ;;  %v934_v31 = vadd.f32 %v8686_v30, %v11205_v8 }
 0x2a7   : > { %v929_v44 = vadd.f32 %v11205_v8, %v928_v27 }
 0x2a9   : > { %v8711_v40 = vpop.f32.mrb[8].mxu1 }
 0x2aa   : > { %v1146_v1 = vadd.f32 %v8711_v40, %v11205_v8  ;;  %v1140_v51 = vpop.f32.mrb[9].mxu1 }
 0x2ab   : > { %v1141_v2 = vadd.f32 %v11205_v8, %v1140_v51 }
 0x2ac   : > { %v1160_v36 = vmax.f32 %v924_v49, %v1146_v1 }
 0x2ad   : > { %v1159_v6 = vmax.f32 %v919_v56, %v1141_v2  ;;  %v8714_v38 = vpop.f32.mrb[10].mxu1 }
 0x2ae   : > { %v1156_v9 = vadd.f32 %v8714_v38, %v11205_v8  ;;  %v1150_v54 = vpop.f32.mrb[11].mxu1 }
 0x2af   : > { %v1151_v0 = vadd.f32 %v11205_v8, %v1150_v54 }
 0x2b0   : > { %v1162_v53 = vmax.f32 %v934_v31, %v1156_v9 }
 0x2b1   : > { %v1161_v50 = vmax.f32 %v929_v44, %v1151_v0  ;;  %v8739_v40 = vpop.f32.mrb[12].mxu1 }
 0x2b2   : > { %v1372_v35 = vadd.f32 %v8739_v40, %v11205_v8  ;;  %v1366_v18 = vpop.f32.mrb[13].mxu1 }
 0x2b3   : > { %v1367_v51 = vadd.f32 %v11205_v8, %v1366_v18 }
 0x2b4   : > { %v1386_v49 = vmax.f32 %v1160_v36, %v1372_v35 }
 0x2b5   : > { %v1385_v1 = vmax.f32 %v1159_v6, %v1367_v51  ;;  %v8742_v56 = vpop.f32.mrb[14].mxu1 }
 0x2b6   : > { %v1382_v30 = vadd.f32 %v8742_v56, %v11205_v8  ;;  %v1376_v2 = vpop.f32.mrb[15].mxu1 }
 0x2b7   : > { %v1377_v38 = vadd.f32 %v11205_v8, %v1376_v2 }
 0x2b8   : > { %v1388_v19 = vmax.f32 %v1162_v53, %v1382_v30 }
 0x2b9   : > { %v1387_v27 = vmax.f32 %v1161_v50, %v1377_v38  ;;  %v8767_v28 = vpop.f32.mrb[16].mxu1 }
 0x2ba   : > { %v1598_v31 = vadd.f32 %v8767_v28, %v11205_v8  ;;  %v1592_v0 = vpop.f32.mrb[17].mxu1 }
 0x2bb   : > { %v1593_v44 = vadd.f32 %v11205_v8, %v1592_v0 }
 0x2bc   : > { %v1612_v9 = vmax.f32 %v1386_v49, %v1598_v31 }
 0x2bd   : > { %v1611_v54 = vmax.f32 %v1385_v1, %v1593_v44  ;;  %v8770_v40 = vpop.f32.mrb[18].mxu1 }
 0x2be   : > { %v1608_v35 = vadd.f32 %v8770_v40, %v11205_v8  ;;  %v1602_v36 = vpop.f32.mrb[19].mxu1 }
 0x2bf   : > { %v1603_v6 = vadd.f32 %v11205_v8, %v1602_v36 }
 0x2c0   : > { %v1614_v18 = vmax.f32 %v1388_v19, %v1608_v35 }
 0x2c1   : > { %v1613_v51 = vmax.f32 %v1387_v27, %v1603_v6  ;;  %v8795_v56 = vpop.f32.mrb[20].mxu1 }
 0x2c2   : > { %v1824_v53 = vadd.f32 %v8795_v56, %v11205_v8  ;;  %v1818_v50 = vpop.f32.mrb[21].mxu1 }
 0x2c3   : > { %v1819_v30 = vadd.f32 %v11205_v8, %v1818_v50 }
 0x2c4   : > { %v1838_v28 = vmax.f32 %v1612_v9, %v1824_v53 }
 0x2c5   : > { %v1837_v2 = vmax.f32 %v1611_v54, %v1819_v30  ;;  %v8798_v38 = vpop.f32.mrb[22].mxu1 }
 0x2c6   : > { %v1834_v49 = vadd.f32 %v8798_v38, %v11205_v8  ;;  %v1828_v1 = vpop.f32.mrb[23].mxu1 }
 0x2c7   : > { %v1829_v31 = vadd.f32 %v11205_v8, %v1828_v1 }
 0x2c8   : > { %v1840_v0 = vmax.f32 %v1614_v18, %v1834_v49 }
 0x2c9   : > { %v1839_v44 = vmax.f32 %v1613_v51, %v1829_v31  ;;  %v8823_v40 = vpop.f32.mrb[24].mxu1 }
 0x2ca   : > { %v2050_v19 = vadd.f32 %v8823_v40, %v11205_v8  ;;  %v2044_v27 = vpop.f32.mrb[25].mxu1 }
 0x2cb   : > { %v2045_v35 = vadd.f32 %v11205_v8, %v2044_v27 }
 0x2cc   : > { %v2064_v36 = vmax.f32 %v1838_v28, %v2050_v19 }
 0x2cd   : > { %v2063_v6 = vmax.f32 %v1837_v2, %v2045_v35  ;;  %v8826_v56 = vpop.f32.mrb[26].mxu1 }
 0x2ce   : > { %v2060_v9 = vadd.f32 %v8826_v56, %v11205_v8  ;;  %v2054_v54 = vpop.f32.mrb[27].mxu1 }
 0x2cf   : > { %v2055_v53 = vadd.f32 %v11205_v8, %v2054_v54 }
 0x2d0   : > { %v2066_v50 = vmax.f32 %v1840_v0, %v2060_v9 }
 0x2d1   : > { %v2065_v30 = vmax.f32 %v1839_v44, %v2055_v53  ;;  %v8851_v38 = vpop.f32.mrb[28].mxu1 }
 0x2d2   : > { %v2276_v18 = vadd.f32 %v8851_v38, %v11205_v8  ;;  %v2270_v51 = vpop.f32.mrb[29].mxu1 }
 0x2d3   : > { %v2271_v49 = vadd.f32 %v11205_v8, %v2270_v51 }
 0x2d4   : > { %v2290_v1 = vmax.f32 %v2064_v36, %v2276_v18 }
 0x2d5   : > { %v2289_v31 = vmax.f32 %v2063_v6, %v2271_v49  ;;  %v8854_v40 = vpop.f32.mrb[30].mxu1 }
 0x2d6   : > { %v2286_v28 = vadd.f32 %v8854_v40, %v11205_v8  ;;  %v2280_v2 = vpop.f32.mrb[31].mxu1 }
 0x2d7   : > { %v2281_v19 = vadd.f32 %v11205_v8, %v2280_v2 }
 0x2d8   : > { %v2292_v27 = vmax.f32 %v2066_v50, %v2286_v28 }
 0x2d9   : > { %v2291_v35 = vmax.f32 %v2065_v30, %v2281_v19  ;;  %v8879_v56 = vpop.f32.mrb[32].mxu1 }
 0x2da   : > { %v2502_v0 = vadd.f32 %v8879_v56, %v11205_v8  ;;  %v2496_v44 = vpop.f32.mrb[33].mxu1 }
 0x2db   : > { %v2497_v9 = vadd.f32 %v11205_v8, %v2496_v44 }
 0x2dc   : > { %v2516_v54 = vmax.f32 %v2290_v1, %v2502_v0 }
 0x2dd   : > { %v2515_v53 = vmax.f32 %v2289_v31, %v2497_v9  ;;  %v8882_v38 = vpop.f32.mrb[34].mxu1 }
 0x2de   : > { %v2512_v36 = vadd.f32 %v8882_v38, %v11205_v8  ;;  %v2506_v6 = vpop.f32.mrb[35].mxu1 }
 0x2df   : > { %v2507_v18 = vadd.f32 %v11205_v8, %v2506_v6 }
 0x2e0   : > { %v2518_v51 = vmax.f32 %v2292_v27, %v2512_v36 }
 0x2e1   : > { %v2517_v49 = vmax.f32 %v2291_v35, %v2507_v18  ;;  %v8907_v40 = vpop.f32.mrb[36].mxu1 }
 0x2e2   : > { %v2728_v50 = vadd.f32 %v8907_v40, %v11205_v8  ;;  %v2722_v30 = vpop.f32.mrb[37].mxu1 }
 0x2e3   : > { %v2723_v28 = vadd.f32 %v11205_v8, %v2722_v30 }
 0x2e4   : > { %v2742_v2 = vmax.f32 %v2516_v54, %v2728_v50 }
 0x2e5   : > { %v2741_v19 = vmax.f32 %v2515_v53, %v2723_v28  ;;  %v8910_v56 = vpop.f32.mrb[38].mxu1 }
 0x2e6   : > { %v2738_v1 = vadd.f32 %v8910_v56, %v11205_v8  ;;  %v2732_v31 = vpop.f32.mrb[39].mxu1 }
 0x2e7   : > { %v2733_v0 = vadd.f32 %v11205_v8, %v2732_v31 }
 0x2e8   : > { %v2744_v44 = vmax.f32 %v2518_v51, %v2738_v1 }
 0x2e9   : > { %v2743_v9 = vmax.f32 %v2517_v49, %v2733_v0  ;;  %v8935_v38 = vpop.f32.mrb[40].mxu1 }
 0x2ea   : > { %v2954_v27 = vadd.f32 %v8935_v38, %v11205_v8  ;;  %v2948_v35 = vpop.f32.mrb[41].mxu1 }
 0x2eb   : > { %v2949_v36 = vadd.f32 %v11205_v8, %v2948_v35 }
 0x2ec   : > { %v2968_v6 = vmax.f32 %v2742_v2, %v2954_v27 }
 0x2ed   : > { %v2967_v18 = vmax.f32 %v2741_v19, %v2949_v36  ;;  %v8938_v40 = vpop.f32.mrb[42].mxu1 }
 0x2ee   : > { %v2964_v54 = vadd.f32 %v8938_v40, %v11205_v8  ;;  %v2958_v53 = vpop.f32.mrb[43].mxu1 }
 0x2ef   : > { %v2959_v50 = vadd.f32 %v11205_v8, %v2958_v53 }
 0x2f0   : > { %v2970_v30 = vmax.f32 %v2744_v44, %v2964_v54 }
 0x2f1   : > { %v2969_v28 = vmax.f32 %v2743_v9, %v2959_v50  ;;  %v8963_v56 = vpop.f32.mrb[44].mxu1 }
 0x2f2   : > { %v3180_v51 = vadd.f32 %v8963_v56, %v11205_v8  ;;  %v3174_v49 = vpop.f32.mrb[45].mxu1 }
 0x2f3   : > { %v3175_v1 = vadd.f32 %v11205_v8, %v3174_v49 }
 0x2f4   : > { %v3194_v31 = vmax.f32 %v2968_v6, %v3180_v51 }
 0x2f5   : > { %v3193_v0 = vmax.f32 %v2967_v18, %v3175_v1  ;;  %v8966_v38 = vpop.f32.mrb[46].mxu1 }
 0x2f6   : > { %v3190_v2 = vadd.f32 %v8966_v38, %v11205_v8  ;;  %v3184_v19 = vpop.f32.mrb[47].mxu1 }
 0x2f7   : > { %v3185_v27 = vadd.f32 %v11205_v8, %v3184_v19 }
 0x2f8   : > { %v3196_v35 = vmax.f32 %v2970_v30, %v3190_v2 }
 0x2f9   : > { %v3195_v36 = vmax.f32 %v2969_v28, %v3185_v27  ;;  %v8991_v40 = vpop.f32.mrb[48].mxu1 }
 0x2fa   : > { %v3406_v44 = vadd.f32 %v8991_v40, %v11205_v8  ;;  %v3400_v9 = vpop.f32.mrb[49].mxu1 }
 0x2fb   : > { %v3401_v54 = vadd.f32 %v11205_v8, %v3400_v9 }
 0x2fc   : > { %v3420_v53 = vmax.f32 %v3194_v31, %v3406_v44 }
 0x2fd   : > { %v3419_v50 = vmax.f32 %v3193_v0, %v3401_v54  ;;  %v8994_v56 = vpop.f32.mrb[50].mxu1 }
 0x2fe   : > { %v3416_v6 = vadd.f32 %v8994_v56, %v11205_v8  ;;  %v3410_v18 = vpop.f32.mrb[51].mxu1 }
 0x2ff   : > { %v3411_v51 = vadd.f32 %v11205_v8, %v3410_v18 }
 0x300   : > { %v3422_v49 = vmax.f32 %v3196_v35, %v3416_v6 }
 0x301   : > { %v3421_v1 = vmax.f32 %v3195_v36, %v3411_v51  ;;  %v9019_v38 = vpop.f32.mrb[52].mxu1 }
 0x302   : > { %v3632_v30 = vadd.f32 %v9019_v38, %v11205_v8  ;;  %v3626_v28 = vpop.f32.mrb[53].mxu1 }
 0x303   : > { %v3627_v2 = vadd.f32 %v11205_v8, %v3626_v28 }
 0x304   : > { %v3646_v19 = vmax.f32 %v3420_v53, %v3632_v30 }
 0x305   : > { %v3645_v27 = vmax.f32 %v3419_v50, %v3627_v2  ;;  %v9022_v40 = vpop.f32.mrb[54].mxu1 }
 0x306   : > { %v3642_v31 = vadd.f32 %v9022_v40, %v11205_v8  ;;  %v3636_v0 = vpop.f32.mrb[55].mxu1 }
 0x307   : > { %v3637_v44 = vadd.f32 %v11205_v8, %v3636_v0 }
 0x308   : > { %v3648_v9 = vmax.f32 %v3422_v49, %v3642_v31 }
 0x309   : > { %v3647_v54 = vmax.f32 %v3421_v1, %v3637_v44  ;;  %v9047_v56 = vpop.f32.mrb[56].mxu1 }
 0x30a   : > { %v3858_v35 = vadd.f32 %v9047_v56, %v11205_v8  ;;  %v3852_v36 = vpop.f32.mrb[57].mxu1 }
 0x30b   : > { %v3853_v6 = vadd.f32 %v11205_v8, %v3852_v36 }
 0x30c   : > { %v3872_v18 = vmax.f32 %v3646_v19, %v3858_v35 }
 0x30d   : > { %v3871_v51 = vmax.f32 %v3645_v27, %v3853_v6  ;;  %v9050_v38 = vpop.f32.mrb[58].mxu1 }
 0x30e   : > { %v3868_v53 = vadd.f32 %v9050_v38, %v11205_v8  ;;  %v3862_v50 = vpop.f32.mrb[59].mxu1 }
 0x30f   : > { %v3863_v30 = vadd.f32 %v11205_v8, %v3862_v50 }
 0x310   : > { %v3874_v28 = vmax.f32 %v3648_v9, %v3868_v53 }
 0x311   : > { %v3873_v2 = vmax.f32 %v3647_v54, %v3863_v30  ;;  %v9075_v40 = vpop.f32.mrb[60].mxu1 }
 0x312   : > { %v4084_v49 = vadd.f32 %v9075_v40, %v11205_v8  ;;  %v4078_v1 = vpop.f32.mrb[61].mxu1 }
 0x313   : > { %v4079_v31 = vadd.f32 %v11205_v8, %v4078_v1 }
 0x314   : > { %v4098_v0 = vmax.f32 %v3872_v18, %v4084_v49 }
 0x315   : > { %v4097_v44 = vmax.f32 %v3871_v51, %v4079_v31  ;;  %v9078_v56 = vpop.f32.mrb[62].mxu1 }
 0x316   : > { %v4094_v19 = vadd.f32 %v9078_v56, %v11205_v8  ;;  %v4088_v27 = vpop.f32.mrb[63].mxu1 }
 0x317   : > { %v4089_v35 = vadd.f32 %v11205_v8, %v4088_v27 }
 0x318   : > { %v4100_v36 = vmax.f32 %v3874_v28, %v4094_v19 }
 0x319   : > { %v4099_v6 = vmax.f32 %v3873_v2, %v4089_v35  ;;  %v9103_v38 = vpop.f32.mrb[64].mxu1 }
 0x31a   : > { %v4310_v9 = vadd.f32 %v9103_v38, %v11205_v8  ;;  %v4304_v54 = vpop.f32.mrb[65].mxu1 }
 0x31b   : > { %v4305_v53 = vadd.f32 %v11205_v8, %v4304_v54 }
 0x31c   : > { %v4324_v50 = vmax.f32 %v4098_v0, %v4310_v9  ;;  %v11277_v0 = vpop.f32.mrb[70].mxu0 }
 0x31d   : > { %v4323_v30 = vmax.f32 %v4097_v44, %v4305_v53  ;;  %v9106_v40 = vpop.f32.mrb[66].mxu1  ;;  %v11279_v44 = vpop.f32.mrb[71].mxu0 }
 0x31e   : > { %v4320_v18 = vadd.f32 %v9106_v40, %v11205_v8  ;;  %v4314_v51 = vpop.f32.mrb[67].mxu1  ;;  %v4328_v31 = vmax.f32 %v4324_v50, 0.0  ;;  %v4533_v40 = vld [vmem:[%s11810_s10 + $0x8] sm:$0xff] }
 0x31f   : > { %v4327_v49 = vmax.f32 %v4323_v30, 0.0  ;;  %v4315_v1 = vadd.f32 %v11205_v8, %v4314_v51  ;;  %v4532_v30 = vld [vmem:[%s11810_s10] sm:$0xff] }
 0x320   : > { %v4326_v56 = vmax.f32 %v4100_v36, %v4320_v18  ;;  %v11299_v18 = vpack.c.bf16 %v4533_v40, %v4532_v30 }
 0x321   : > { %v4325_v27 = vmax.f32 %v4099_v6, %v4315_v1  ;;  %9123 = vmatprep.mubr.msk.f32.mxu1 %vm732_vm2, %v4327_v49 }
 0x322   : > { %9124 = vmatmul.mubr.msk.f32.vlgmr.msra.gmra.mrb[68].mxu1 %vm732_vm2, %v4328_v31  ;;  %v4330_v2 = vmax.f32 %v4326_v56, 0.0  ;;  %9861 = vmatprep.subr.bf16.mxu1 %v11299_v18 }
 0x323   : > { %v4329_v28 = vmax.f32 %v4325_v27, 0.0  ;;  %9863 = vmatpush3.bf16.msra.mxu1 %v11299_v18 }
 0x325   : > { %9126 = vmatprep.mubr.msk.f32.mxu1 %vm732_vm2, %v4329_v28 }
 0x326   : > { %9127 = vmatmul.mubr.msk.f32.gmra.mrb[70].mxu1 %vm732_vm2, %v4330_v2 }
 0x3f5   : > { %v9125_v19 = vpop.f32.mrb[68].mxu1 }
 0x3f6   : > { %v4508_v8 = vadd.f32 %v9125_v19, %v11200_v5  ;;  %v4502_v35 = vpop.f32.mrb[69].mxu1 }
 0x3f7   : > { %v4503_v36 = vadd.f32 %v4502_v35, %v11207_v29 }
 0x3f9   : > { %v11283_v6 = vpack.c.bf16 %v4508_v8, %v4503_v36  ;;  %v9128_v38 = vpop.f32.mrb[70].mxu1 }
 0x3fa   : > { %v4518_v9 = vadd.f32 %v9128_v38, %v11277_v0  ;;  %v4512_v54 = vpop.f32.mrb[71].mxu1 }
 0x3fb   : > { %v4513_v53 = vadd.f32 %v4512_v54, %v11279_v44  ;;  %9853 = vmatprep.subr.bf16.mxu0 %v11283_v6 }
 0x3fc   : > { %9855 = vmatpush3.bf16.msra.mxu0 %v11283_v6 }
 0x3fd   : > { %v11289_v50 = vpack.c.bf16 %v4518_v9, %v4513_v53 }
 0x3ff   : > { %9857 = vmatprep.subr.bf16.mxu0 %v11289_v50 }
 0x400   : > { %9859 = vmatpush3.bf16.msra.mxu0 %v11289_v50 }
 0x401   : > { %9869 = vmatprep.subr.bf16.mxu0 %v11283_v6 }
 0x403   : > { %9138 = vmatmul.mubr.msk.f32.vlgmr.msra.gmra.mrb[72].mxu0 %vm732_vm2, %v10450_v57  ;;  %v11867_v57 = vld [vmem:[#allocation2_spill] sm:$0xff] }
 0x404   : > { %9140 = vmatprep.mubr.msk.f32.mxu0 %vm732_vm2, %v10454_v58  ;;  %9871 = vmatpush3.bf16.msra.mxu0 %v11283_v6  ;;  %v11868_v58 = vld [vmem:[#allocation3_spill] sm:$0xff] }
 0x405   : > { %9873 = vmatprep.subr.bf16.mxu0 %v11289_v50 }
 0x407   : > { %9141 = vmatmul.mubr.msk.f32.gmra.mrb[74].mxu0 %vm732_vm2, %v10469_v61  ;;  %v11870_v61 = vld [vmem:[#allocation5_spill] sm:$0xff] }
 0x408   : > { %9875 = vmatpush3.bf16.msra.mxu0 %v11289_v50  ;;  %9165 = vmatprep.mubr.msk.f32.mxu0 %vm732_vm2, %v10463_v59  ;;  %v11869_v59 = vld [vmem:[#allocation4_spill] sm:$0xff] }
 0x409   : > { %9885 = vmatprep.subr.bf16.mxu0 %v11283_v6 }
 0x40b   : > { %9166 = vmatmul.mubr.msk.f32.vlgmr.msra.gmra.mrb[76].mxu0 %vm732_vm2, %v10490_v3  ;;  %v4534_v3 = vld [vmem:[%s11810_s10 + $0x10] sm:$0xff] }
 0x40c   : > { %9168 = vmatprep.mubr.msk.f32.mxu0 %vm732_vm2, %v10493_v7  ;;  %9887 = vmatpush3.bf16.msra.mxu0 %v11283_v6  ;;  %v4535_v7 = vld [vmem:[%s11810_s10 + $0x18] sm:$0xff] }
 0x40d   : > { %9889 = vmatprep.subr.bf16.mxu0 %v11289_v50 }
 0x40f   : > { %9169 = vmatmul.mubr.msk.f32.gmra.mrb[78].mxu0 %vm732_vm2, %v10510_v10  ;;  %v11438_v10 = vpack.c.bf16 %v4535_v7, %v4534_v3 }
 0x410   : > { %9891 = vmatpush3.bf16.msra.mxu0 %v11289_v50  ;;  %9193 = vmatprep.mubr.msk.f32.mxu0 %vm732_vm2, %v10513_v11  ;;  %v11871_v11 = vld [vmem:[#allocation6_spill] sm:$0xff] }
 0x411   : > { %9901 = vmatprep.subr.bf16.mxu0 %v11283_v6  ;;  %9865 = vmatprep.subr.bf16.mxu1 %v11438_v10 }
 0x412   : > { %9867 = vmatpush3.bf16.msra.mxu1 %v11438_v10 }
 0x413   : > { %9194 = vmatmul.mubr.msk.f32.vlgmr.msra.gmra.mrb[80].mxu0 %vm732_vm2, %v10520_v12  ;;  %v11872_v12 = vld [vmem:[#allocation7_spill] sm:$0xff]  ;;  %9877 = vmatprep.subr.bf16.mxu1 %v11299_v18 }
 0x414   : > { %9196 = vmatprep.mubr.msk.f32.mxu0 %vm732_vm2, %v10530_v15  ;;  %9903 = vmatpush3.bf16.msra.mxu0 %v11283_v6  ;;  %v11873_v15 = vld [vmem:[#allocation8_spill] sm:$0xff] }
 0x415   : > { %9905 = vmatprep.subr.bf16.mxu0 %v11289_v50 }
 0x417   : > { %9197 = vmatmul.mubr.msk.f32.gmra.mrb[82].mxu0 %vm732_vm2, %v10544_v17  ;;  %v11875_v17 = vld [vmem:[#allocation10_spill] sm:$0xff] }
 0x418   : > { %9907 = vmatpush3.bf16.msra.mxu0 %v11289_v50  ;;  %9221 = vmatprep.mubr.msk.f32.mxu0 %vm732_vm2, %v10540_v16  ;;  %v11874_v16 = vld [vmem:[#allocation9_spill] sm:$0xff] }
 0x419   : > { %9917 = vmatprep.subr.bf16.mxu0 %v11283_v6 }
 0x41b   : > { %9222 = vmatmul.mubr.msk.f32.vlgmr.msra.gmra.mrb[84].mxu0 %vm732_vm2, %v10559_v20  ;;  %v11876_v20 = vld [vmem:[#allocation11_spill] sm:$0xff] }
 0x41c   : > { %9224 = vmatprep.mubr.msk.f32.mxu0 %vm732_vm2, %v10562_v22  ;;  %9919 = vmatpush3.bf16.msra.mxu0 %v11283_v6  ;;  %v11877_v22 = vld [vmem:[#allocation12_spill] sm:$0xff] }
 0x41d   : > { %9921 = vmatprep.subr.bf16.mxu0 %v11289_v50 }
 0x41f   : > { %9225 = vmatmul.mubr.msk.f32.gmra.mrb[86].mxu0 %vm732_vm2, %v10577_v24  ;;  %v11878_v24 = vld [vmem:[#allocation14_spill] sm:$0xff] }
 0x420   : > { %9923 = vmatpush3.bf16.msra.mxu0 %v11289_v50  ;;  %9249 = vmatprep.mubr.msk.f32.mxu0 %vm732_vm2, %v10580_v25  ;;  %v11879_v25 = vld [vmem:[#allocation13_spill] sm:$0xff] }
 0x421   : > { %9933 = vmatprep.subr.bf16.mxu0 %v11283_v6 }
 0x423   : > { %9250 = vmatmul.mubr.msk.f32.vlgmr.msra.gmra.mrb[88].mxu0 %vm732_vm2, %v10587_v26  ;;  %v11880_v26 = vld [vmem:[#allocation15_spill] sm:$0xff] }
 0x424   : > { %9252 = vmatprep.mubr.msk.f32.mxu0 %vm732_vm2, %v10597_v32  ;;  %9935 = vmatpush3.bf16.msra.mxu0 %v11283_v6  ;;  %v11881_v32 = vld [vmem:[#allocation16_spill] sm:$0xff] }
 0x425   : > { %9937 = vmatprep.subr.bf16.mxu0 %v11289_v50 }
 0x427   : > { %9253 = vmatmul.mubr.msk.f32.gmra.mrb[90].mxu0 %vm732_vm2, %v10611_v34  ;;  %v11883_v34 = vld [vmem:[#allocation18_spill] sm:$0xff] }
 0x428   : > { %9939 = vmatpush3.bf16.msra.mxu0 %v11289_v50  ;;  %9277 = vmatprep.mubr.msk.f32.mxu0 %vm732_vm2, %v10607_v33  ;;  %v11882_v33 = vld [vmem:[#allocation17_spill] sm:$0xff] }
 0x429   : > { %9949 = vmatprep.subr.bf16.mxu0 %v11283_v6 }
 0x42b   : > { %9278 = vmatmul.mubr.msk.f32.vlgmr.msra.gmra.mrb[92].mxu0 %vm732_vm2, %v10626_v37  ;;  %v11884_v37 = vld [vmem:[#allocation19_spill] sm:$0xff] }
 0x42c   : > { %9280 = vmatprep.mubr.msk.f32.mxu0 %vm732_vm2, %v10629_v39  ;;  %9951 = vmatpush3.bf16.msra.mxu0 %v11283_v6  ;;  %v11885_v39 = vld [vmem:[#allocation20_spill] sm:$0xff] }
 0x42d   : > { %9953 = vmatprep.subr.bf16.mxu0 %v11289_v50 }
 0x42f   : > { %9281 = vmatmul.mubr.msk.f32.gmra.mrb[94].mxu0 %vm732_vm2, %v10644_v41  ;;  %v11886_v41 = vld [vmem:[#allocation22_spill] sm:$0xff] }
 0x430   : > { %9955 = vmatpush3.bf16.msra.mxu0 %v11289_v50  ;;  %9305 = vmatprep.mubr.msk.f32.mxu0 %vm732_vm2, %v10647_v42  ;;  %v11887_v42 = vld [vmem:[#allocation21_spill] sm:$0xff] }
 0x431   : > { %9965 = vmatprep.subr.bf16.mxu0 %v11283_v6 }
 0x433   : > { %9306 = vmatmul.mubr.msk.f32.vlgmr.msra.gmra.mrb[96].mxu0 %vm732_vm2, %v10654_v43  ;;  %v11888_v43 = vld [vmem:[#allocation23_spill] sm:$0xff] }
 0x434   : > { %9308 = vmatprep.mubr.msk.f32.mxu0 %vm732_vm2, %v10662_v45  ;;  %9967 = vmatpush3.bf16.msra.mxu0 %v11283_v6  ;;  %v11889_v45 = vld [vmem:[#allocation24_spill] sm:$0xff] }
 0x435   : > { %9969 = vmatprep.subr.bf16.mxu0 %v11289_v50 }
 0x437   : > { %9309 = vmatmul.mubr.msk.f32.gmra.mrb[98].mxu0 %vm732_vm2, %v10678_v48  ;;  %v7969_v48 = vld [vmem:[%s11809_s9] ss:$0 sm:$0xff] }
 0x438   : > { %9971 = vmatpush3.bf16.msra.mxu0 %v11289_v50  ;;  %9333 = vmatprep.mubr.msk.f32.mxu0 %vm732_vm2, %v10674_v47  ;;  %v11890_v47 = vld [vmem:[#allocation25_spill] sm:$0xff] }
 0x439   : > { %9981 = vmatprep.subr.bf16.mxu0 %v11283_v6 }
 0x43b   : > { %9334 = vmatmul.mubr.msk.f32.vlgmr.msra.gmra.mrb[100].mxu0 %vm732_vm2, %v10693_v52  ;;  %v11504_v52 = vsub.f32 %v7969_v48, %v11200_v5 }
 0x43c   : > { %9336 = vmatprep.mubr.msk.f32.mxu0 %vm732_vm2, %v10696_v55  ;;  %9983 = vmatpush3.bf16.msra.mxu0 %v11283_v6  ;;  %v11507_v55 = vsub.f32 %v7969_v48, %v11207_v29 }
 0x43d   : > { %9985 = vmatprep.subr.bf16.mxu0 %v11289_v50 }
 0x43f   : > { %9337 = vmatmul.mubr.msk.f32.gmra.mrb[102].mxu0 %vm732_vm2, %v10711_v60 }
 0x440   : > { %9987 = vmatpush3.bf16.msra.mxu0 %v11289_v50  ;;  %9361 = vmatprep.mubr.msk.f32.mxu0 %vm732_vm2, %v10714_v62 }
 0x441   : > { %9997 = vmatprep.subr.bf16.mxu0 %v11283_v6 }
 0x443   : > { %9362 = vmatmul.mubr.msk.f32.vlgmr.msra.gmra.mrb[104].mxu0 %vm732_vm2, %v10721_v63 }
 0x444   : > { %9364 = vmatprep.mubr.msk.f32.mxu0 %vm732_vm2, %v10729_v4  ;;  %9999 = vmatpush3.bf16.msra.mxu0 %v11283_v6 }
 0x445   : > { %10001 = vmatprep.subr.bf16.mxu0 %v11289_v50 }
 0x447   : > { %9365 = vmatmul.mubr.msk.f32.gmra.mrb[106].mxu0 %vm732_vm2, %v10745_v14  ;;  %v11515_v14 = vsub.f32 %v7969_v48, %v11279_v44 }
 0x448   : > { %10003 = vmatpush3.bf16.msra.mxu0 %v11289_v50  ;;  %9389 = vmatprep.mubr.msk.f32.mxu0 %vm732_vm2, %v10741_v13  ;;  %v11512_v13 = vsub.f32 %v7969_v48, %v11277_v0 }
 0x449   : > { %10013 = vmatprep.subr.bf16.mxu0 %v11283_v6 }
 0x44b   : > { %9390 = vmatmul.mubr.msk.f32.vlgmr.msra.gmra.mrb[108].mxu0 %vm732_vm2, %v10760_v21 }
 0x44c   : > { %9392 = vmatprep.mubr.msk.f32.mxu0 %vm732_vm2, %v10763_v23  ;;  %10015 = vmatpush3.bf16.msra.mxu0 %v11283_v6 }
 0x44d   : > { %10017 = vmatprep.subr.bf16.mxu0 %v11289_v50 }
 0x44f   : > { %9393 = vmatmul.mubr.msk.f32.gmra.mrb[110].mxu0 %vm732_vm2, %v11867_v57 }
 0x450   : > { %10019 = vmatpush3.bf16.msra.mxu0 %v11289_v50  ;;  %9417 = vmatprep.mubr.msk.f32.mxu0 %vm732_vm2, %v11868_v58 }
 0x451   : > { %10029 = vmatprep.subr.bf16.mxu0 %v11283_v6 }
 0x453   : > { %9418 = vmatmul.mubr.msk.f32.vlgmr.msra.gmra.mrb[112].mxu0 %vm732_vm2, %v11869_v59 }
 0x454   : > { %9420 = vmatprep.mubr.msk.f32.mxu0 %vm732_vm2, %v11870_v61  ;;  %10031 = vmatpush3.bf16.msra.mxu0 %v11283_v6 }
 0x455   : > { %10033 = vmatprep.subr.bf16.mxu0 %v11289_v50 }
 0x457   : > { %9421 = vmatmul.mubr.msk.f32.gmra.mrb[114].mxu0 %vm732_vm2, %v10814_v46 }
 0x458   : > { %10035 = vmatpush3.bf16.msra.mxu0 %v11289_v50  ;;  %9445 = vmatprep.mubr.msk.f32.mxu0 %vm732_vm2, %v11871_v11 }
 0x459   : > { %10045 = vmatprep.subr.bf16.mxu0 %v11283_v6 }
 0x45b   : > { %9446 = vmatmul.mubr.msk.f32.vlgmr.msra.gmra.mrb[116].mxu0 %vm732_vm2, %v11872_v12 }
 0x45c   : > { %9448 = vmatprep.mubr.msk.f32.mxu0 %vm732_vm2, %v11873_v15  ;;  %10047 = vmatpush3.bf16.msra.mxu0 %v11283_v6 }
 0x45d   : > { %10049 = vmatprep.subr.bf16.mxu0 %v11289_v50 }
 0x45f   : > { %9449 = vmatmul.mubr.msk.f32.gmra.mrb[118].mxu0 %vm732_vm2, %v11874_v16 }
 0x460   : > { %10051 = vmatpush3.bf16.msra.mxu0 %v11289_v50  ;;  %9473 = vmatprep.mubr.msk.f32.mxu0 %vm732_vm2, %v11875_v17 }
 0x461   : > { %10061 = vmatprep.subr.bf16.mxu0 %v11283_v6 }
 0x463   : > { %9474 = vmatmul.mubr.msk.f32.vlgmr.msra.gmra.mrb[120].mxu0 %vm732_vm2, %v11876_v20 }
 0x464   : > { %9476 = vmatprep.mubr.msk.f32.mxu0 %vm732_vm2, %v11877_v22  ;;  %10063 = vmatpush3.bf16.msra.mxu0 %v11283_v6 }
 0x465   : > { %10065 = vmatprep.subr.bf16.mxu0 %v11289_v50 }
 0x467   : > { %9477 = vmatmul.mubr.msk.f32.gmra.mrb[122].mxu0 %vm732_vm2, %v11878_v24 }
 0x468   : > { %10067 = vmatpush3.bf16.msra.mxu0 %v11289_v50  ;;  %9501 = vmatprep.mubr.msk.f32.mxu0 %vm732_vm2, %v11879_v25 }
 0x469   : > { %10077 = vmatprep.subr.bf16.mxu0 %v11283_v6 }
 0x46b   : > { %9502 = vmatmul.mubr.msk.f32.vlgmr.msra.gmra.mrb[124].mxu0 %vm732_vm2, %v11880_v26 }
 0x46c   : > { %9504 = vmatprep.mubr.msk.f32.mxu0 %vm732_vm2, %v11881_v32  ;;  %10079 = vmatpush3.bf16.msra.mxu0 %v11283_v6 }
 0x46d   : > { %10081 = vmatprep.subr.bf16.mxu0 %v11289_v50 }
 0x46f   : > { %9505 = vmatmul.mubr.msk.f32.gmra.mrb[126].mxu0 %vm732_vm2, %v11882_v33 }
 0x470   : > { %10083 = vmatpush3.bf16.msra.mxu0 %v11289_v50  ;;  %9529 = vmatprep.mubr.msk.f32.mxu0 %vm732_vm2, %v11883_v34 }
 0x471   : > { %10093 = vmatprep.subr.bf16.mxu0 %v11283_v6 }
 0x473   : > { %9530 = vmatmul.mubr.msk.f32.vlgmr.msra.gmra.mrb[128].mxu0 %vm732_vm2, %v11884_v37 }
 0x474   : > { %9532 = vmatprep.mubr.msk.f32.mxu0 %vm732_vm2, %v11885_v39  ;;  %10095 = vmatpush3.bf16.msra.mxu0 %v11283_v6 }
 0x475   : > { %10097 = vmatprep.subr.bf16.mxu0 %v11289_v50 }
 0x477   : > { %9533 = vmatmul.mubr.msk.f32.gmra.mrb[130].mxu0 %vm732_vm2, %v11886_v41 }
 0x478   : > { %10099 = vmatpush3.bf16.msra.mxu0 %v11289_v50  ;;  %9557 = vmatprep.mubr.msk.f32.mxu0 %vm732_vm2, %v11887_v42 }
 0x47b   : > { %9558 = vmatmul.mubr.msk.f32.vlgmr.msra.gmra.mrb[132].mxu0 %vm732_vm2, %v11888_v43 }
 0x47c   : > { %9560 = vmatprep.mubr.msk.f32.mxu0 %vm732_vm2, %v11889_v45 }
 0x47f   : > { %9561 = vmatmul.mubr.msk.f32.gmra.mrb[134].mxu0 %vm732_vm2, %v11890_v47 }
 0x4d6   : > { %v9139_v60 = vpop.f32.mrb[72].mxu0 }
 0x4d7   : > { %v4609_v62 = vadd.f32 %v9139_v60, %v11504_v52  ;;  %v4603_v63 = vpop.f32.mrb[73].mxu0 }
 0x4d8   : > { %v4604_v4 = vadd.f32 %v4603_v63, %v11507_v55 }
 0x4d9   : > { %v4623_v46 = vmax.f32 %v4609_v62, 0.0 }
 0x4da   : > { %v4622_v21 = vmax.f32 %v4604_v4, 0.0  ;;  %v9142_v23 = vpop.f32.mrb[74].mxu0 }
 0x4db   : > { %v4619_v5 = vadd.f32 %v9142_v23, %v11512_v13  ;;  %v4613_v51 = vpop.f32.mrb[75].mxu0 }
 0x4dc   : > { %v4614_v29 = vadd.f32 %v4613_v51, %v11515_v14  ;;  %9151 = vmatprep.mubr.msk.f32.mxu1 %vm732_vm2, %v4622_v21 }
 0x4dd   : > { %9152 = vmatmul.mubr.msk.f32.vlgmr.msra.gmra.mrb[72].mxu1 %vm732_vm2, %v4623_v46  ;;  %v4625_v31 = vmax.f32 %v4619_v5, 0.0 }
 0x4de   : > { %v4624_v49 = vmax.f32 %v4614_v29, 0.0  ;;  %v9167_v1 = vpop.f32.mrb[76].mxu0  ;;  %9879 = vmatpush3.bf16.msra.mxu1 %v11299_v18 }
 0x4df   : > { %v4801_v56 = vadd.f32 %v9167_v1, %v11504_v52  ;;  %v4795_v27 = vpop.f32.mrb[77].mxu0  ;;  %9881 = vmatprep.subr.bf16.mxu1 %v11438_v10 }
 0x4e0   : > { %v4796_v28 = vadd.f32 %v4795_v27, %v11507_v55  ;;  %9154 = vmatprep.mubr.msk.f32.mxu1 %vm732_vm2, %v4624_v49 }
 0x4e1   : > { %9155 = vmatmul.mubr.msk.f32.gmra.mrb[74].mxu1 %vm732_vm2, %v4625_v31  ;;  %v4815_v44 = vmax.f32 %v4801_v56, 0.0 }
 0x4e2   : > { %v4814_v2 = vmax.f32 %v4796_v28, 0.0  ;;  %v9170_v0 = vpop.f32.mrb[78].mxu0  ;;  %9883 = vmatpush3.bf16.msra.mxu1 %v11438_v10 }
 0x4e3   : > { %v4811_v19 = vadd.f32 %v9170_v0, %v11512_v13  ;;  %v4805_v8 = vpop.f32.mrb[79].mxu0  ;;  %9893 = vmatprep.subr.bf16.mxu1 %v11299_v18 }
 0x4e4   : > { %v4806_v35 = vadd.f32 %v4805_v8, %v11515_v14  ;;  %9179 = vmatprep.mubr.msk.f32.mxu1 %vm732_vm2, %v4814_v2 }
 0x4e5   : > { %9180 = vmatmul.mubr.msk.f32.vlgmr.msra.gmra.mrb[76].mxu1 %vm732_vm2, %v4815_v44  ;;  %v4817_v38 = vmax.f32 %v4811_v19, 0.0 }
 0x4e6   : > { %v4816_v36 = vmax.f32 %v4806_v35, 0.0  ;;  %v9195_v6 = vpop.f32.mrb[80].mxu0  ;;  %9895 = vmatpush3.bf16.msra.mxu1 %v11299_v18 }
 0x4e7   : > { %v4991_v9 = vadd.f32 %v9195_v6, %v11504_v52  ;;  %v4985_v54 = vpop.f32.mrb[81].mxu0  ;;  %9897 = vmatprep.subr.bf16.mxu1 %v11438_v10 }
 0x4e8   : > { %v4986_v53 = vadd.f32 %v4985_v54, %v11507_v55  ;;  %9182 = vmatprep.mubr.msk.f32.mxu1 %vm732_vm2, %v4816_v36 }
 0x4e9   : > { %9183 = vmatmul.mubr.msk.f32.gmra.mrb[78].mxu1 %vm732_vm2, %v4817_v38  ;;  %v5005_v40 = vmax.f32 %v4991_v9, 0.0 }
 0x4ea   : > { %v5004_v50 = vmax.f32 %v4986_v53, 0.0  ;;  %v9198_v30 = vpop.f32.mrb[82].mxu0  ;;  %9899 = vmatpush3.bf16.msra.mxu1 %v11438_v10 }
 0x4eb   : > { %v5001_v57 = vadd.f32 %v9198_v30, %v11512_v13  ;;  %v4995_v58 = vpop.f32.mrb[83].mxu0  ;;  %9909 = vmatprep.subr.bf16.mxu1 %v11299_v18 }
 0x4ec   : > { %v4996_v59 = vadd.f32 %v4995_v58, %v11515_v14  ;;  %9207 = vmatprep.mubr.msk.f32.mxu1 %vm732_vm2, %v5004_v50 }
 0x4ed   : > { %9208 = vmatmul.mubr.msk.f32.vlgmr.msra.gmra.mrb[80].mxu1 %vm732_vm2, %v5005_v40  ;;  %v5007_v7 = vmax.f32 %v5001_v57, 0.0 }
 0x4ee   : > { %v5006_v61 = vmax.f32 %v4996_v59, 0.0  ;;  %v9223_v3 = vpop.f32.mrb[84].mxu0  ;;  %9911 = vmatpush3.bf16.msra.mxu1 %v11299_v18 }
 0x4ef   : > { %v5181_v11 = vadd.f32 %v9223_v3, %v11504_v52  ;;  %v5175_v12 = vpop.f32.mrb[85].mxu0  ;;  %9913 = vmatprep.subr.bf16.mxu1 %v11438_v10 }
 0x4f0   : > { %v5176_v15 = vadd.f32 %v5175_v12, %v11507_v55  ;;  %9210 = vmatprep.mubr.msk.f32.mxu1 %vm732_vm2, %v5006_v61 }
 0x4f1   : > { %9211 = vmatmul.mubr.msk.f32.gmra.mrb[82].mxu1 %vm732_vm2, %v5007_v7  ;;  %v5195_v20 = vmax.f32 %v5181_v11, 0.0 }
 0x4f2   : > { %v5194_v16 = vmax.f32 %v5176_v15, 0.0  ;;  %v9226_v17 = vpop.f32.mrb[86].mxu0  ;;  %9915 = vmatpush3.bf16.msra.mxu1 %v11438_v10 }
 0x4f3   : > { %v5191_v22 = vadd.f32 %v9226_v17, %v11512_v13  ;;  %v5185_v24 = vpop.f32.mrb[87].mxu0  ;;  %9925 = vmatprep.subr.bf16.mxu1 %v11299_v18 }
 0x4f4   : > { %v5186_v25 = vadd.f32 %v5185_v24, %v11515_v14  ;;  %9235 = vmatprep.mubr.msk.f32.mxu1 %vm732_vm2, %v5194_v16 }
 0x4f5   : > { %9236 = vmatmul.mubr.msk.f32.vlgmr.msra.gmra.mrb[84].mxu1 %vm732_vm2, %v5195_v20  ;;  %v5197_v33 = vmax.f32 %v5191_v22, 0.0 }
 0x4f6   : > { %v5196_v26 = vmax.f32 %v5186_v25, 0.0  ;;  %v9251_v32 = vpop.f32.mrb[88].mxu0  ;;  %9927 = vmatpush3.bf16.msra.mxu1 %v11299_v18 }
 0x4f7   : > { %v5371_v34 = vadd.f32 %v9251_v32, %v11504_v52  ;;  %v5365_v37 = vpop.f32.mrb[89].mxu0  ;;  %9929 = vmatprep.subr.bf16.mxu1 %v11438_v10 }
 0x4f8   : > { %v5366_v39 = vadd.f32 %v5365_v37, %v11507_v55  ;;  %9238 = vmatprep.mubr.msk.f32.mxu1 %vm732_vm2, %v5196_v26 }
 0x4f9   : > { %9239 = vmatmul.mubr.msk.f32.gmra.mrb[86].mxu1 %vm732_vm2, %v5197_v33  ;;  %v5385_v43 = vmax.f32 %v5371_v34, 0.0 }
 0x4fa   : > { %v5384_v41 = vmax.f32 %v5366_v39, 0.0  ;;  %v9254_v42 = vpop.f32.mrb[90].mxu0  ;;  %9931 = vmatpush3.bf16.msra.mxu1 %v11438_v10 }
 0x4fb   : > { %v5381_v45 = vadd.f32 %v9254_v42, %v11512_v13  ;;  %v5375_v47 = vpop.f32.mrb[91].mxu0  ;;  %9941 = vmatprep.subr.bf16.mxu1 %v11299_v18 }
 0x4fc   : > { %v5376_v48 = vadd.f32 %v5375_v47, %v11515_v14  ;;  %9263 = vmatprep.mubr.msk.f32.mxu1 %vm732_vm2, %v5384_v41 }
 0x4fd   : > { %9264 = vmatmul.mubr.msk.f32.vlgmr.msra.gmra.mrb[88].mxu1 %vm732_vm2, %v5385_v43  ;;  %v5387_v63 = vmax.f32 %v5381_v45, 0.0 }
 0x4fe   : > { %v5386_v60 = vmax.f32 %v5376_v48, 0.0  ;;  %v9279_v62 = vpop.f32.mrb[92].mxu0  ;;  %9943 = vmatpush3.bf16.msra.mxu1 %v11299_v18 }
 0x4ff   : > { %v5561_v4 = vadd.f32 %v9279_v62, %v11504_v52  ;;  %v5555_v21 = vpop.f32.mrb[93].mxu0  ;;  %9945 = vmatprep.subr.bf16.mxu1 %v11438_v10 }
 0x500   : > { %v5556_v23 = vadd.f32 %v5555_v21, %v11507_v55  ;;  %9266 = vmatprep.mubr.msk.f32.mxu1 %vm732_vm2, %v5386_v60 }
 0x501   : > { %9267 = vmatmul.mubr.msk.f32.gmra.mrb[90].mxu1 %vm732_vm2, %v5387_v63  ;;  %v5575_v51 = vmax.f32 %v5561_v4, 0.0 }
 0x502   : > { %v5574_v46 = vmax.f32 %v5556_v23, 0.0  ;;  %v9282_v5 = vpop.f32.mrb[94].mxu0  ;;  %9947 = vmatpush3.bf16.msra.mxu1 %v11438_v10 }
 0x503   : > { %v5571_v29 = vadd.f32 %v9282_v5, %v11512_v13  ;;  %v5565_v49 = vpop.f32.mrb[95].mxu0  ;;  %9957 = vmatprep.subr.bf16.mxu1 %v11299_v18 }
 0x504   : > { %v5566_v1 = vadd.f32 %v5565_v49, %v11515_v14  ;;  %9291 = vmatprep.mubr.msk.f32.mxu1 %vm732_vm2, %v5574_v46 }
 0x505   : > { %9292 = vmatmul.mubr.msk.f32.vlgmr.msra.gmra.mrb[92].mxu1 %vm732_vm2, %v5575_v51  ;;  %v5577_v27 = vmax.f32 %v5571_v29, 0.0 }
 0x506   : > { %v5576_v31 = vmax.f32 %v5566_v1, 0.0  ;;  %v9307_v56 = vpop.f32.mrb[96].mxu0  ;;  %9959 = vmatpush3.bf16.msra.mxu1 %v11299_v18 }
 0x507   : > { %v5751_v28 = vadd.f32 %v9307_v56, %v11504_v52  ;;  %v5745_v2 = vpop.f32.mrb[97].mxu0  ;;  %9961 = vmatprep.subr.bf16.mxu1 %v11438_v10 }
 0x508   : > { %v5746_v0 = vadd.f32 %v5745_v2, %v11507_v55  ;;  %9294 = vmatprep.mubr.msk.f32.mxu1 %vm732_vm2, %v5576_v31 }
 0x509   : > { %9295 = vmatmul.mubr.msk.f32.gmra.mrb[94].mxu1 %vm732_vm2, %v5577_v27  ;;  %v5765_v8 = vmax.f32 %v5751_v28, 0.0 }
 0x50a   : > { %v5764_v44 = vmax.f32 %v5746_v0, 0.0  ;;  %v9310_v19 = vpop.f32.mrb[98].mxu0  ;;  %9963 = vmatpush3.bf16.msra.mxu1 %v11438_v10 }
 0x50b   : > { %v5761_v35 = vadd.f32 %v9310_v19, %v11512_v13  ;;  %v5755_v36 = vpop.f32.mrb[99].mxu0  ;;  %9973 = vmatprep.subr.bf16.mxu1 %v11299_v18 }
 0x50c   : > { %v5756_v6 = vadd.f32 %v5755_v36, %v11515_v14  ;;  %9319 = vmatprep.mubr.msk.f32.mxu1 %vm732_vm2, %v5764_v44 }
 0x50d   : > { %9320 = vmatmul.mubr.msk.f32.vlgmr.msra.gmra.mrb[96].mxu1 %vm732_vm2, %v5765_v8  ;;  %v5767_v54 = vmax.f32 %v5761_v35, 0.0 }
 0x50e   : > { %v5766_v38 = vmax.f32 %v5756_v6, 0.0  ;;  %v9335_v9 = vpop.f32.mrb[100].mxu0  ;;  %9975 = vmatpush3.bf16.msra.mxu1 %v11299_v18 }
 0x50f   : > { %v5941_v53 = vadd.f32 %v9335_v9, %v11504_v52  ;;  %v5935_v50 = vpop.f32.mrb[101].mxu0  ;;  %9977 = vmatprep.subr.bf16.mxu1 %v11438_v10 }
 0x510   : > { %v5936_v30 = vadd.f32 %v5935_v50, %v11507_v55  ;;  %9322 = vmatprep.mubr.msk.f32.mxu1 %vm732_vm2, %v5766_v38 }
 0x511   : > { %9323 = vmatmul.mubr.msk.f32.gmra.mrb[98].mxu1 %vm732_vm2, %v5767_v54  ;;  %v5955_v58 = vmax.f32 %v5941_v53, 0.0 }
 0x512   : > { %v5954_v40 = vmax.f32 %v5936_v30, 0.0  ;;  %v9338_v57 = vpop.f32.mrb[102].mxu0  ;;  %9979 = vmatpush3.bf16.msra.mxu1 %v11438_v10 }
 0x513   : > { %v5951_v59 = vadd.f32 %v9338_v57, %v11512_v13  ;;  %v5945_v61 = vpop.f32.mrb[103].mxu0  ;;  %9989 = vmatprep.subr.bf16.mxu1 %v11299_v18 }
 0x514   : > { %v5946_v3 = vadd.f32 %v5945_v61, %v11515_v14  ;;  %9347 = vmatprep.mubr.msk.f32.mxu1 %vm732_vm2, %v5954_v40 }
 0x515   : > { %9348 = vmatmul.mubr.msk.f32.vlgmr.msra.gmra.mrb[100].mxu1 %vm732_vm2, %v5955_v58  ;;  %v5957_v12 = vmax.f32 %v5951_v59, 0.0 }
 0x516   : > { %v5956_v7 = vmax.f32 %v5946_v3, 0.0  ;;  %v9363_v11 = vpop.f32.mrb[104].mxu0  ;;  %9991 = vmatpush3.bf16.msra.mxu1 %v11299_v18 }
 0x517   : > { %v6131_v15 = vadd.f32 %v9363_v11, %v11504_v52  ;;  %v6125_v16 = vpop.f32.mrb[105].mxu0  ;;  %9993 = vmatprep.subr.bf16.mxu1 %v11438_v10 }
 0x518   : > { %v6126_v17 = vadd.f32 %v6125_v16, %v11507_v55  ;;  %9350 = vmatprep.mubr.msk.f32.mxu1 %vm732_vm2, %v5956_v7 }
 0x519   : > { %9351 = vmatmul.mubr.msk.f32.gmra.mrb[102].mxu1 %vm732_vm2, %v5957_v12  ;;  %v6145_v24 = vmax.f32 %v6131_v15, 0.0 }
 0x51a   : > { %v6144_v20 = vmax.f32 %v6126_v17, 0.0  ;;  %v9366_v22 = vpop.f32.mrb[106].mxu0  ;;  %9995 = vmatpush3.bf16.msra.mxu1 %v11438_v10 }
 0x51b   : > { %v6141_v25 = vadd.f32 %v9366_v22, %v11512_v13  ;;  %v6135_v26 = vpop.f32.mrb[107].mxu0  ;;  %10005 = vmatprep.subr.bf16.mxu1 %v11299_v18 }
 0x51c   : > { %v6136_v32 = vadd.f32 %v6135_v26, %v11515_v14  ;;  %9375 = vmatprep.mubr.msk.f32.mxu1 %vm732_vm2, %v6144_v20 }
 0x51d   : > { %9376 = vmatmul.mubr.msk.f32.vlgmr.msra.gmra.mrb[104].mxu1 %vm732_vm2, %v6145_v24  ;;  %v6147_v37 = vmax.f32 %v6141_v25, 0.0 }
 0x51e   : > { %v6146_v33 = vmax.f32 %v6136_v32, 0.0  ;;  %v9391_v34 = vpop.f32.mrb[108].mxu0  ;;  %10007 = vmatpush3.bf16.msra.mxu1 %v11299_v18 }
 0x51f   : > { %v6321_v39 = vadd.f32 %v9391_v34, %v11504_v52  ;;  %v6315_v41 = vpop.f32.mrb[109].mxu0  ;;  %10009 = vmatprep.subr.bf16.mxu1 %v11438_v10 }
 0x520   : > { %v6316_v42 = vadd.f32 %v6315_v41, %v11507_v55  ;;  %9378 = vmatprep.mubr.msk.f32.mxu1 %vm732_vm2, %v6146_v33 }
 0x521   : > { %9379 = vmatmul.mubr.msk.f32.gmra.mrb[106].mxu1 %vm732_vm2, %v6147_v37  ;;  %v6335_v47 = vmax.f32 %v6321_v39, 0.0 }
 0x522   : > { %v6334_v43 = vmax.f32 %v6316_v42, 0.0  ;;  %v9394_v45 = vpop.f32.mrb[110].mxu0  ;;  %10011 = vmatpush3.bf16.msra.mxu1 %v11438_v10 }
 0x523   : > { %v6331_v48 = vadd.f32 %v9394_v45, %v11512_v13  ;;  %v6325_v60 = vpop.f32.mrb[111].mxu0  ;;  %10021 = vmatprep.subr.bf16.mxu1 %v11299_v18 }
 0x524   : > { %v6326_v62 = vadd.f32 %v6325_v60, %v11515_v14  ;;  %9403 = vmatprep.mubr.msk.f32.mxu1 %vm732_vm2, %v6334_v43 }
 0x525   : > { %9404 = vmatmul.mubr.msk.f32.vlgmr.msra.gmra.mrb[108].mxu1 %vm732_vm2, %v6335_v47  ;;  %v6337_v21 = vmax.f32 %v6331_v48, 0.0 }
 0x526   : > { %v6336_v63 = vmax.f32 %v6326_v62, 0.0  ;;  %v9419_v4 = vpop.f32.mrb[112].mxu0  ;;  %10023 = vmatpush3.bf16.msra.mxu1 %v11299_v18 }
 0x527   : > { %v6511_v23 = vadd.f32 %v9419_v4, %v11504_v52  ;;  %v6505_v46 = vpop.f32.mrb[113].mxu0  ;;  %10025 = vmatprep.subr.bf16.mxu1 %v11438_v10 }
 0x528   : > { %v6506_v5 = vadd.f32 %v6505_v46, %v11507_v55  ;;  %9406 = vmatprep.mubr.msk.f32.mxu1 %vm732_vm2, %v6336_v63 }
 0x529   : > { %9407 = vmatmul.mubr.msk.f32.gmra.mrb[110].mxu1 %vm732_vm2, %v6337_v21  ;;  %v6525_v49 = vmax.f32 %v6511_v23, 0.0 }
 0x52a   : > { %v6524_v51 = vmax.f32 %v6506_v5, 0.0  ;;  %v9422_v29 = vpop.f32.mrb[114].mxu0  ;;  %10027 = vmatpush3.bf16.msra.mxu1 %v11438_v10 }
 0x52b   : > { %v6521_v1 = vadd.f32 %v9422_v29, %v11512_v13  ;;  %v6515_v31 = vpop.f32.mrb[115].mxu0  ;;  %10037 = vmatprep.subr.bf16.mxu1 %v11299_v18 }
 0x52c   : > { %v6516_v56 = vadd.f32 %v6515_v31, %v11515_v14  ;;  %9431 = vmatprep.mubr.msk.f32.mxu1 %vm732_vm2, %v6524_v51 }
 0x52d   : > { %9432 = vmatmul.mubr.msk.f32.vlgmr.msra.gmra.mrb[112].mxu1 %vm732_vm2, %v6525_v49  ;;  %v6527_v2 = vmax.f32 %v6521_v1, 0.0 }
 0x52e   : > { %v6526_v27 = vmax.f32 %v6516_v56, 0.0  ;;  %v9447_v28 = vpop.f32.mrb[116].mxu0  ;;  %10039 = vmatpush3.bf16.msra.mxu1 %v11299_v18 }
 0x52f   : > { %v6701_v0 = vadd.f32 %v9447_v28, %v11504_v52  ;;  %v6695_v44 = vpop.f32.mrb[117].mxu0  ;;  %10041 = vmatprep.subr.bf16.mxu1 %v11438_v10 }
 0x530   : > { %v6696_v19 = vadd.f32 %v6695_v44, %v11507_v55  ;;  %9434 = vmatprep.mubr.msk.f32.mxu1 %vm732_vm2, %v6526_v27 }
 0x531   : > { %9435 = vmatmul.mubr.msk.f32.gmra.mrb[114].mxu1 %vm732_vm2, %v6527_v2  ;;  %v6715_v36 = vmax.f32 %v6701_v0, 0.0 }
 0x532   : > { %v6714_v8 = vmax.f32 %v6696_v19, 0.0  ;;  %v9450_v35 = vpop.f32.mrb[118].mxu0  ;;  %10043 = vmatpush3.bf16.msra.mxu1 %v11438_v10 }
 0x533   : > { %v6711_v6 = vadd.f32 %v9450_v35, %v11512_v13  ;;  %v6705_v38 = vpop.f32.mrb[119].mxu0  ;;  %10053 = vmatprep.subr.bf16.mxu1 %v11299_v18 }
 0x534   : > { %v6706_v9 = vadd.f32 %v6705_v38, %v11515_v14  ;;  %9459 = vmatprep.mubr.msk.f32.mxu1 %vm732_vm2, %v6714_v8  ;;  %v7596_v38 = vld [vmem:[%s11812_s12] sm:$0xff] }
 0x535   : > { %9460 = vmatmul.mubr.msk.f32.vlgmr.msra.gmra.mrb[116].mxu1 %vm732_vm2, %v6715_v36  ;;  %v6717_v50 = vmax.f32 %v6711_v6, 0.0 }
 0x536   : > { %v6716_v54 = vmax.f32 %v6706_v9, 0.0  ;;  %v9475_v53 = vpop.f32.mrb[120].mxu0  ;;  %10055 = vmatpush3.bf16.msra.mxu1 %v11299_v18  ;;  %v7597_v9 = vld [vmem:[%s11812_s12 + $0x8] sm:$0xff] }
 0x537   : > { %v6891_v30 = vadd.f32 %v9475_v53, %v11504_v52  ;;  %v6885_v40 = vpop.f32.mrb[121].mxu0  ;;  %10057 = vmatprep.subr.bf16.mxu1 %v11438_v10 }
 0x538   : > { %v6886_v57 = vadd.f32 %v6885_v40, %v11507_v55  ;;  %9462 = vmatprep.mubr.msk.f32.mxu1 %vm732_vm2, %v6716_v54 }
 0x539   : > { %9463 = vmatmul.mubr.msk.f32.gmra.mrb[118].mxu1 %vm732_vm2, %v6717_v50  ;;  %v6905_v61 = vmax.f32 %v6891_v30, 0.0  ;;  %v10109_v50 = vpack.c.bf16 %v7597_v9, %v7596_v38 }
 0x53a   : > { %v6904_v58 = vmax.f32 %v6886_v57, 0.0  ;;  %v9478_v59 = vpop.f32.mrb[122].mxu0  ;;  %10059 = vmatpush3.bf16.msra.mxu1 %v11438_v10 }
 0x53b   : > { %v6901_v3 = vadd.f32 %v9478_v59, %v11512_v13  ;;  %v6895_v7 = vpop.f32.mrb[123].mxu0  ;;  %10069 = vmatprep.subr.bf16.mxu1 %v11299_v18 }
 0x53c   : > { %v6896_v11 = vadd.f32 %v6895_v7, %v11515_v14  ;;  %9487 = vmatprep.mubr.msk.f32.mxu1 %vm732_vm2, %v6904_v58  ;;  %v10198_v58 = vmov 0.0|0.0   ;;  %v7598_v7 = vld [vmem:[%s11812_s12 + $0x10] sm:$0xff] }
 0x53d   : > { %9488 = vmatmul.mubr.msk.f32.vlgmr.msra.gmra.mrb[120].mxu1 %vm732_vm2, %v6905_v61  ;;  %v6907_v16 = vmax.f32 %v6901_v3, 0.0  ;;  %10108 = vmatprep.subr.bf16.mxu0 %v10198_v58 }
 0x53e   : > { %v6906_v12 = vmax.f32 %v6896_v11, 0.0  ;;  %v9503_v15 = vpop.f32.mrb[124].mxu0  ;;  %10071 = vmatpush3.bf16.msra.mxu1 %v11299_v18  ;;  %10110 = vmatpush3.bf16.msra.mxu0 %v10109_v50  ;;  %v7599_v11 = vld [vmem:[%s11812_s12 + $0x18] sm:$0xff] }
 0x53f   : > { %v7081_v17 = vadd.f32 %v9503_v15, %v11504_v52  ;;  %v7075_v20 = vpop.f32.mrb[125].mxu0  ;;  %10073 = vmatprep.subr.bf16.mxu1 %v11438_v10  ;;  %10111 = vmatprep.subr.bf16.mxu0 %v10198_v58 }
 0x540   : > { %v7076_v22 = vadd.f32 %v7075_v20, %v11507_v55  ;;  %9490 = vmatprep.mubr.msk.f32.mxu1 %vm732_vm2, %v6906_v12 }
 0x541   : > { %9491 = vmatmul.mubr.msk.f32.gmra.mrb[122].mxu1 %vm732_vm2, %v6907_v16  ;;  %v7095_v26 = vmax.f32 %v7081_v17, 0.0  ;;  %v10112_v16 = vpack.c.bf16 %v7599_v11, %v7598_v7 }
 0x542   : > { %v7094_v24 = vmax.f32 %v7076_v22, 0.0  ;;  %v9506_v25 = vpop.f32.mrb[126].mxu0  ;;  %10075 = vmatpush3.bf16.msra.mxu1 %v11438_v10 }
 0x543   : > { %v7091_v32 = vadd.f32 %v9506_v25, %v11512_v13  ;;  %v7085_v33 = vpop.f32.mrb[127].mxu0  ;;  %10085 = vmatprep.subr.bf16.mxu1 %v11299_v18  ;;  %10113 = vmatpush3.bf16.msra.mxu0 %v10112_v16 }
 0x544   : > { %v7086_v34 = vadd.f32 %v7085_v33, %v11515_v14  ;;  %9515 = vmatprep.mubr.msk.f32.mxu1 %vm732_vm2, %v7094_v24 }
 0x545   : > { %9516 = vmatmul.mubr.msk.f32.vlgmr.msra.gmra.mrb[124].mxu1 %vm732_vm2, %v7095_v26  ;;  %v7097_v41 = vmax.f32 %v7091_v32, 0.0  ;;  %v11891_v32 = vmov 0.0  }
 0x546   : > { %v7096_v37 = vmax.f32 %v7086_v34, 0.0  ;;  %v9531_v39 = vpop.f32.mrb[128].mxu0  ;;  %10087 = vmatpush3.bf16.msra.mxu1 %v11299_v18  ;;  %9585 = vmatprep.mubr.msk.f32.mxu0 %vm10199_vm0, %v11891_v32 }
 0x547   : > { %v7271_v42 = vadd.f32 %v9531_v39, %v11504_v52  ;;  %v7265_v43 = vpop.f32.mrb[129].mxu0  ;;  %10089 = vmatprep.subr.bf16.mxu1 %v11438_v10 }
 0x548   : > { %v7266_v45 = vadd.f32 %v7265_v43, %v11507_v55  ;;  %9518 = vmatprep.mubr.msk.f32.mxu1 %vm732_vm2, %v7096_v37 }
 0x549   : > { %9519 = vmatmul.mubr.msk.f32.gmra.mrb[126].mxu1 %vm732_vm2, %v7097_v41  ;;  %v7285_v60 = vmax.f32 %v7271_v42, 0.0 }
 0x54a   : > { %v7284_v47 = vmax.f32 %v7266_v45, 0.0  ;;  %v9534_v48 = vpop.f32.mrb[130].mxu0  ;;  %10091 = vmatpush3.bf16.msra.mxu1 %v11438_v10 }
 0x54b   : > { %v7281_v62 = vadd.f32 %v9534_v48, %v11512_v13  ;;  %v7275_v63 = vpop.f32.mrb[131].mxu0  ;;  %10101 = vmatprep.subr.bf16.mxu1 %v11299_v18 }
 0x54c   : > { %v7276_v4 = vadd.f32 %v7275_v63, %v11515_v14  ;;  %9543 = vmatprep.mubr.msk.f32.mxu1 %vm732_vm2, %v7284_v47 }
 0x54d   : > { %9544 = vmatmul.mubr.msk.f32.vlgmr.msra.gmra.mrb[128].mxu1 %vm732_vm2, %v7285_v60  ;;  %v7287_v46 = vmax.f32 %v7281_v62, 0.0 }
 0x54e   : > { %v7286_v21 = vmax.f32 %v7276_v4, 0.0  ;;  %v9559_v23 = vpop.f32.mrb[132].mxu0  ;;  %10103 = vmatpush3.bf16.msra.mxu1 %v11299_v18 }
 0x54f   : > { %v7461_v5 = vadd.f32 %v9559_v23, %v11504_v52  ;;  %v7455_v51 = vpop.f32.mrb[133].mxu0  ;;  %10105 = vmatprep.subr.bf16.mxu1 %v11438_v10 }
 0x550   : > { %v7456_v29 = vadd.f32 %v7455_v51, %v11507_v55  ;;  %9546 = vmatprep.mubr.msk.f32.mxu1 %vm732_vm2, %v7286_v21 }
 0x551   : > { %9547 = vmatmul.mubr.msk.f32.gmra.mrb[130].mxu1 %vm732_vm2, %v7287_v46  ;;  %v7475_v31 = vmax.f32 %v7461_v5, 0.0 }
 0x552   : > { %v7474_v49 = vmax.f32 %v7456_v29, 0.0  ;;  %v9562_v1 = vpop.f32.mrb[134].mxu0  ;;  %10107 = vmatpush3.bf16.msra.mxu1 %v11438_v10 }
 0x553   : > { %v7471_v56 = vadd.f32 %v9562_v1, %v11512_v13  ;;  %v7465_v18 = vpop.f32.mrb[135].mxu0  ;;  %v11705_v13 = vld [vmem:[%s11811_s11] ss:$0 sm:$0xff] }
 0x554   : > { %v7466_v27 = vadd.f32 %v7465_v18, %v11515_v14  ;;  %9571 = vmatprep.mubr.msk.f32.mxu1 %vm732_vm2, %v7474_v49 }
 0x555   : > { %9572 = vmatmul.mubr.msk.f32.vlgmr.msra.gmra.mrb[132].mxu1 %vm732_vm2, %v7475_v31  ;;  %v7477_v55 = vmax.f32 %v7471_v56, 0.0 }
 0x556   : > { %v7476_v52 = vmax.f32 %v7466_v27, 0.0 }
 0x558   : > { %9574 = vmatprep.mubr.msk.f32.mxu1 %vm732_vm2, %v7476_v52 }
 0x559   : > { %9575 = vmatmul.mubr.msk.f32.gmra.mrb[134].mxu1 %vm732_vm2, %v7477_v55 }
 0x5b0   : > { %v9153_v28 = vpop.f32.mrb[72].mxu1 }
 0x5b1   : > { %v4710_v2 = vpop.f32.mrb[73].mxu1  ;;  %v4716_v44 = vadd.f32 %v9153_v28, %v11705_v13 }
 0x5b2   : > { %v4711_v35 = vadd.f32 %v11705_v13, %v4710_v2 }
 0x5b4   : > { %v9156_v0 = vpop.f32.mrb[74].mxu1 }
 0x5b5   : > { %v4720_v10 = vpop.f32.mrb[75].mxu1  ;;  %v4726_v30 = vadd.f32 %v9156_v0, %v11705_v13 }
 0x5b6   : > { %v4721_v59 = vadd.f32 %v11705_v13, %v4720_v10 }
 0x5b8   : > { %v9181_v14 = vpop.f32.mrb[76].mxu1 }
 0x5b9   : > { %v4902_v19 = vadd.f32 %v9181_v14, %v11705_v13  ;;  %v4896_v8 = vpop.f32.mrb[77].mxu1 }
 0x5ba   : > { %v4897_v36 = vadd.f32 %v11705_v13, %v4896_v8 }
 0x5bb   : > { %v4916_v6 = vmax.f32 %v4716_v44, %v4902_v19 }
 0x5bc   : > { %v4915_v54 = vmax.f32 %v4711_v35, %v4897_v36  ;;  %v9184_v53 = vpop.f32.mrb[78].mxu1 }
 0x5bd   : > { %v4912_v40 = vadd.f32 %v9184_v53, %v11705_v13  ;;  %v4906_v57 = vpop.f32.mrb[79].mxu1 }
 0x5be   : > { %v4907_v61 = vadd.f32 %v11705_v13, %v4906_v57 }
 0x5bf   : > { %v4918_v3 = vmax.f32 %v4726_v30, %v4912_v40 }
 0x5c0   : > { %v4917_v12 = vmax.f32 %v4721_v59, %v4907_v61  ;;  %v9209_v15 = vpop.f32.mrb[80].mxu1 }
 0x5c1   : > { %v5092_v17 = vadd.f32 %v9209_v15, %v11705_v13  ;;  %v5086_v20 = vpop.f32.mrb[81].mxu1 }
 0x5c2   : > { %v5087_v22 = vadd.f32 %v11705_v13, %v5086_v20 }
 0x5c3   : > { %v5106_v24 = vmax.f32 %v4916_v6, %v5092_v17 }
 0x5c4   : > { %v5105_v25 = vmax.f32 %v4915_v54, %v5087_v22  ;;  %v9212_v26 = vpop.f32.mrb[82].mxu1 }
 0x5c5   : > { %v5102_v33 = vadd.f32 %v9212_v26, %v11705_v13  ;;  %v5096_v34 = vpop.f32.mrb[83].mxu1 }
 0x5c6   : > { %v5097_v37 = vadd.f32 %v11705_v13, %v5096_v34 }
 0x5c7   : > { %v5108_v39 = vmax.f32 %v4918_v3, %v5102_v33 }
 0x5c8   : > { %v5107_v41 = vmax.f32 %v4917_v12, %v5097_v37  ;;  %v9237_v42 = vpop.f32.mrb[84].mxu1 }
 0x5c9   : > { %v5282_v43 = vadd.f32 %v9237_v42, %v11705_v13  ;;  %v5276_v45 = vpop.f32.mrb[85].mxu1 }
 0x5ca   : > { %v5277_v47 = vadd.f32 %v11705_v13, %v5276_v45 }
 0x5cb   : > { %v5296_v48 = vmax.f32 %v5106_v24, %v5282_v43 }
 0x5cc   : > { %v5295_v60 = vmax.f32 %v5105_v25, %v5277_v47  ;;  %v9240_v62 = vpop.f32.mrb[86].mxu1 }
 0x5cd   : > { %v5292_v63 = vadd.f32 %v9240_v62, %v11705_v13  ;;  %v5286_v4 = vpop.f32.mrb[87].mxu1 }
 0x5ce   : > { %v5287_v21 = vadd.f32 %v11705_v13, %v5286_v4 }
 0x5cf   : > { %v5298_v23 = vmax.f32 %v5108_v39, %v5292_v63 }
 0x5d0   : > { %v5297_v46 = vmax.f32 %v5107_v41, %v5287_v21  ;;  %v9265_v5 = vpop.f32.mrb[88].mxu1 }
 0x5d1   : > { %v5472_v51 = vadd.f32 %v9265_v5, %v11705_v13  ;;  %v5466_v29 = vpop.f32.mrb[89].mxu1 }
 0x5d2   : > { %v5467_v49 = vadd.f32 %v11705_v13, %v5466_v29 }
 0x5d3   : > { %v5486_v1 = vmax.f32 %v5296_v48, %v5472_v51 }
 0x5d4   : > { %v5485_v31 = vmax.f32 %v5295_v60, %v5467_v49  ;;  %v9268_v56 = vpop.f32.mrb[90].mxu1 }
 0x5d5   : > { %v5482_v18 = vadd.f32 %v9268_v56, %v11705_v13  ;;  %v5476_v27 = vpop.f32.mrb[91].mxu1 }
 0x5d6   : > { %v5477_v52 = vadd.f32 %v11705_v13, %v5476_v27 }
 0x5d7   : > { %v5488_v55 = vmax.f32 %v5298_v23, %v5482_v18 }
 0x5d8   : > { %v5487_v28 = vmax.f32 %v5297_v46, %v5477_v52  ;;  %v9293_v2 = vpop.f32.mrb[92].mxu1 }
 0x5d9   : > { %v5662_v0 = vadd.f32 %v9293_v2, %v11705_v13  ;;  %v5656_v10 = vpop.f32.mrb[93].mxu1 }
 0x5da   : > { %v5657_v14 = vadd.f32 %v11705_v13, %v5656_v10 }
 0x5db   : > { %v5676_v44 = vmax.f32 %v5486_v1, %v5662_v0 }
 0x5dc   : > { %v5675_v19 = vmax.f32 %v5485_v31, %v5657_v14  ;;  %v9296_v8 = vpop.f32.mrb[94].mxu1 }
 0x5dd   : > { %v5672_v35 = vadd.f32 %v9296_v8, %v11705_v13  ;;  %v5666_v36 = vpop.f32.mrb[95].mxu1 }
 0x5de   : > { %v5667_v6 = vadd.f32 %v11705_v13, %v5666_v36 }
 0x5df   : > { %v5678_v38 = vmax.f32 %v5488_v55, %v5672_v35 }
 0x5e0   : > { %v5677_v9 = vmax.f32 %v5487_v28, %v5667_v6  ;;  %v9321_v54 = vpop.f32.mrb[96].mxu1 }
 0x5e1   : > { %v5852_v53 = vadd.f32 %v9321_v54, %v11705_v13  ;;  %v5846_v50 = vpop.f32.mrb[97].mxu1 }
 0x5e2   : > { %v5847_v30 = vadd.f32 %v11705_v13, %v5846_v50 }
 0x5e3   : > { %v5866_v40 = vmax.f32 %v5676_v44, %v5852_v53 }
 0x5e4   : > { %v5865_v57 = vmax.f32 %v5675_v19, %v5847_v30  ;;  %v9324_v58 = vpop.f32.mrb[98].mxu1 }
 0x5e5   : > { %v5862_v59 = vadd.f32 %v9324_v58, %v11705_v13  ;;  %v5856_v61 = vpop.f32.mrb[99].mxu1 }
 0x5e6   : > { %v5857_v3 = vadd.f32 %v11705_v13, %v5856_v61 }
 0x5e7   : > { %v5868_v7 = vmax.f32 %v5678_v38, %v5862_v59 }
 0x5e8   : > { %v5867_v11 = vmax.f32 %v5677_v9, %v5857_v3  ;;  %v9349_v12 = vpop.f32.mrb[100].mxu1 }
 0x5e9   : > { %v6042_v15 = vadd.f32 %v9349_v12, %v11705_v13  ;;  %v6036_v16 = vpop.f32.mrb[101].mxu1 }
 0x5ea   : > { %v6037_v17 = vadd.f32 %v11705_v13, %v6036_v16 }
 0x5eb   : > { %v6056_v20 = vmax.f32 %v5866_v40, %v6042_v15 }
 0x5ec   : > { %v6055_v22 = vmax.f32 %v5865_v57, %v6037_v17  ;;  %v9352_v24 = vpop.f32.mrb[102].mxu1 }
 0x5ed   : > { %v6052_v25 = vadd.f32 %v9352_v24, %v11705_v13  ;;  %v6046_v26 = vpop.f32.mrb[103].mxu1 }
 0x5ee   : > { %v6047_v32 = vadd.f32 %v11705_v13, %v6046_v26 }
 0x5ef   : > { %v6058_v33 = vmax.f32 %v5868_v7, %v6052_v25 }
 0x5f0   : > { %v6057_v34 = vmax.f32 %v5867_v11, %v6047_v32  ;;  %v9377_v37 = vpop.f32.mrb[104].mxu1 }
 0x5f1   : > { %v6232_v39 = vadd.f32 %v9377_v37, %v11705_v13  ;;  %v6226_v41 = vpop.f32.mrb[105].mxu1 }
 0x5f2   : > { %v6227_v42 = vadd.f32 %v11705_v13, %v6226_v41 }
 0x5f3   : > { %v6246_v43 = vmax.f32 %v6056_v20, %v6232_v39 }
 0x5f4   : > { %v6245_v45 = vmax.f32 %v6055_v22, %v6227_v42  ;;  %v9380_v47 = vpop.f32.mrb[106].mxu1 }
 0x5f5   : > { %v6242_v48 = vadd.f32 %v9380_v47, %v11705_v13  ;;  %v6236_v60 = vpop.f32.mrb[107].mxu1 }
 0x5f6   : > { %v6237_v62 = vadd.f32 %v11705_v13, %v6236_v60 }
 0x5f7   : > { %v6248_v63 = vmax.f32 %v6058_v33, %v6242_v48 }
 0x5f8   : > { %v6247_v4 = vmax.f32 %v6057_v34, %v6237_v62  ;;  %v9405_v21 = vpop.f32.mrb[108].mxu1 }
 0x5f9   : > { %v6422_v23 = vadd.f32 %v9405_v21, %v11705_v13  ;;  %v6416_v46 = vpop.f32.mrb[109].mxu1 }
 0x5fa   : > { %v6417_v5 = vadd.f32 %v11705_v13, %v6416_v46 }
 0x5fb   : > { %v6436_v51 = vmax.f32 %v6246_v43, %v6422_v23 }
 0x5fc   : > { %v6435_v29 = vmax.f32 %v6245_v45, %v6417_v5  ;;  %v9408_v49 = vpop.f32.mrb[110].mxu1 }
 0x5fd   : > { %v6432_v1 = vadd.f32 %v9408_v49, %v11705_v13  ;;  %v6426_v31 = vpop.f32.mrb[111].mxu1 }
 0x5fe   : > { %v6427_v56 = vadd.f32 %v11705_v13, %v6426_v31 }
 0x5ff   : > { %v6438_v18 = vmax.f32 %v6248_v63, %v6432_v1 }
 0x600   : > { %v6437_v27 = vmax.f32 %v6247_v4, %v6427_v56  ;;  %v9433_v52 = vpop.f32.mrb[112].mxu1 }
 0x601   : > { %v6612_v55 = vadd.f32 %v9433_v52, %v11705_v13  ;;  %v6606_v28 = vpop.f32.mrb[113].mxu1 }
 0x602   : > { %v6607_v2 = vadd.f32 %v11705_v13, %v6606_v28 }
 0x603   : > { %v6626_v0 = vmax.f32 %v6436_v51, %v6612_v55 }
 0x604   : > { %v6625_v10 = vmax.f32 %v6435_v29, %v6607_v2  ;;  %v9436_v14 = vpop.f32.mrb[114].mxu1 }
 0x605   : > { %v6622_v44 = vadd.f32 %v9436_v14, %v11705_v13  ;;  %v6616_v19 = vpop.f32.mrb[115].mxu1 }
 0x606   : > { %v6617_v8 = vadd.f32 %v11705_v13, %v6616_v19 }
 0x607   : > { %v6628_v35 = vmax.f32 %v6438_v18, %v6622_v44 }
 0x608   : > { %v6627_v36 = vmax.f32 %v6437_v27, %v6617_v8  ;;  %v9461_v6 = vpop.f32.mrb[116].mxu1 }
 0x609   : > { %v6802_v38 = vadd.f32 %v9461_v6, %v11705_v13  ;;  %v6796_v9 = vpop.f32.mrb[117].mxu1 }
 0x60a   : > { %v6797_v54 = vadd.f32 %v11705_v13, %v6796_v9 }
 0x60b   : > { %v6816_v53 = vmax.f32 %v6626_v0, %v6802_v38 }
 0x60c   : > { %v6815_v50 = vmax.f32 %v6625_v10, %v6797_v54  ;;  %v9464_v30 = vpop.f32.mrb[118].mxu1 }
 0x60d   : > { %v6812_v40 = vadd.f32 %v9464_v30, %v11705_v13  ;;  %v6806_v57 = vpop.f32.mrb[119].mxu1 }
 0x60e   : > { %v6807_v58 = vadd.f32 %v11705_v13, %v6806_v57 }
 0x60f   : > { %v6818_v59 = vmax.f32 %v6628_v35, %v6812_v40 }
 0x610   : > { %v6817_v61 = vmax.f32 %v6627_v36, %v6807_v58  ;;  %v9489_v3 = vpop.f32.mrb[120].mxu1 }
 0x611   : > { %v6992_v7 = vadd.f32 %v9489_v3, %v11705_v13  ;;  %v6986_v11 = vpop.f32.mrb[121].mxu1 }
 0x612   : > { %v6987_v12 = vadd.f32 %v11705_v13, %v6986_v11 }
 0x613   : > { %v7006_v15 = vmax.f32 %v6816_v53, %v6992_v7  ;;  %v8099_v7 = vld [vmem:[%s11813_s13] ss:$0 sm:$0xff] }
 0x614   : > { %v7005_v16 = vmax.f32 %v6815_v50, %v6987_v12  ;;  %v9492_v17 = vpop.f32.mrb[122].mxu1 }
 0x615   : > { %v7002_v20 = vadd.f32 %v9492_v17, %v11705_v13  ;;  %v6996_v22 = vpop.f32.mrb[123].mxu1 }
 0x616   : > { %v6997_v24 = vadd.f32 %v11705_v13, %v6996_v22 }
 0x617   : > { %v7008_v25 = vmax.f32 %v6818_v59, %v7002_v20 }
 0x618   : > { %v7007_v26 = vmax.f32 %v6817_v61, %v6997_v24  ;;  %v9517_v32 = vpop.f32.mrb[124].mxu1 }
 0x619   : > { %v7182_v33 = vadd.f32 %v9517_v32, %v11705_v13  ;;  %v7176_v34 = vpop.f32.mrb[125].mxu1 }
 0x61a   : > { %v7177_v37 = vadd.f32 %v11705_v13, %v7176_v34 }
 0x61b   : > { %v7196_v39 = vmax.f32 %v7006_v15, %v7182_v33 }
 0x61c   : > { %v7195_v41 = vmax.f32 %v7005_v16, %v7177_v37  ;;  %v9520_v42 = vpop.f32.mrb[126].mxu1 }
 0x61d   : > { %v7192_v43 = vadd.f32 %v9520_v42, %v11705_v13  ;;  %v7186_v45 = vpop.f32.mrb[127].mxu1 }
 0x61e   : > { %v7187_v47 = vadd.f32 %v11705_v13, %v7186_v45 }
 0x61f   : > { %v7198_v48 = vmax.f32 %v7008_v25, %v7192_v43 }
 0x620   : > { %v7197_v60 = vmax.f32 %v7007_v26, %v7187_v47  ;;  %v9545_v62 = vpop.f32.mrb[128].mxu1 }
 0x621   : > { %v7372_v63 = vadd.f32 %v9545_v62, %v11705_v13  ;;  %v7366_v4 = vpop.f32.mrb[129].mxu1 }
 0x622   : > { %v7367_v21 = vadd.f32 %v11705_v13, %v7366_v4 }
 0x623   : > { %v7386_v23 = vmax.f32 %v7196_v39, %v7372_v63 }
 0x624   : > { %v7385_v46 = vmax.f32 %v7195_v41, %v7367_v21  ;;  %v9548_v5 = vpop.f32.mrb[130].mxu1 }
 0x625   : > { %v7382_v51 = vadd.f32 %v9548_v5, %v11705_v13  ;;  %v7376_v29 = vpop.f32.mrb[131].mxu1 }
 0x626   : > { %v7377_v49 = vadd.f32 %v11705_v13, %v7376_v29 }
 0x627   : > { %v7388_v1 = vmax.f32 %v7198_v48, %v7382_v51 }
 0x628   : > { %v7387_v31 = vmax.f32 %v7197_v60, %v7377_v49  ;;  %v9573_v56 = vpop.f32.mrb[132].mxu1 }
 0x629   : > { %v7562_v18 = vadd.f32 %v9573_v56, %v11705_v13  ;;  %v7556_v27 = vpop.f32.mrb[133].mxu1 }
 0x62a   : > { %v7557_v52 = vadd.f32 %v11705_v13, %v7556_v27 }
 0x62b   : > { %v7576_v55 = vmax.f32 %v7386_v23, %v7562_v18 }
 0x62c   : > { %v7575_v28 = vmax.f32 %v7385_v46, %v7557_v52  ;;  %v9576_v2 = vpop.f32.mrb[134].mxu1 }
 0x62d   : > { %v7580_v0 = vmax.f32 %v7576_v55, 0.0  ;;  %v7572_v10 = vadd.f32 %v9576_v2, %v11705_v13  ;;  %v7566_v14 = vpop.f32.mrb[135].mxu1 }
 0x62e   : > { %v7579_v44 = vmax.f32 %v7575_v28, 0.0  ;;  %v7567_v19 = vadd.f32 %v11705_v13, %v7566_v14 }
 0x62f   : > { %v7584_v8 = vsel %vm732_vm2, %v7580_v0, -inf  ;;  %v7578_v35 = vmax.f32 %v7388_v1, %v7572_v10 }
 0x630   : > { %v7583_v36 = vsel %vm732_vm2, %v7579_v44, -inf  ;;  %v7577_v6 = vmax.f32 %v7387_v31, %v7567_v19 }
 0x631   : > { %v7587_v38 = vmax.f32 %v7583_v36, %v7584_v8  ;;  %v7582_v9 = vmax.f32 %v7578_v35, 0.0 }
 0x632   : > { %v7581_v54 = vmax.f32 %v7577_v6, 0.0 }
 0x633   : > { %v7586_v53 = vsel %vm732_vm2, %v7582_v9, -inf }
 0x634   : > { %v7585_v50 = vsel %vm732_vm2, %v7581_v54, -inf }
 0x635   : > { %v7588_v30 = vmax.f32 %v7585_v50, %v7586_v53 }
 0x637   : > { %v7589_v40 = vmax.f32 %v7587_v38, %v7588_v30 }
 0x639   : > { %v7590_v57 = vrot.slane %v7589_v40, 4 }
 0x63b   : > { %v7591_v58 = vmax.f32 %v7589_v40, %v7590_v57 }
 0x63d   : > { %v7592_v13 = vrot.slane %v7591_v58, 2 }
 0x63f   : > { %v7593_v59 = vmax.f32 %v7591_v58, %v7592_v13 }
 0x641   : > { %v7594_v61 = vrot.slane %v7593_v59, 1 }
 0x643   : > { %v7595_v3 = vmax.f32 %v7593_v59, %v7594_v61 }
 0x645   : > { %9586 = vmatmul.mubr.msk.f32.vlgmr.msra.gmra.mrb[136].mxu0 %vm732_vm2, %v7595_v3 }
 0x718   : > { %v7676_v11 = vpop.f32.mrb[136].mxu0 }
 0x719   : > { %v7677_v12 = vadd.f32 %v8099_v7, %v7676_v11  ;;  %v9587_v15 = vpop.f32.mrb[137].mxu0 }
 0x71b   : > { %7680 = vst [vmem:[%s489_s18] sm:$0xff] %v7677_v12 }
 0x71c PF: > { %s24_s29 = sadd.s32 1, %s10179_s29  }
 0x71d   : > { %p21_p5 = scmp.ge.s32.totalorder %s24_s29, 4  }
 0x71f   :  { %23 = sbr.rel (!%p21_p5) target bundleno = 1 (0x1), region = 109 }

</bundles_post_ra>
